<compile_context>
chip_gen: v7x
topology: tpu7x:2x2x1
jax: 0.10.0
libtpu: 0.0.40
codegen_flags: <defaults>
</compile_context>

<pallas_src>
import math
import numpy as np

import jax
import jax.numpy as jnp
from jax import lax
from jax.experimental import pallas as pl
from jax.experimental.pallas import tpu as pltpu

F32 = jnp.float32

# ----------------------------------------------------------------------------- 
# Configuration (small shapes, consistent with the module's constructor args)
# -----------------------------------------------------------------------------
SR = 16000
N_FFT = 512            # l_grain (kept small for the test)
HOP = 128              # mfcc_hop_size
SYNTH_WINDOW = 128     # synth_window (chosen so the [:n_frames] slice is well formed)
N_MELS = 128           # fixed: cnn1 expects 128 input channels
Z_DIM = 128
N_FREQ = N_FFT // 2 + 1
F_PAD = ((N_FREQ + 127) // 128) * 128      # pad freq axis to lane multiple (384)

_HANN = (0.5 - 0.5 * np.cos(2.0 * np.pi * np.arange(N_FFT) / N_FFT)).astype(np.float32)


# ----------------------------------------------------------------------------- 
# Host-side constant matrices: windowed real-DFT + slaney mel filterbank
# -----------------------------------------------------------------------------
def _hz_to_mel_slaney(freq):
    f_sp = 200.0 / 3
    min_log_hz = 1000.0
    min_log_mel = min_log_hz / f_sp
    logstep = math.log(6.4) / 27.0
    freq = np.asarray(freq, dtype=np.float64)
    mel = freq / f_sp
    return np.where(freq >= min_log_hz,
                    min_log_mel + np.log(np.maximum(freq, min_log_hz) / min_log_hz) / logstep,
                    mel)


def _mel_to_hz_slaney(mel):
    f_sp = 200.0 / 3
    min_log_hz = 1000.0
    min_log_mel = min_log_hz / f_sp
    logstep = math.log(6.4) / 27.0
    mel = np.asarray(mel, dtype=np.float64)
    return np.where(mel >= min_log_mel,
                    min_log_hz * np.exp(logstep * (mel - min_log_mel)),
                    mel * f_sp)


def _slaney_mel_filterbank(n_freqs, n_mels, sr, f_min=0.0, f_max=None):
    # matches torchaudio.functional.melscale_fbanks(mel_scale='slaney', norm='slaney')
    if f_max is None:
        f_max = sr / 2.0
    all_freqs = np.linspace(0.0, sr / 2.0, n_freqs)
    m_pts = np.linspace(_hz_to_mel_slaney(f_min), _hz_to_mel_slaney(f_max), n_mels + 2)
    f_pts = _mel_to_hz_slaney(m_pts)
    f_diff = np.diff(f_pts)                                   # (n_mels+1,)
    slopes = f_pts[None, :] - all_freqs[:, None]              # (n_freqs, n_mels+2)
    down = -slopes[:, :-2] / f_diff[:-1]
    up = slopes[:, 2:] / f_diff[1:]
    fb = np.maximum(0.0, np.minimum(down, up))                # (n_freqs, n_mels)
    enorm = 2.0 / (f_pts[2:n_mels + 2] - f_pts[:n_mels])
    return (fb * enorm[None, :]).astype(np.float32)


def _build_dft(n_fft, f_pad):
    n = np.arange(n_fft, dtype=np.float64)[:, None]
    k = np.arange(n_fft // 2 + 1, dtype=np.float64)[None, :]
    ang = 2.0 * np.pi * n * k / n_fft
    w = _HANN.astype(np.float64)[:, None]                     # fold Hann window in
    cos_m = np.zeros((n_fft, f_pad), np.float32)
    sin_m = np.zeros((n_fft, f_pad), np.float32)
    cos_m[:, :n_fft // 2 + 1] = (w * np.cos(ang)).astype(np.float32)
    sin_m[:, :n_fft // 2 + 1] = (w * -np.sin(ang)).astype(np.float32)
    return cos_m, sin_m


_DFT_COS_W, _DFT_SIN_W = _build_dft(N_FFT, F_PAD)
_MEL_FB = _slaney_mel_filterbank(N_FREQ, N_MELS, SR)          # (N_FREQ, N_MELS)
_MEL_FB_PAD = np.zeros((F_PAD, N_MELS), np.float32)
_MEL_FB_PAD[:N_FREQ, :] = _MEL_FB


def frame_audio(audio, n_fft, hop, n_frames):
    """center=True reflect-padded framing (matches torch.stft framing). Pure layout."""
    pad = n_fft // 2
    padded = jnp.pad(audio, ((0, 0), (pad, pad)), mode="reflect")
    idx = (jnp.arange(n_frames) * hop)[:, None] + jnp.arange(n_fft)[None, :]
    return padded[:, idx]                                     # (B, n_frames, n_fft)


# ----------------------------------------------------------------------------- 
# Fused encoder kernel (one program per batch element)
# -----------------------------------------------------------------------------
def encoder_kernel(frames_ref, dcos_ref, dsin_ref, melfb_ref,
                   ln_g_ref, ln_b_ref, sprev_ref, snext_ref,
                   w1_ref, b1_ref, w2_ref, b2_ref, w3_ref, b3_ref,
                   wmu_ref, bmu_ref, wlv_ref, blv_ref, eps_ref,
                   z_ref, mu_ref, logvar_ref):
    x = frames_ref[...]                                       # (T, N_FFT)

    # --- MelSpectrogram(power=2): windowed real DFT (two MXU matmuls) + mel fb ---
    re = jnp.dot(x, dcos_ref[...], preferred_element_type=jnp.float32)
    im = jnp.dot(x, dsin_ref[...], preferred_element_type=jnp.float32)
    power = re * re + im * im                                 # (T, F_PAD)
    mel = jnp.dot(power, melfb_ref[...], preferred_element_type=jnp.float32)   # (T, N_MELS)

    # --- LayerNorm over the mel axis (one-pass stats) ---
    mean = jnp.mean(mel, axis=-1, keepdims=True)
    ex2 = jnp.mean(mel * mel, axis=-1, keepdims=True)
    var = ex2 - mean * mean
    h = (mel - mean) * lax.rsqrt(var + 1e-5) * ln_g_ref[...] + ln_b_ref[...]

    sprev = sprev_ref[...]        # (T, T): (sprev @ h)[t] = h[t-1], zero at t=0
    snext = snext_ref[...]        # (T, T): (snext @ h)[t] = h[t+1], zero at t=T-1

    def conv_bn_act(h_in, w_ref, b_ref):
        # Conv1d(k=3, pad=1) along time as 3 matmuls; eval-mode BatchNorm and the
        # conv bias are pre-folded into w/b in the wrapper.
        h_prev = jnp.dot(sprev, h_in, preferred_element_type=jnp.float32)
        h_next = jnp.dot(snext, h_in, preferred_element_type=jnp.float32)
        y = (jnp.dot(h_prev, w_ref[0], preferred_element_type=jnp.float32)
             + jnp.dot(h_in, w_ref[1], preferred_element_type=jnp.float32)
             + jnp.dot(h_next, w_ref[2], preferred_element_type=jnp.float32)
             + b_ref[...])
        return jnp.where(y >= 0.0, y, 0.2 * y)                # LeakyReLU(0.2)

    h = conv_bn_act(h, w1_ref, b1_ref)                        # (T, 64)
    h = conv_bn_act(h, w2_ref, b2_ref)                        # (T, 32)
    h = conv_bn_act(h, w3_ref, b3_ref)                        # (T, 16)

    mu = jnp.dot(h, wmu_ref[...], preferred_element_type=jnp.float32) + bmu_ref[...]
    logvar = jnp.dot(h, wlv_ref[...], preferred_element_type=jnp.float32) + blv_ref[...]
    # TODO(synk): torch.randn_like sampling is supplied as a deterministic `eps` input;
    #             in-kernel RNG via pltpu.prng_seed/prng_random_bits would also work.
    z = mu + eps_ref[...] * jnp.exp(0.5 * logvar)

    z_ref[...] = z
    mu_ref[...] = mu
    logvar_ref[...] = logvar


# ----------------------------------------------------------------------------- 
# Wrapper (== SpectralEncoder_v4.forward, noise_synth='filterbank')
# -----------------------------------------------------------------------------
def spectral_encoder_v4_forward(params, audio, eps):
    B, L = audio.shape
    T = min(L // SYNTH_WINDOW, 1 + L // HOP)                  # n_frames used after slicing
    frames = frame_audio(audio, N_FFT, HOP, T)                # (B, T, N_FFT)

    # Fold eval-mode BatchNorm1d (running stats) + conv bias into each conv's w / b.
    # TODO(synk): training-mode BatchNorm (batch statistics) is not reproduced here.
    def fold(w, b, bn):
        scale = bn["gamma"] * lax.rsqrt(bn["var"] + 1e-5)
        shift = bn["beta"] - bn["mean"] * scale
        return w * scale[None, None, :], (b * scale + shift).reshape(1, -1)

    w1, b1 = fold(params["w1"], params["b1"], params["bn1"])
    w2, b2 = fold(params["w2"], params["b2"], params["bn2"])
    w3, b3 = fold(params["w3"], params["b3"], params["bn3"])

    dcos = jnp.asarray(_DFT_COS_W)
    dsin = jnp.asarray(_DFT_SIN_W)
    melfb = jnp.asarray(_MEL_FB_PAD)
    ln_g = params["ln_g"].reshape(1, -1)
    ln_b = params["ln_b"].reshape(1, -1)
    sprev = jnp.asarray(np.eye(T, k=-1, dtype=np.float32))
    snext = jnp.asarray(np.eye(T, k=1, dtype=np.float32))
    wmu = params["wmu"]
    bmu = params["bmu"].reshape(1, -1)
    wlv = params["wlv"]
    blv = params["blv"].reshape(1, -1)

    args = (frames, dcos, dsin, melfb, ln_g, ln_b, sprev, snext,
            w1, b1, w2, b2, w3, b3, wmu, bmu, wlv, blv, eps)

    def _const_spec(a):
        zeros = (0,) * a.ndim
        return pl.BlockSpec(tuple(a.shape), lambda b, _z=zeros: _z)

    def _batched_spec(a):
        return pl.BlockSpec((None,) + tuple(a.shape[1:]), lambda b: (b, 0, 0))

    in_specs = ([_batched_spec(frames)]
                + [_const_spec(a) for a in args[1:18]]
                + [_batched_spec(eps)])
    out_specs = tuple(pl.BlockSpec((None, T, Z_DIM), lambda b: (b, 0, 0)) for _ in range(3))
    out_shape = tuple(jax.ShapeDtypeStruct((B, T, Z_DIM), F32) for _ in range(3))

    z, mu, logvar = pl.pallas_call(
        encoder_kernel,
        grid=(B,),
        out_shape=out_shape,
        in_specs=in_specs,
        out_specs=out_specs,
        compiler_params=pltpu.CompilerParams(dimension_semantics=("parallel",)),
    )(*args)
    return z, mu, logvar


# ----------------------------------------------------------------------------- 
# Synthetic parameters (deterministic)
# -----------------------------------------------------------------------------
def init_params(key, n_mels=N_MELS, z_dim=Z_DIM):
    ks = iter(jax.random.split(key, 32))

    def nrm(shape, scale=0.1):
        return scale * jax.random.normal(next(ks), shape, F32)

    p = {"ln_g": 1.0 + nrm((n_mels,)), "ln_b": nrm((n_mels,))}
    for i, (ci, co) in enumerate(((n_mels, 64), (64, 32), (32, 16)), start=1):
        p[f"w{i}"] = nrm((3, ci, co))                 # (tap, C_in, C_out)
        p[f"b{i}"] = nrm((co,))
        p[f"bn{i}"] = dict(gamma=1.0 + nrm((co,)), beta=nrm((co,)),
                           mean=nrm((co,)), var=1.0 + jnp.abs(nrm((co,))))
    p["wmu"] = nrm((16, z_dim)); p["bmu"] = nrm((z_dim,))
    p["wlv"] = nrm((16, z_dim)); p["blv"] = nrm((z_dim,))
    return p


# ----------------------------------------------------------------------------- 
# Pure-JAX reference (independent path: rfft + explicit conv/BN)
# -----------------------------------------------------------------------------
def _ref_forward(params, audio, eps):
    B, L = audio.shape
    T = min(L // SYNTH_WINDOW, 1 + L // HOP)
    frames = frame_audio(audio, N_FFT, HOP, T)
    spec = jnp.fft.rfft(frames * jnp.asarray(_HANN), axis=-1)
    power = jnp.real(spec) ** 2 + jnp.imag(spec) ** 2
    mel = power @ jnp.asarray(_MEL_FB)                                  # (B, T, N_MELS)

    mean = mel.mean(-1, keepdims=True)
    var = ((mel - mean) ** 2).mean(-1, keepdims=True)
    h = (mel - mean) / jnp.sqrt(var + 1e-5) * params["ln_g"] + params["ln_b"]

    def conv_bn_act(h_in, w, b, bn):
        hp = jnp.pad(h_in, ((0, 0), (1, 1), (0, 0)))
        y = hp[:, :-2] @ w[0] + hp[:, 1:-1] @ w[1] + hp[:, 2:] @ w[2] + b
        y = (y - bn["mean"]) / jnp.sqrt(bn["var"] + 1e-5) * bn["gamma"] + bn["beta"]
        return jnp.where(y >= 0.0, y, 0.2 * y)

    h = conv_bn_act(h, params["w1"], params["b1"], params["bn1"])
    h = conv_bn_act(h, params["w2"], params["b2"], params["bn2"])
    h = conv_bn_act(h, params["w3"], params["b3"], params["bn3"])
    mu = h @ params["wmu"] + params["bmu"]
    logvar = h @ params["wlv"] + params["blv"]
    z = mu + eps * jnp.exp(0.5 * logvar)
    return z, mu, logvar


# -----------------------------------------------------------------------------
if __name__ == "__main__":
    B, L = 2, 2048

    key = jax.random.PRNGKey(0)
    k_params, k_audio, k_eps = jax.random.split(key, 3)
    params = init_params(k_params)
    audio = jax.random.normal(k_audio, (B, L), F32)
    T = min(L // SYNTH_WINDOW, 1 + L // HOP)                            # 16
    eps = jax.random.normal(k_eps, (B, T, Z_DIM), F32)

    z, mu, logvar = jax.jit(spectral_encoder_v4_forward)(params, audio, eps)
    jax.block_until_ready((z, mu, logvar))

    z_r, mu_r, lv_r = _ref_forward(params, audio, eps)
    assert z.shape == (B, T, Z_DIM) and mu.shape == (B, T, Z_DIM) and logvar.shape == (B, T, Z_DIM)
    assert jnp.allclose(mu, mu_r, atol=2e-2, rtol=2e-2)
    assert jnp.allclose(logvar, lv_r, atol=2e-2, rtol=2e-2)
    assert jnp.allclose(z, z_r, atol=2e-2, rtol=2e-2)

    print("KERNEL_OK")
</pallas_src>

<mosaic_0001>
module attributes {stable_mosaic.version = 11 : i64} {
  func.func @encoder_kernel(%arg0: i32, %arg1: memref<1x16x512xf32, #tpu.memory_space<vmem>>, %arg2: memref<512x384xf32, #tpu.memory_space<vmem>>, %arg3: memref<512x384xf32, #tpu.memory_space<vmem>>, %arg4: memref<384x128xf32, #tpu.memory_space<vmem>>, %arg5: memref<1x128xf32, #tpu.memory_space<vmem>>, %arg6: memref<1x128xf32, #tpu.memory_space<vmem>>, %arg7: memref<16x16xf32, #tpu.memory_space<vmem>>, %arg8: memref<16x16xf32, #tpu.memory_space<vmem>>, %arg9: memref<3x128x64xf32, #tpu.memory_space<vmem>>, %arg10: memref<1x64xf32, #tpu.memory_space<vmem>>, %arg11: memref<3x64x32xf32, #tpu.memory_space<vmem>>, %arg12: memref<1x32xf32, #tpu.memory_space<vmem>>, %arg13: memref<3x32x16xf32, #tpu.memory_space<vmem>>, %arg14: memref<1x16xf32, #tpu.memory_space<vmem>>, %arg15: memref<16x128xf32, #tpu.memory_space<vmem>>, %arg16: memref<1x128xf32, #tpu.memory_space<vmem>>, %arg17: memref<16x128xf32, #tpu.memory_space<vmem>>, %arg18: memref<1x128xf32, #tpu.memory_space<vmem>>, %arg19: memref<1x16x128xf32, #tpu.memory_space<vmem>>, %arg20: memref<1x16x128xf32, #tpu.memory_space<vmem>>, %arg21: memref<1x16x128xf32, #tpu.memory_space<vmem>>, %arg22: memref<1x16x128xf32, #tpu.memory_space<vmem>>) attributes {dimension_semantics = [#tpu.dimension_semantics<parallel>], iteration_bounds = array<i64: 2>, scalar_prefetch = 0 : i64, scratch_operands = 0 : i64, tpu.core_type = #tpu.core_type<tc>, window_params = [{transform_indices = @transform_0, window_bounds = array<i64: 1, 16, 512>}, {pipeline_mode = #tpu.pipeline_mode<synchronous>, transform_indices = @transform_1, window_bounds = array<i64: 512, 384>}, {pipeline_mode = #tpu.pipeline_mode<synchronous>, transform_indices = @transform_2, window_bounds = array<i64: 512, 384>}, {pipeline_mode = #tpu.pipeline_mode<synchronous>, transform_indices = @transform_3, window_bounds = array<i64: 384, 128>}, {pipeline_mode = #tpu.pipeline_mode<synchronous>, transform_indices = @transform_4, window_bounds = array<i64: 1, 128>}, {pipeline_mode = #tpu.pipeline_mode<synchronous>, transform_indices = @transform_5, window_bounds = array<i64: 1, 128>}, {pipeline_mode = #tpu.pipeline_mode<synchronous>, transform_indices = @transform_6, window_bounds = array<i64: 16, 16>}, {pipeline_mode = #tpu.pipeline_mode<synchronous>, transform_indices = @transform_7, window_bounds = array<i64: 16, 16>}, {pipeline_mode = #tpu.pipeline_mode<synchronous>, transform_indices = @transform_8, window_bounds = array<i64: 3, 128, 64>}, {pipeline_mode = #tpu.pipeline_mode<synchronous>, transform_indices = @transform_9, window_bounds = array<i64: 1, 64>}, {pipeline_mode = #tpu.pipeline_mode<synchronous>, transform_indices = @transform_10, window_bounds = array<i64: 3, 64, 32>}, {pipeline_mode = #tpu.pipeline_mode<synchronous>, transform_indices = @transform_11, window_bounds = array<i64: 1, 32>}, {pipeline_mode = #tpu.pipeline_mode<synchronous>, transform_indices = @transform_12, window_bounds = array<i64: 3, 32, 16>}, {pipeline_mode = #tpu.pipeline_mode<synchronous>, transform_indices = @transform_13, window_bounds = array<i64: 1, 16>}, {pipeline_mode = #tpu.pipeline_mode<synchronous>, transform_indices = @transform_14, window_bounds = array<i64: 16, 128>}, {pipeline_mode = #tpu.pipeline_mode<synchronous>, transform_indices = @transform_15, window_bounds = array<i64: 1, 128>}, {pipeline_mode = #tpu.pipeline_mode<synchronous>, transform_indices = @transform_16, window_bounds = array<i64: 16, 128>}, {pipeline_mode = #tpu.pipeline_mode<synchronous>, transform_indices = @transform_17, window_bounds = array<i64: 1, 128>}, {transform_indices = @transform_18, window_bounds = array<i64: 1, 16, 128>}, {transform_indices = @transform_19, window_bounds = array<i64: 1, 16, 128>}, {transform_indices = @transform_20, window_bounds = array<i64: 1, 16, 128>}, {transform_indices = @transform_21, window_bounds = array<i64: 1, 16, 128>}]} {
    %c0 = arith.constant 0 : index
    %c0_0 = arith.constant 0 : index
    %c0_1 = arith.constant 0 : index
    %0 = vector.load %arg1[%c0, %c0_0, %c0_1] : memref<1x16x512xf32, #tpu.memory_space<vmem>>, vector<1x16x512xf32>
    %1 = vector.shape_cast %0 : vector<1x16x512xf32> to vector<16x512xf32>
    %c0_2 = arith.constant 0 : index
    %c0_3 = arith.constant 0 : index
    %2 = vector.load %arg2[%c0_2, %c0_3] : memref<512x384xf32, #tpu.memory_space<vmem>>, vector<512x384xf32>
    %cst = arith.constant dense<0.000000e+00> : vector<16x384xf32>
    %3 = tpu.matmul %1, %2, %cst {dimension_numbers = #tpu.dot_dimension_numbers<[1], [0], [0], [1], [0, 0, 1, 1], [], []>} : vector<16x512xf32>, vector<512x384xf32>, vector<16x384xf32> -> vector<16x384xf32>
    %c0_4 = arith.constant 0 : index
    %c0_5 = arith.constant 0 : index
    %4 = vector.load %arg3[%c0_4, %c0_5] : memref<512x384xf32, #tpu.memory_space<vmem>>, vector<512x384xf32>
    %cst_6 = arith.constant dense<0.000000e+00> : vector<16x384xf32>
    %5 = tpu.matmul %1, %4, %cst_6 {dimension_numbers = #tpu.dot_dimension_numbers<[1], [0], [0], [1], [0, 0, 1, 1], [], []>} : vector<16x512xf32>, vector<512x384xf32>, vector<16x384xf32> -> vector<16x384xf32>
    %6 = arith.mulf %3, %3 : vector<16x384xf32>
    %7 = arith.mulf %5, %5 : vector<16x384xf32>
    %8 = arith.addf %6, %7 : vector<16x384xf32>
    %c0_7 = arith.constant 0 : index
    %c0_8 = arith.constant 0 : index
    %9 = vector.load %arg4[%c0_7, %c0_8] : memref<384x128xf32, #tpu.memory_space<vmem>>, vector<384x128xf32>
    %cst_9 = arith.constant dense<0.000000e+00> : vector<16x128xf32>
    %10 = tpu.matmul %8, %9, %cst_9 {dimension_numbers = #tpu.dot_dimension_numbers<[1], [0], [0], [1], [0, 0, 1, 1], [], []>} : vector<16x384xf32>, vector<384x128xf32>, vector<16x128xf32> -> vector<16x128xf32>
    %cst_10 = arith.constant dense<0.000000e+00> : vector<16xf32>
    %11 = vector.multi_reduction <add>, %10, %cst_10 [1] : vector<16x128xf32> to vector<16xf32>
    %12 = vector.shape_cast %11 : vector<16xf32> to vector<16x1xf32>
    %cst_11 = arith.constant 1.280000e+02 : f32
    %13 = vector.broadcast %cst_11 : f32 to vector<16x1xf32>
    %14 = arith.divf %12, %13 : vector<16x1xf32>
    %15 = arith.mulf %10, %10 : vector<16x128xf32>
    %cst_12 = arith.constant dense<0.000000e+00> : vector<16xf32>
    %16 = vector.multi_reduction <add>, %15, %cst_12 [1] : vector<16x128xf32> to vector<16xf32>
    %17 = vector.shape_cast %16 : vector<16xf32> to vector<16x1xf32>
    %cst_13 = arith.constant 1.280000e+02 : f32
    %18 = vector.broadcast %cst_13 : f32 to vector<16x1xf32>
    %19 = arith.divf %17, %18 : vector<16x1xf32>
    %20 = arith.mulf %14, %14 : vector<16x1xf32>
    %21 = arith.subf %19, %20 : vector<16x1xf32>
    %22 = vector.broadcast %14 : vector<16x1xf32> to vector<16x128xf32>
    %23 = arith.subf %10, %22 : vector<16x128xf32>
    %cst_14 = arith.constant 9.99999974E-6 : f32
    %24 = vector.broadcast %cst_14 : f32 to vector<16x1xf32>
    %25 = arith.addf %21, %24 : vector<16x1xf32>
    %26 = math.rsqrt %25 : vector<16x1xf32>
    %27 = vector.broadcast %26 : vector<16x1xf32> to vector<16x128xf32>
    %28 = arith.mulf %23, %27 : vector<16x128xf32>
    %c0_15 = arith.constant 0 : index
    %c0_16 = arith.constant 0 : index
    %29 = vector.load %arg5[%c0_15, %c0_16] : memref<1x128xf32, #tpu.memory_space<vmem>>, vector<1x128xf32>
    %30 = vector.broadcast %29 : vector<1x128xf32> to vector<16x128xf32>
    %31 = arith.mulf %28, %30 : vector<16x128xf32>
    %c0_17 = arith.constant 0 : index
    %c0_18 = arith.constant 0 : index
    %32 = vector.load %arg6[%c0_17, %c0_18] : memref<1x128xf32, #tpu.memory_space<vmem>>, vector<1x128xf32>
    %33 = vector.broadcast %32 : vector<1x128xf32> to vector<16x128xf32>
    %34 = arith.addf %31, %33 : vector<16x128xf32>
    %c0_19 = arith.constant 0 : index
    %c0_20 = arith.constant 0 : index
    %35 = vector.load %arg7[%c0_19, %c0_20] : memref<16x16xf32, #tpu.memory_space<vmem>>, vector<16x16xf32>
    %c0_21 = arith.constant 0 : index
    %c0_22 = arith.constant 0 : index
    %36 = vector.load %arg8[%c0_21, %c0_22] : memref<16x16xf32, #tpu.memory_space<vmem>>, vector<16x16xf32>
    %cst_23 = arith.constant dense<0.000000e+00> : vector<16x128xf32>
    %37 = tpu.matmul %35, %34, %cst_23 {dimension_numbers = #tpu.dot_dimension_numbers<[1], [0], [0], [1], [0, 0, 1, 1], [], []>} : vector<16x16xf32>, vector<16x128xf32>, vector<16x128xf32> -> vector<16x128xf32>
    %cst_24 = arith.constant dense<0.000000e+00> : vector<16x128xf32>
    %38 = tpu.matmul %36, %34, %cst_24 {dimension_numbers = #tpu.dot_dimension_numbers<[1], [0], [0], [1], [0, 0, 1, 1], [], []>} : vector<16x16xf32>, vector<16x128xf32>, vector<16x128xf32> -> vector<16x128xf32>
    %c0_25 = arith.constant 0 : index
    %c0_26 = arith.constant 0 : index
    %c0_27 = arith.constant 0 : index
    %39 = vector.load %arg9[%c0_25, %c0_26, %c0_27] : memref<3x128x64xf32, #tpu.memory_space<vmem>>, vector<1x128x64xf32>
    %40 = vector.shape_cast %39 : vector<1x128x64xf32> to vector<128x64xf32>
    %cst_28 = arith.constant dense<0.000000e+00> : vector<16x64xf32>
    %41 = tpu.matmul %37, %40, %cst_28 {dimension_numbers = #tpu.dot_dimension_numbers<[1], [0], [0], [1], [0, 0, 1, 1], [], []>} : vector<16x128xf32>, vector<128x64xf32>, vector<16x64xf32> -> vector<16x64xf32>
    %c1 = arith.constant 1 : index
    %c0_29 = arith.constant 0 : index
    %c0_30 = arith.constant 0 : index
    %42 = vector.load %arg9[%c1, %c0_29, %c0_30] : memref<3x128x64xf32, #tpu.memory_space<vmem>>, vector<1x128x64xf32>
    %43 = vector.shape_cast %42 : vector<1x128x64xf32> to vector<128x64xf32>
    %cst_31 = arith.constant dense<0.000000e+00> : vector<16x64xf32>
    %44 = tpu.matmul %34, %43, %cst_31 {dimension_numbers = #tpu.dot_dimension_numbers<[1], [0], [0], [1], [0, 0, 1, 1], [], []>} : vector<16x128xf32>, vector<128x64xf32>, vector<16x64xf32> -> vector<16x64xf32>
    %45 = arith.addf %41, %44 : vector<16x64xf32>
    %c2 = arith.constant 2 : index
    %c0_32 = arith.constant 0 : index
    %c0_33 = arith.constant 0 : index
    %46 = vector.load %arg9[%c2, %c0_32, %c0_33] : memref<3x128x64xf32, #tpu.memory_space<vmem>>, vector<1x128x64xf32>
    %47 = vector.shape_cast %46 : vector<1x128x64xf32> to vector<128x64xf32>
    %cst_34 = arith.constant dense<0.000000e+00> : vector<16x64xf32>
    %48 = tpu.matmul %38, %47, %cst_34 {dimension_numbers = #tpu.dot_dimension_numbers<[1], [0], [0], [1], [0, 0, 1, 1], [], []>} : vector<16x128xf32>, vector<128x64xf32>, vector<16x64xf32> -> vector<16x64xf32>
    %49 = arith.addf %45, %48 : vector<16x64xf32>
    %c0_35 = arith.constant 0 : index
    %c0_36 = arith.constant 0 : index
    %50 = vector.load %arg10[%c0_35, %c0_36] : memref<1x64xf32, #tpu.memory_space<vmem>>, vector<1x64xf32>
    %51 = vector.broadcast %50 : vector<1x64xf32> to vector<16x64xf32>
    %52 = arith.addf %49, %51 : vector<16x64xf32>
    %cst_37 = arith.constant 0.000000e+00 : f32
    %53 = vector.broadcast %cst_37 : f32 to vector<16x64xf32>
    %54 = arith.cmpf oge, %52, %53 : vector<16x64xf32>
    %cst_38 = arith.constant 2.000000e-01 : f32
    %55 = vector.broadcast %cst_38 : f32 to vector<16x64xf32>
    %56 = arith.mulf %55, %52 : vector<16x64xf32>
    %57 = arith.select %54, %52, %56 : vector<16x64xi1>, vector<16x64xf32>
    %cst_39 = arith.constant dense<0.000000e+00> : vector<16x64xf32>
    %58 = tpu.matmul %35, %57, %cst_39 {dimension_numbers = #tpu.dot_dimension_numbers<[1], [0], [0], [1], [0, 0, 1, 1], [], []>} : vector<16x16xf32>, vector<16x64xf32>, vector<16x64xf32> -> vector<16x64xf32>
    %cst_40 = arith.constant dense<0.000000e+00> : vector<16x64xf32>
    %59 = tpu.matmul %36, %57, %cst_40 {dimension_numbers = #tpu.dot_dimension_numbers<[1], [0], [0], [1], [0, 0, 1, 1], [], []>} : vector<16x16xf32>, vector<16x64xf32>, vector<16x64xf32> -> vector<16x64xf32>
    %c0_41 = arith.constant 0 : index
    %c0_42 = arith.constant 0 : index
    %c0_43 = arith.constant 0 : index
    %60 = vector.load %arg11[%c0_41, %c0_42, %c0_43] : memref<3x64x32xf32, #tpu.memory_space<vmem>>, vector<1x64x32xf32>
    %61 = vector.shape_cast %60 : vector<1x64x32xf32> to vector<64x32xf32>
    %cst_44 = arith.constant dense<0.000000e+00> : vector<16x32xf32>
    %62 = tpu.matmul %58, %61, %cst_44 {dimension_numbers = #tpu.dot_dimension_numbers<[1], [0], [0], [1], [0, 0, 1, 1], [], []>} : vector<16x64xf32>, vector<64x32xf32>, vector<16x32xf32> -> vector<16x32xf32>
    %c1_45 = arith.constant 1 : index
    %c0_46 = arith.constant 0 : index
    %c0_47 = arith.constant 0 : index
    %63 = vector.load %arg11[%c1_45, %c0_46, %c0_47] : memref<3x64x32xf32, #tpu.memory_space<vmem>>, vector<1x64x32xf32>
    %64 = vector.shape_cast %63 : vector<1x64x32xf32> to vector<64x32xf32>
    %cst_48 = arith.constant dense<0.000000e+00> : vector<16x32xf32>
    %65 = tpu.matmul %57, %64, %cst_48 {dimension_numbers = #tpu.dot_dimension_numbers<[1], [0], [0], [1], [0, 0, 1, 1], [], []>} : vector<16x64xf32>, vector<64x32xf32>, vector<16x32xf32> -> vector<16x32xf32>
    %66 = arith.addf %62, %65 : vector<16x32xf32>
    %c2_49 = arith.constant 2 : index
    %c0_50 = arith.constant 0 : index
    %c0_51 = arith.constant 0 : index
    %67 = vector.load %arg11[%c2_49, %c0_50, %c0_51] : memref<3x64x32xf32, #tpu.memory_space<vmem>>, vector<1x64x32xf32>
    %68 = vector.shape_cast %67 : vector<1x64x32xf32> to vector<64x32xf32>
    %cst_52 = arith.constant dense<0.000000e+00> : vector<16x32xf32>
    %69 = tpu.matmul %59, %68, %cst_52 {dimension_numbers = #tpu.dot_dimension_numbers<[1], [0], [0], [1], [0, 0, 1, 1], [], []>} : vector<16x64xf32>, vector<64x32xf32>, vector<16x32xf32> -> vector<16x32xf32>
    %70 = arith.addf %66, %69 : vector<16x32xf32>
    %c0_53 = arith.constant 0 : index
    %c0_54 = arith.constant 0 : index
    %71 = vector.load %arg12[%c0_53, %c0_54] : memref<1x32xf32, #tpu.memory_space<vmem>>, vector<1x32xf32>
    %72 = vector.broadcast %71 : vector<1x32xf32> to vector<16x32xf32>
    %73 = arith.addf %70, %72 : vector<16x32xf32>
    %cst_55 = arith.constant 0.000000e+00 : f32
    %74 = vector.broadcast %cst_55 : f32 to vector<16x32xf32>
    %75 = arith.cmpf oge, %73, %74 : vector<16x32xf32>
    %cst_56 = arith.constant 2.000000e-01 : f32
    %76 = vector.broadcast %cst_56 : f32 to vector<16x32xf32>
    %77 = arith.mulf %76, %73 : vector<16x32xf32>
    %78 = arith.select %75, %73, %77 : vector<16x32xi1>, vector<16x32xf32>
    %cst_57 = arith.constant dense<0.000000e+00> : vector<16x32xf32>
    %79 = tpu.matmul %35, %78, %cst_57 {dimension_numbers = #tpu.dot_dimension_numbers<[1], [0], [0], [1], [0, 0, 1, 1], [], []>} : vector<16x16xf32>, vector<16x32xf32>, vector<16x32xf32> -> vector<16x32xf32>
    %cst_58 = arith.constant dense<0.000000e+00> : vector<16x32xf32>
    %80 = tpu.matmul %36, %78, %cst_58 {dimension_numbers = #tpu.dot_dimension_numbers<[1], [0], [0], [1], [0, 0, 1, 1], [], []>} : vector<16x16xf32>, vector<16x32xf32>, vector<16x32xf32> -> vector<16x32xf32>
    %c0_59 = arith.constant 0 : index
    %c0_60 = arith.constant 0 : index
    %c0_61 = arith.constant 0 : index
    %81 = vector.load %arg13[%c0_59, %c0_60, %c0_61] : memref<3x32x16xf32, #tpu.memory_space<vmem>>, vector<1x32x16xf32>
    %82 = vector.shape_cast %81 : vector<1x32x16xf32> to vector<32x16xf32>
    %cst_62 = arith.constant dense<0.000000e+00> : vector<16x16xf32>
    %83 = tpu.matmul %79, %82, %cst_62 {dimension_numbers = #tpu.dot_dimension_numbers<[1], [0], [0], [1], [0, 0, 1, 1], [], []>} : vector<16x32xf32>, vector<32x16xf32>, vector<16x16xf32> -> vector<16x16xf32>
    %c1_63 = arith.constant 1 : index
    %c0_64 = arith.constant 0 : index
    %c0_65 = arith.constant 0 : index
    %84 = vector.load %arg13[%c1_63, %c0_64, %c0_65] : memref<3x32x16xf32, #tpu.memory_space<vmem>>, vector<1x32x16xf32>
    %85 = vector.shape_cast %84 : vector<1x32x16xf32> to vector<32x16xf32>
    %cst_66 = arith.constant dense<0.000000e+00> : vector<16x16xf32>
    %86 = tpu.matmul %78, %85, %cst_66 {dimension_numbers = #tpu.dot_dimension_numbers<[1], [0], [0], [1], [0, 0, 1, 1], [], []>} : vector<16x32xf32>, vector<32x16xf32>, vector<16x16xf32> -> vector<16x16xf32>
    %87 = arith.addf %83, %86 : vector<16x16xf32>
    %c2_67 = arith.constant 2 : index
    %c0_68 = arith.constant 0 : index
    %c0_69 = arith.constant 0 : index
    %88 = vector.load %arg13[%c2_67, %c0_68, %c0_69] : memref<3x32x16xf32, #tpu.memory_space<vmem>>, vector<1x32x16xf32>
    %89 = vector.shape_cast %88 : vector<1x32x16xf32> to vector<32x16xf32>
    %cst_70 = arith.constant dense<0.000000e+00> : vector<16x16xf32>
    %90 = tpu.matmul %80, %89, %cst_70 {dimension_numbers = #tpu.dot_dimension_numbers<[1], [0], [0], [1], [0, 0, 1, 1], [], []>} : vector<16x32xf32>, vector<32x16xf32>, vector<16x16xf32> -> vector<16x16xf32>
    %91 = arith.addf %87, %90 : vector<16x16xf32>
    %c0_71 = arith.constant 0 : index
    %c0_72 = arith.constant 0 : index
    %92 = vector.load %arg14[%c0_71, %c0_72] : memref<1x16xf32, #tpu.memory_space<vmem>>, vector<1x16xf32>
    %93 = vector.broadcast %92 : vector<1x16xf32> to vector<16x16xf32>
    %94 = arith.addf %91, %93 : vector<16x16xf32>
    %cst_73 = arith.constant 0.000000e+00 : f32
    %95 = vector.broadcast %cst_73 : f32 to vector<16x16xf32>
    %96 = arith.cmpf oge, %94, %95 : vector<16x16xf32>
    %cst_74 = arith.constant 2.000000e-01 : f32
    %97 = vector.broadcast %cst_74 : f32 to vector<16x16xf32>
    %98 = arith.mulf %97, %94 : vector<16x16xf32>
    %99 = arith.select %96, %94, %98 : vector<16x16xi1>, vector<16x16xf32>
    %c0_75 = arith.constant 0 : index
    %c0_76 = arith.constant 0 : index
    %100 = vector.load %arg15[%c0_75, %c0_76] : memref<16x128xf32, #tpu.memory_space<vmem>>, vector<16x128xf32>
    %cst_77 = arith.constant dense<0.000000e+00> : vector<16x128xf32>
    %101 = tpu.matmul %99, %100, %cst_77 {dimension_numbers = #tpu.dot_dimension_numbers<[1], [0], [0], [1], [0, 0, 1, 1], [], []>} : vector<16x16xf32>, vector<16x128xf32>, vector<16x128xf32> -> vector<16x128xf32>
    %c0_78 = arith.constant 0 : index
    %c0_79 = arith.constant 0 : index
    %102 = vector.load %arg16[%c0_78, %c0_79] : memref<1x128xf32, #tpu.memory_space<vmem>>, vector<1x128xf32>
    %103 = vector.broadcast %102 : vector<1x128xf32> to vector<16x128xf32>
    %104 = arith.addf %101, %103 : vector<16x128xf32>
    %c0_80 = arith.constant 0 : index
    %c0_81 = arith.constant 0 : index
    %105 = vector.load %arg17[%c0_80, %c0_81] : memref<16x128xf32, #tpu.memory_space<vmem>>, vector<16x128xf32>
    %cst_82 = arith.constant dense<0.000000e+00> : vector<16x128xf32>
    %106 = tpu.matmul %99, %105, %cst_82 {dimension_numbers = #tpu.dot_dimension_numbers<[1], [0], [0], [1], [0, 0, 1, 1], [], []>} : vector<16x16xf32>, vector<16x128xf32>, vector<16x128xf32> -> vector<16x128xf32>
    %c0_83 = arith.constant 0 : index
    %c0_84 = arith.constant 0 : index
    %107 = vector.load %arg18[%c0_83, %c0_84] : memref<1x128xf32, #tpu.memory_space<vmem>>, vector<1x128xf32>
    %108 = vector.broadcast %107 : vector<1x128xf32> to vector<16x128xf32>
    %109 = arith.addf %106, %108 : vector<16x128xf32>
    %c0_85 = arith.constant 0 : index
    %c0_86 = arith.constant 0 : index
    %c0_87 = arith.constant 0 : index
    %110 = vector.load %arg19[%c0_85, %c0_86, %c0_87] : memref<1x16x128xf32, #tpu.memory_space<vmem>>, vector<1x16x128xf32>
    %111 = vector.shape_cast %110 : vector<1x16x128xf32> to vector<16x128xf32>
    %cst_88 = arith.constant 5.000000e-01 : f32
    %112 = vector.broadcast %cst_88 : f32 to vector<16x128xf32>
    %113 = arith.mulf %112, %109 : vector<16x128xf32>
    %114 = math.exp %113 : vector<16x128xf32>
    %115 = arith.mulf %111, %114 : vector<16x128xf32>
    %116 = arith.addf %104, %115 : vector<16x128xf32>
    %c0_89 = arith.constant 0 : index
    %c0_90 = arith.constant 0 : index
    %c0_91 = arith.constant 0 : index
    %117 = vector.load %arg20[%c0_89, %c0_90, %c0_91] : memref<1x16x128xf32, #tpu.memory_space<vmem>>, vector<1x16x128xf32>
    %118 = vector.shape_cast %117 : vector<1x16x128xf32> to vector<16x128xf32>
    %119 = vector.shape_cast %116 : vector<16x128xf32> to vector<1x16x128xf32>
    tpu.vector_store %arg20[%c0_89, %c0_90, %c0_91], %119 {strides = array<i32>} : memref<1x16x128xf32, #tpu.memory_space<vmem>>, vector<1x16x128xf32>,
    %c0_92 = arith.constant 0 : index
    %c0_93 = arith.constant 0 : index
    %c0_94 = arith.constant 0 : index
    %120 = vector.load %arg21[%c0_92, %c0_93, %c0_94] : memref<1x16x128xf32, #tpu.memory_space<vmem>>, vector<1x16x128xf32>
    %121 = vector.shape_cast %120 : vector<1x16x128xf32> to vector<16x128xf32>
    %122 = vector.shape_cast %104 : vector<16x128xf32> to vector<1x16x128xf32>
    tpu.vector_store %arg21[%c0_92, %c0_93, %c0_94], %122 {strides = array<i32>} : memref<1x16x128xf32, #tpu.memory_space<vmem>>, vector<1x16x128xf32>,
    %c0_95 = arith.constant 0 : index
    %c0_96 = arith.constant 0 : index
    %c0_97 = arith.constant 0 : index
    %123 = vector.load %arg22[%c0_95, %c0_96, %c0_97] : memref<1x16x128xf32, #tpu.memory_space<vmem>>, vector<1x16x128xf32>
    %124 = vector.shape_cast %123 : vector<1x16x128xf32> to vector<16x128xf32>
    %125 = vector.shape_cast %109 : vector<16x128xf32> to vector<1x16x128xf32>
    tpu.vector_store %arg22[%c0_95, %c0_96, %c0_97], %125 {strides = array<i32>} : memref<1x16x128xf32, #tpu.memory_space<vmem>>, vector<1x16x128xf32>,
    return
  }
  func.func @transform_0(%arg0: i32) -> (i32, i32, i32) {
    %c0_i32 = arith.constant 0 : i32
    %c0_i32_0 = arith.constant 0 : i32
    %c0_i32_1 = arith.constant 0 : i32
    return %arg0, %c0_i32, %c0_i32_0 : i32, i32, i32
  }
  func.func @transform_1(%arg0: i32) -> (i32, i32) {
    %c0_i32 = arith.constant 0 : i32
    %c0_i32_0 = arith.constant 0 : i32
    %c0_i32_1 = arith.constant 0 : i32
    return %c0_i32, %c0_i32_0 : i32, i32
  }
  func.func @transform_2(%arg0: i32) -> (i32, i32) {
    %c0_i32 = arith.constant 0 : i32
    %c0_i32_0 = arith.constant 0 : i32
    %c0_i32_1 = arith.constant 0 : i32
    return %c0_i32, %c0_i32_0 : i32, i32
  }
  func.func @transform_3(%arg0: i32) -> (i32, i32) {
    %c0_i32 = arith.constant 0 : i32
    %c0_i32_0 = arith.constant 0 : i32
    %c0_i32_1 = arith.constant 0 : i32
    return %c0_i32, %c0_i32_0 : i32, i32
  }
  func.func @transform_4(%arg0: i32) -> (i32, i32) {
    %c0_i32 = arith.constant 0 : i32
    %c0_i32_0 = arith.constant 0 : i32
    %c0_i32_1 = arith.constant 0 : i32
    return %c0_i32, %c0_i32_0 : i32, i32
  }
  func.func @transform_5(%arg0: i32) -> (i32, i32) {
    %c0_i32 = arith.constant 0 : i32
    %c0_i32_0 = arith.constant 0 : i32
    %c0_i32_1 = arith.constant 0 : i32
    return %c0_i32, %c0_i32_0 : i32, i32
  }
  func.func @transform_6(%arg0: i32) -> (i32, i32) {
    %c0_i32 = arith.constant 0 : i32
    %c0_i32_0 = arith.constant 0 : i32
    %c0_i32_1 = arith.constant 0 : i32
    return %c0_i32, %c0_i32_0 : i32, i32
  }
  func.func @transform_7(%arg0: i32) -> (i32, i32) {
    %c0_i32 = arith.constant 0 : i32
    %c0_i32_0 = arith.constant 0 : i32
    %c0_i32_1 = arith.constant 0 : i32
    return %c0_i32, %c0_i32_0 : i32, i32
  }
  func.func @transform_8(%arg0: i32) -> (i32, i32, i32) {
    %c0_i32 = arith.constant 0 : i32
    %c0_i32_0 = arith.constant 0 : i32
    %c0_i32_1 = arith.constant 0 : i32
    %c0_i32_2 = arith.constant 0 : i32
    return %c0_i32, %c0_i32_0, %c0_i32_1 : i32, i32, i32
  }
  func.func @transform_9(%arg0: i32) -> (i32, i32) {
    %c0_i32 = arith.constant 0 : i32
    %c0_i32_0 = arith.constant 0 : i32
    %c0_i32_1 = arith.constant 0 : i32
    return %c0_i32, %c0_i32_0 : i32, i32
  }
  func.func @transform_10(%arg0: i32) -> (i32, i32, i32) {
    %c0_i32 = arith.constant 0 : i32
    %c0_i32_0 = arith.constant 0 : i32
    %c0_i32_1 = arith.constant 0 : i32
    %c0_i32_2 = arith.constant 0 : i32
    return %c0_i32, %c0_i32_0, %c0_i32_1 : i32, i32, i32
  }
  func.func @transform_11(%arg0: i32) -> (i32, i32) {
    %c0_i32 = arith.constant 0 : i32
    %c0_i32_0 = arith.constant 0 : i32
    %c0_i32_1 = arith.constant 0 : i32
    return %c0_i32, %c0_i32_0 : i32, i32
  }
  func.func @transform_12(%arg0: i32) -> (i32, i32, i32) {
    %c0_i32 = arith.constant 0 : i32
    %c0_i32_0 = arith.constant 0 : i32
    %c0_i32_1 = arith.constant 0 : i32
    %c0_i32_2 = arith.constant 0 : i32
    return %c0_i32, %c0_i32_0, %c0_i32_1 : i32, i32, i32
  }
  func.func @transform_13(%arg0: i32) -> (i32, i32) {
    %c0_i32 = arith.constant 0 : i32
    %c0_i32_0 = arith.constant 0 : i32
    %c0_i32_1 = arith.constant 0 : i32
    return %c0_i32, %c0_i32_0 : i32, i32
  }
  func.func @transform_14(%arg0: i32) -> (i32, i32) {
    %c0_i32 = arith.constant 0 : i32
    %c0_i32_0 = arith.constant 0 : i32
    %c0_i32_1 = arith.constant 0 : i32
    return %c0_i32, %c0_i32_0 : i32, i32
  }
  func.func @transform_15(%arg0: i32) -> (i32, i32) {
    %c0_i32 = arith.constant 0 : i32
    %c0_i32_0 = arith.constant 0 : i32
    %c0_i32_1 = arith.constant 0 : i32
    return %c0_i32, %c0_i32_0 : i32, i32
  }
  func.func @transform_16(%arg0: i32) -> (i32, i32) {
    %c0_i32 = arith.constant 0 : i32
    %c0_i32_0 = arith.constant 0 : i32
    %c0_i32_1 = arith.constant 0 : i32
    return %c0_i32, %c0_i32_0 : i32, i32
  }
  func.func @transform_17(%arg0: i32) -> (i32, i32) {
    %c0_i32 = arith.constant 0 : i32
    %c0_i32_0 = arith.constant 0 : i32
    %c0_i32_1 = arith.constant 0 : i32
    return %c0_i32, %c0_i32_0 : i32, i32
  }
  func.func @transform_18(%arg0: i32) -> (i32, i32, i32) {
    %c0_i32 = arith.constant 0 : i32
    %c0_i32_0 = arith.constant 0 : i32
    %c0_i32_1 = arith.constant 0 : i32
    return %arg0, %c0_i32, %c0_i32_0 : i32, i32, i32
  }
  func.func @transform_19(%arg0: i32) -> (i32, i32, i32) {
    %c0_i32 = arith.constant 0 : i32
    %c0_i32_0 = arith.constant 0 : i32
    %c0_i32_1 = arith.constant 0 : i32
    return %arg0, %c0_i32, %c0_i32_0 : i32, i32, i32
  }
  func.func @transform_20(%arg0: i32) -> (i32, i32, i32) {
    %c0_i32 = arith.constant 0 : i32
    %c0_i32_0 = arith.constant 0 : i32
    %c0_i32_1 = arith.constant 0 : i32
    return %arg0, %c0_i32, %c0_i32_0 : i32, i32, i32
  }
  func.func @transform_21(%arg0: i32) -> (i32, i32, i32) {
    %c0_i32 = arith.constant 0 : i32
    %c0_i32_0 = arith.constant 0 : i32
    %c0_i32_1 = arith.constant 0 : i32
    return %arg0, %c0_i32, %c0_i32_0 : i32, i32, i32
  }
}

</mosaic_0001>

<bundles_post_ra>
// kernel: spectral_encoder_v4_forward.1
= control target key start
LH: loop header
LB: loop body
LE: loop exit
PB: predicated region body
PF: predicated region fallthrough
CT: control target
= control target key end

     0   :  { %s7294_s0 = inlined_call_operand.vmem [shape: f32[2,16,512], index: 0, kind: input, shape index: {}]   ;;  %s7295_s1 = inlined_call_operand.vmem [shape: f32[512,384], index: 1, kind: input, shape index: {}]   ;;  %s7296_s2 = inlined_call_operand.vmem [shape: f32[512,384], index: 2, kind: input, shape index: {}]   ;;  %s7297_s3 = inlined_call_operand.vmem [shape: f32[384,128], index: 3, kind: input, shape index: {}]   ;;  %s7298_s4 = inlined_call_operand.vmem [shape: f32[1,128], index: 4, kind: input, shape index: {}]   ;;  %s7299_s5 = inlined_call_operand.vmem [shape: f32[1,128], index: 5, kind: input, shape index: {}]   ;;  %s7300_s6 = inlined_call_operand.vmem [shape: f32[16,16], index: 6, kind: input, shape index: {}]   ;;  %s7301_s7 = inlined_call_operand.vmem [shape: f32[16,16], index: 7, kind: input, shape index: {}]   ;;  %s7302_s8 = inlined_call_operand.vmem [shape: f32[3,128,64], index: 8, kind: input, shape index: {}]   ;;  %s7303_s9 = inlined_call_operand.vmem [shape: f32[1,64], index: 9, kind: input, shape index: {}]   ;;  %s7304_s10 = inlined_call_operand.vmem [shape: f32[3,64,32], index: 10, kind: input, shape index: {}]   ;;  %s7305_s11 = inlined_call_operand.vmem [shape: f32[1,32], index: 11, kind: input, shape index: {}]   ;;  %s7306_s12 = inlined_call_operand.vmem [shape: f32[3,32,16], index: 12, kind: input, shape index: {}]   ;;  %s7307_s13 = inlined_call_operand.vmem [shape: f32[1,16], index: 13, kind: input, shape index: {}]   ;;  %s7308_s14 = inlined_call_operand.vmem [shape: f32[16,128], index: 14, kind: input, shape index: {}]   ;;  %s7309_s15 = inlined_call_operand.vmem [shape: f32[1,128], index: 15, kind: input, shape index: {}]   ;;  %s7310_s16 = inlined_call_operand.vmem [shape: f32[16,128], index: 16, kind: input, shape index: {}]   ;;  %s7311_s17 = inlined_call_operand.vmem [shape: f32[1,128], index: 17, kind: input, shape index: {}]   ;;  %s7312_s18 = inlined_call_operand.vmem [shape: f32[2,16,128], index: 18, kind: input, shape index: {}]   ;;  %s7313_s19 = inlined_call_operand.hbm [shape: f32[2,16,128], index: 19, kind: output, shape index: {0}]   ;;  %s7314_s20 = inlined_call_operand.hbm [shape: f32[2,16,128], index: 20, kind: output, shape index: {1}]   ;;  %s7315_s21 = inlined_call_operand.hbm [shape: f32[2,16,128], index: 21, kind: output, shape index: {2}]  }
   0x1   :  { %7337 = sst [smem:[#allocation16_spill]] %s7294_s0 }
   0x2   :  { %7338 = sst [smem:[#allocation17_spill]] %s7295_s1 }
   0x3   :  { %7339 = sst [smem:[#allocation18_spill]] %s7296_s2 }
   0x4   :  { %7340 = sst [smem:[#allocation19_spill]] %s7297_s3 }
   0x5   :  { %7341 = sst [smem:[#allocation20_spill]] %s7298_s4 }
   0x6   :  { %7342 = sst [smem:[#allocation21_spill]] %s7299_s5 }
   0x7   :  { %7343 = sst [smem:[#allocation22_spill]] %s7300_s6 }
   0x8   :  { %7344 = sst [smem:[#allocation23_spill]] %s7301_s7 }
   0x9   :  { %7345 = sst [smem:[#allocation24_spill]] %s7312_s18 }
   0xa   :  { %7346 = sst [smem:[#allocation25_spill]] %s7313_s19 }
   0xb   :  { %7347 = sst [smem:[#allocation26_spill]] %s7315_s21 }
   0xc   :  { %27 = vsyncpa [#allocation3], 0 }
   0xd   :  { %29 = vsyncpa [#allocation3 + $0x1], 0 }
   0xe   :  { %30 = vsyncpa [#allocation5], 0 }
   0xf   :  { %32 = vsyncpa [#allocation5 + $0x1], 0  ;;  %s5376_s2 = smov 0   ;;  %s5378_s25 = smov 0  }
  0x10   :  { %s5380_s26 = smov 0   ;;  %s5382_s27 = smov 0  }
  0x11 LB: > { %7348 = sst [smem:[#allocation9_spill]] %s5247_s2  ;;  %s5397_s3 = sadd.s32 4294967295, %s5259_s27   ;;  %s5259_s27 = sphi %s5382_s27, %s7379_s27   ;;  %s5255_s26 = sphi %s5380_s26, %s7381_s26   ;;  %s5251_s25 = sphi %s5378_s25, %s7383_s25   ;;  %s5247_s2 = sphi %s5376_s2, %s7382_s2  }
  0x12   : > { %7349 = sst [smem:[#allocation10_spill]] %s5255_s26  ;;  %s7319_s28 = sadd.s32 4294967294, %s5259_s27  }
  0x13   : > { %7350 = sst [smem:[#allocation11_spill]] %s5259_s27  ;;  %s5401_s29 = sadd.s32 1, %s5259_s27  }
  0x14   : > { %7351 = sst [smem:[#allocation12_spill]] %s5401_s29  ;;  %s454_s0 = sadd.s32 1, %s5255_s26 }
  0x15   : > { %s451_s4 = ssub.s32 %s5259_s27, %s5401_s29  ;;  %p464_p0 = scmp.ne.s32.totalorder %s5255_s26, %s5251_s25 }
  0x16   : > { %p452_p1 = scmp.eq.s32.totalorder %s451_s4, 0  ;;  %p465_p2 = scmp.eq.s32.totalorder %s5397_s3, 1 }
  0x17   : > { %p470_p3 = scmp.ne.s32.totalorder %s5251_s25, %s5247_s2  ;;  %p471_p4 = scmp.eq.s32.totalorder %s7319_s28, 1 }
  0x18   : > { %s5414_s30 = scalar_select %p452_p1, %s5255_s26, %s454_s0  }
  0x19   : > { %p5416_p5 = por %p465_p2, %p464_p0  ;;  %p5420_p6 = por %p471_p4, %p470_p3 }
  0x1a   : > { %7352 = sst [smem:[#allocation13_spill]] %s5414_s30  ;;  %p3661_p7 = scmp.ge.s32.totalorder %s5259_s27, 1 }
  0x1b   : > { %s7354_s22 = scalar_select %p5420_p6, 1, 0 }
  0x1c   : > { %p608_p8 = scmp.lt.s32.totalorder %s5259_s27, 3 }
  0x1d   : > { %7355 = sst [smem:[#allocation14_spill]] %s7354_s22 }
  0x1e   : > { %p609_p9 = pnand %p3661_p7, %p608_p8 }
  0x20   : > { %612 = sbr.rel (%p609_p9) target bundleno = 2507 (0x9cb), region = 96 }
  0x27   : > { %s7356_s24 = sld [smem:[#allocation17_spill]]  ;;  %p683_p10 = scmp.lt.s32.totalorder %s5397_s3, 1  ;;  %vm1958_vm0 = vcmask 130048   ;;  %vm2580_vm3 = vcmask 523264   ;;  %vm3009_vm6 = vcmask 261120  }
  0x28   : > { %s7358_s2 = sld [smem:[#allocation16_spill]]  ;;  %s7359_s23 = sld [smem:[#allocation18_spill]] }
  0x29   : > { %s5538_s26 = scalar_select %p683_p10, %s5397_s3, 1 }
  0x2a   : > { %s7362_s6 = sld [smem:[#allocation22_spill]]  ;;  %s7363_s7 = sld [smem:[#allocation23_spill]] }
  0x2b   : > { %7357 = sst [smem:[#allocation15_spill]] %s5538_s26  ;;  %s3771_s0 = sshll.u32 %s5538_s26, 6 }
  0x2c   : > { %s7360_s26 = sld [smem:[#allocation19_spill]]  ;;  %s7365_s28 = sld [smem:[#allocation21_spill]] }
  0x2d   : > { %v702_v0 = vld [vmem:[%s7356_s24 + $0x8] sm:$0xff]  ;;  %v705_v1 = vld [vmem:[%s7356_s24 + $0x20] sm:$0xff]  ;;  %v751_v2 = vld [vmem:[%s7356_s24 + $0x190] sm:$0xff]  ;;  %s3472_s1 = sand.u32 1, %s5397_s3   ;;  %s7144_s30 = sshll.u32 %s5397_s3, 8 }
  0x2e   : > { %v4404_v3 = vpack.c.bf16 %v705_v1, %v702_v0  ;;  %v754_v4 = vld [vmem:[%s7356_s24 + $0x1a8] sm:$0xff]  ;;  %v701_v5 = vld [vmem:[%s7356_s24] sm:$0xff]  ;;  %v704_v6 = vld [vmem:[%s7356_s24 + $0x18] sm:$0xff]  ;;  %s5592_s22 = scalar_lea.vmem %s7358_s2, %s3771_s0  ;;  %s7330_s2 = sand.u32 1, %s5251_s25  }
  0x2f   : > { %v4532_v7 = vpack.c.bf16 %v754_v4, %v751_v2  ;;  %v4406_v8 = vpack.c.bf16 %v704_v6, %v701_v5  ;;  %v703_v9 = vld [vmem:[%s7356_s24 + $0x10] sm:$0xff]  ;;  %v706_v10 = vld [vmem:[%s7356_s24 + $0x28] sm:$0xff]  ;;  %v708_v11 = vld [vmem:[%s7356_s24 + $0x38] sm:$0xff]  ;;  %s7136_s27 = sshll.u32 %s7330_s2, 4  ;;  %s7159_s3 = scalar_lea.hbm %s7314_s20, %s7144_s30 }
  0x30   : > { %4405 = vmatprep.subr.bf16.mxu0 %v4404_v3  ;;  %v4534_v12 = vpack.c.bf16 %v706_v10, %v703_v9  ;;  %v711_v13 = vld [vmem:[%s7356_s24 + $0x50] sm:$0xff]  ;;  %v757_v14 = vld [vmem:[%s7356_s24 + $0x1c0] sm:$0xff]  ;;  %v760_v15 = vld [vmem:[%s7356_s24 + $0x1d8] sm:$0xff]  ;;  %s7163_s19 = scalar_lea.vmem [#allocation6], %s7136_s27  ;;  %s7167_s2 = scalar_lea.sflag [#allocation5], %s3472_s1 }
  0x31   : > { %4533 = vmatprep.subr.bf16.mxu1 %v4532_v7  ;;  %4407 = vmatpush1.bf16.msra.mxu0 %v4406_v8  ;;  %v4408_v16 = vpack.c.bf16 %v711_v13, %v708_v11  ;;  %v4536_v17 = vpack.c.bf16 %v760_v15, %v757_v14  ;;  %v707_v18 = vld [vmem:[%s7356_s24 + $0x30] sm:$0xff]  ;;  %v710_v19 = vld [vmem:[%s7356_s24 + $0x48] sm:$0xff]  ;;  %v709_v20 = vld [vmem:[%s7356_s24 + $0x40] sm:$0xff] }
  0x32   : > { %4535 = vmatpush3.bf16.msra.mxu1 %v4534_v12  ;;  %v4410_v21 = vpack.c.bf16 %v710_v19, %v707_v18  ;;  %v712_v22 = vld [vmem:[%s7356_s24 + $0x58] sm:$0xff]  ;;  %v714_v23 = vld [vmem:[%s7356_s24 + $0x68] sm:$0xff]  ;;  %v717_v24 = vld [vmem:[%s7356_s24 + $0x80] sm:$0xff]  ;;  %s7361_s0 = smov %s7360_s26 }
  0x33   : > { %4409 = vmatprep.subr.bf16.mxu0 %v4408_v16  ;;  %4537 = vmatprep.subr.bf16.mxu1 %v4536_v17  ;;  %v4538_v25 = vpack.c.bf16 %v712_v22, %v709_v20  ;;  %v4412_v26 = vpack.c.bf16 %v717_v24, %v714_v23  ;;  %v763_v27 = vld [vmem:[%s7356_s24 + $0x1f0] sm:$0xff]  ;;  %v766_v28 = vld [vmem:[%s7356_s24 + $0x208] sm:$0xff]  ;;  %v713_v29 = vld [vmem:[%s7356_s24 + $0x60] sm:$0xff] }
  0x34   : > { %v4540_v30 = vpack.c.bf16 %v766_v28, %v763_v27  ;;  %v716_v31 = vld [vmem:[%s7356_s24 + $0x78] sm:$0xff]  ;;  %v715_v32 = vld [vmem:[%s7356_s24 + $0x70] sm:$0xff]  ;;  %v718_v33 = vld [vmem:[%s7356_s24 + $0x88] sm:$0xff] }
  0x35   : > { %4411 = vmatpush1.bf16.msra.mxu0 %v4410_v21  ;;  %v4414_v34 = vpack.c.bf16 %v716_v31, %v713_v29  ;;  %v720_v35 = vld [vmem:[%s7356_s24 + $0x98] sm:$0xff]  ;;  %v723_v36 = vld [vmem:[%s7356_s24 + $0xb0] sm:$0xff]  ;;  %v769_v37 = vld [vmem:[%s7356_s24 + $0x220] sm:$0xff]  ;;  %v4542_v38 = vpack.c.bf16 %v718_v33, %v715_v32 }
  0x36   : > { %4539 = vmatpush3.bf16.msra.mxu1 %v4538_v25  ;;  %4413 = vmatprep.subr.bf16.mxu0 %v4412_v26  ;;  %v4416_v39 = vpack.c.bf16 %v723_v36, %v720_v35  ;;  %v772_v40 = vld [vmem:[%s7356_s24 + $0x238] sm:$0xff]  ;;  %v719_v41 = vld [vmem:[%s7356_s24 + $0x90] sm:$0xff]  ;;  %v722_v42 = vld [vmem:[%s7356_s24 + $0xa8] sm:$0xff] }
  0x37   : > { %4541 = vmatprep.subr.bf16.mxu1 %v4540_v30  ;;  %v4544_v43 = vpack.c.bf16 %v772_v40, %v769_v37  ;;  %v721_v44 = vld [vmem:[%s7356_s24 + $0xa0] sm:$0xff]  ;;  %v724_v45 = vld [vmem:[%s7356_s24 + $0xb8] sm:$0xff]  ;;  %v726_v46 = vld [vmem:[%s7356_s24 + $0xc8] sm:$0xff]  ;;  %v4418_v50 = vpack.c.bf16 %v722_v42, %v719_v41 }
  0x38   : > { %v729_v47 = vld [vmem:[%s7356_s24 + $0xe0] sm:$0xff]  ;;  %v775_v48 = vld [vmem:[%s7356_s24 + $0x250] sm:$0xff]  ;;  %v778_v49 = vld [vmem:[%s7356_s24 + $0x268] sm:$0xff]  ;;  %v4546_v51 = vpack.c.bf16 %v724_v45, %v721_v44 }
  0x39   : > { %4415 = vmatpush1.bf16.msra.mxu0 %v4414_v34  ;;  %v4420_v52 = vpack.c.bf16 %v729_v47, %v726_v46  ;;  %v725_v53 = vld [vmem:[%s7356_s24 + $0xc0] sm:$0xff]  ;;  %v728_v54 = vld [vmem:[%s7356_s24 + $0xd8] sm:$0xff]  ;;  %v727_v55 = vld [vmem:[%s7356_s24 + $0xd0] sm:$0xff]  ;;  %v4548_v56 = vpack.c.bf16 %v778_v49, %v775_v48 }
  0x3a   : > { %4543 = vmatpush3.bf16.msra.mxu1 %v4542_v38  ;;  %4417 = vmatprep.subr.bf16.mxu0 %v4416_v39  ;;  %v730_v57 = vld [vmem:[%s7356_s24 + $0xe8] sm:$0xff]  ;;  %v732_v58 = vld [vmem:[%s7356_s24 + $0xf8] sm:$0xff]  ;;  %v735_v59 = vld [vmem:[%s7356_s24 + $0x110] sm:$0xff]  ;;  %v4422_v62 = vpack.c.bf16 %v728_v54, %v725_v53 }
  0x3b   : > { %4545 = vmatprep.subr.bf16.mxu1 %v4544_v43  ;;  %v781_v60 = vld [vmem:[%s7356_s24 + $0x280] sm:$0xff]  ;;  %v784_v61 = vld [vmem:[%s7356_s24 + $0x298] sm:$0xff]  ;;  %v4550_v63 = vpack.c.bf16 %v730_v57, %v727_v55  ;;  %v4424_v0 = vpack.c.bf16 %v735_v59, %v732_v58  ;;  %v731_v1 = vld [vmem:[%s7356_s24 + $0xf0] sm:$0xff] }
  0x3c   : > { %v734_v2 = vld [vmem:[%s7356_s24 + $0x108] sm:$0xff]  ;;  %v733_v3 = vld [vmem:[%s7356_s24 + $0x100] sm:$0xff]  ;;  %v4552_v4 = vpack.c.bf16 %v784_v61, %v781_v60  ;;  %v736_v5 = vld [vmem:[%s7356_s24 + $0x118] sm:$0xff] }
  0x3d   : > { %4419 = vmatpush1.bf16.msra.mxu0 %v4418_v50  ;;  %v738_v6 = vld [vmem:[%s7356_s24 + $0x128] sm:$0xff]  ;;  %v741_v7 = vld [vmem:[%s7356_s24 + $0x140] sm:$0xff]  ;;  %v787_v8 = vld [vmem:[%s7356_s24 + $0x2b0] sm:$0xff]  ;;  %v4426_v10 = vpack.c.bf16 %v734_v2, %v731_v1  ;;  %v4554_v12 = vpack.c.bf16 %v736_v5, %v733_v3 }
  0x3e   : > { %4547 = vmatpush3.bf16.msra.mxu1 %v4546_v51  ;;  %4421 = vmatprep.subr.bf16.mxu0 %v4420_v52  ;;  %v790_v9 = vld [vmem:[%s7356_s24 + $0x2c8] sm:$0xff]  ;;  %v737_v11 = vld [vmem:[%s7356_s24 + $0x120] sm:$0xff]  ;;  %v4428_v13 = vpack.c.bf16 %v741_v7, %v738_v6  ;;  %v740_v14 = vld [vmem:[%s7356_s24 + $0x138] sm:$0xff] }
  0x3f   : > { %4549 = vmatprep.subr.bf16.mxu1 %v4548_v56  ;;  %v739_v15 = vld [vmem:[%s7356_s24 + $0x130] sm:$0xff]  ;;  %v742_v16 = vld [vmem:[%s7356_s24 + $0x148] sm:$0xff]  ;;  %v4556_v17 = vpack.c.bf16 %v790_v9, %v787_v8  ;;  %v744_v18 = vld [vmem:[%s7356_s24 + $0x158] sm:$0xff]  ;;  %v4430_v23 = vpack.c.bf16 %v740_v14, %v737_v11 }
  0x40   : > { %v747_v19 = vld [vmem:[%s7356_s24 + $0x170] sm:$0xff]  ;;  %v5613_v20 = vld [vmem:[%s5592_s22 + $0x8] sm:$0xff]  ;;  %v793_v21 = vld [vmem:[%s7356_s24 + $0x2e0] sm:$0xff]  ;;  %v4558_v24 = vpack.c.bf16 %v742_v16, %v739_v15 }
  0x41   : > { %4423 = vmatpush1.bf16.msra.mxu0 %v4422_v62  ;;  %v796_v22 = vld [vmem:[%s7356_s24 + $0x2f8] sm:$0xff]  ;;  %1111 = vmatprep.mubr.f32.mxu1 %v5613_v20  ;;  %v4432_v25 = vpack.c.bf16 %v747_v19, %v744_v18  ;;  %v743_v26 = vld [vmem:[%s7356_s24 + $0x150] sm:$0xff]  ;;  %v746_v27 = vld [vmem:[%s7356_s24 + $0x168] sm:$0xff] }
  0x42   : > { %4551 = vmatpush3.bf16.msra.mxu1 %v4550_v63  ;;  %4425 = vmatprep.subr.bf16.mxu0 %v4424_v0  ;;  %v745_v28 = vld [vmem:[%s7356_s24 + $0x160] sm:$0xff]  ;;  %v4560_v29 = vpack.c.bf16 %v796_v22, %v793_v21  ;;  %v748_v30 = vld [vmem:[%s7356_s24 + $0x178] sm:$0xff]  ;;  %v750_v31 = vld [vmem:[%s7356_s24 + $0x188] sm:$0xff]  ;;  %v4434_v35 = vpack.c.bf16 %v746_v27, %v743_v26 }
  0x43   : > { %4553 = vmatprep.subr.bf16.mxu1 %v4552_v4  ;;  %957 = vmatprep.mubr.f32.mxu0 %v5613_v20  ;;  %v753_v32 = vld [vmem:[%s7356_s24 + $0x1a0] sm:$0xff]  ;;  %v847_v33 = vld [vmem:[%s7356_s24 + $0x490] sm:$0xff]  ;;  %v850_v34 = vld [vmem:[%s7356_s24 + $0x4a8] sm:$0xff]  ;;  %v4562_v36 = vpack.c.bf16 %v748_v30, %v745_v28 }
  0x44   : > { %v4436_v37 = vpack.c.bf16 %v753_v32, %v750_v31  ;;  %v749_v38 = vld [vmem:[%s7356_s24 + $0x180] sm:$0xff]  ;;  %v752_v39 = vld [vmem:[%s7356_s24 + $0x198] sm:$0xff]  ;;  %v799_v40 = vld [vmem:[%s7356_s24 + $0x310] sm:$0xff]  ;;  %v4564_v41 = vpack.c.bf16 %v850_v34, %v847_v33 }
  0x45   : > { %4427 = vmatpush1.bf16.msra.mxu0 %v4426_v10  ;;  %v802_v42 = vld [vmem:[%s7356_s24 + $0x328] sm:$0xff]  ;;  %v756_v43 = vld [vmem:[%s7356_s24 + $0x1b8] sm:$0xff]  ;;  %v759_v44 = vld [vmem:[%s7356_s24 + $0x1d0] sm:$0xff]  ;;  %v4438_v47 = vpack.c.bf16 %v752_v39, %v749_v38 }
  0x46   : > { %4555 = vmatpush3.bf16.msra.mxu1 %v4554_v12  ;;  %4429 = vmatprep.subr.bf16.mxu0 %v4428_v13  ;;  %v853_v45 = vld [vmem:[%s7356_s24 + $0x4c0] sm:$0xff]  ;;  %v856_v46 = vld [vmem:[%s7356_s24 + $0x4d8] sm:$0xff]  ;;  %v4566_v49 = vpack.c.bf16 %v802_v42, %v799_v40  ;;  %v4440_v50 = vpack.c.bf16 %v759_v44, %v756_v43  ;;  %v755_v51 = vld [vmem:[%s7356_s24 + $0x1b0] sm:$0xff] }
  0x47   : > { %4557 = vmatprep.subr.bf16.mxu1 %v4556_v17  ;;  %v5672_v48 = vld [vmem:[%s5592_s22] sm:$0xff]  ;;  %v758_v52 = vld [vmem:[%s7356_s24 + $0x1c8] sm:$0xff]  ;;  %v4568_v54 = vpack.c.bf16 %v856_v46, %v853_v45  ;;  %v808_v55 = vld [vmem:[%s7356_s24 + $0x358] sm:$0xff] }
  0x48   : > { %v805_v53 = vld [vmem:[%s7356_s24 + $0x340] sm:$0xff]  ;;  %v762_v56 = vld [vmem:[%s7356_s24 + $0x1e8] sm:$0xff]  ;;  %v859_v58 = vld [vmem:[%s7356_s24 + $0x4f0] sm:$0xff]  ;;  %v4442_v60 = vpack.c.bf16 %v758_v52, %v755_v51 }
  0x49   : > { %4431 = vmatpush1.bf16.msra.mxu0 %v4430_v23  ;;  %v765_v57 = vld [vmem:[%s7356_s24 + $0x200] sm:$0xff]  ;;  %v862_v59 = vld [vmem:[%s7356_s24 + $0x508] sm:$0xff]  ;;  %v4570_v61 = vpack.c.bf16 %v808_v55, %v805_v53  ;;  %v764_v0 = vld [vmem:[%s7356_s24 + $0x1f8] sm:$0xff] }
  0x4a   : > { %4559 = vmatpush3.bf16.msra.mxu1 %v4558_v24  ;;  %4433 = vmatprep.subr.bf16.mxu0 %v4432_v25  ;;  %v4444_v62 = vpack.c.bf16 %v765_v57, %v762_v56  ;;  %v761_v63 = vld [vmem:[%s7356_s24 + $0x1e0] sm:$0xff]  ;;  %v811_v1 = vld [vmem:[%s7356_s24 + $0x370] sm:$0xff]  ;;  %v4572_v2 = vpack.c.bf16 %v862_v59, %v859_v58  ;;  %v814_v3 = vld [vmem:[%s7356_s24 + $0x388] sm:$0xff] }
  0x4b   : > { %4561 = vmatprep.subr.bf16.mxu1 %v4560_v29  ;;  %v768_v4 = vld [vmem:[%s7356_s24 + $0x218] sm:$0xff]  ;;  %v771_v5 = vld [vmem:[%s7356_s24 + $0x230] sm:$0xff]  ;;  %v865_v6 = vld [vmem:[%s7356_s24 + $0x520] sm:$0xff]  ;;  %v4446_v8 = vpack.c.bf16 %v764_v0, %v761_v63  ;;  %v4574_v11 = vpack.c.bf16 %v814_v3, %v811_v1 }
  0x4c   : > { %v868_v7 = vld [vmem:[%s7356_s24 + $0x538] sm:$0xff]  ;;  %v767_v9 = vld [vmem:[%s7356_s24 + $0x210] sm:$0xff]  ;;  %v5727_v10 = vld [vmem:[%s5592_s22 + $0x28] sm:$0xff]  ;;  %v4448_v12 = vpack.c.bf16 %v771_v5, %v768_v4 }
  0x4d   : > { %4435 = vmatpush1.bf16.msra.mxu0 %v4434_v35  ;;  %v770_v13 = vld [vmem:[%s7356_s24 + $0x228] sm:$0xff]  ;;  %v817_v14 = vld [vmem:[%s7356_s24 + $0x3a0] sm:$0xff]  ;;  %v4576_v16 = vpack.c.bf16 %v868_v7, %v865_v6  ;;  %v820_v17 = vld [vmem:[%s7356_s24 + $0x3b8] sm:$0xff] }
  0x4e   : > { %4563 = vmatpush3.bf16.msra.mxu1 %v4562_v36  ;;  %4437 = vmatprep.subr.bf16.mxu0 %v4436_v37  ;;  %v5736_v15 = vld [vmem:[%s5592_s22 + $0x20] sm:$0xff]  ;;  %v774_v18 = vld [vmem:[%s7356_s24 + $0x248] sm:$0xff]  ;;  %v871_v21 = vld [vmem:[%s7356_s24 + $0x550] sm:$0xff]  ;;  %v4450_v23 = vpack.c.bf16 %v770_v13, %v767_v9  ;;  %v4578_v25 = vpack.c.bf16 %v820_v17, %v817_v14 }
  0x4f   : > { %4565 = vmatprep.subr.bf16.mxu1 %v4564_v41  ;;  %v777_v19 = vld [vmem:[%s7356_s24 + $0x260] sm:$0xff]  ;;  %v874_v22 = vld [vmem:[%s7356_s24 + $0x568] sm:$0xff]  ;;  %v5756_v24 = vld [vmem:[%s5592_s22 + $0x18] sm:$0xff] }
  0x50   : > { %v4452_v26 = vpack.c.bf16 %v777_v19, %v774_v18  ;;  %v773_v27 = vld [vmem:[%s7356_s24 + $0x240] sm:$0xff]  ;;  %v776_v28 = vld [vmem:[%s7356_s24 + $0x258] sm:$0xff]  ;;  %v823_v29 = vld [vmem:[%s7356_s24 + $0x3d0] sm:$0xff]  ;;  %v4580_v30 = vpack.c.bf16 %v874_v22, %v871_v21 }
  0x51   : > { %4439 = vmatpush1.bf16.msra.mxu0 %v4438_v47  ;;  %1112 = vmatmul.mubr.f32.vlgmr.msra.gmra.mrb[0].mxu1 %v5672_v48  ;;  %v826_v31 = vld [vmem:[%s7356_s24 + $0x3e8] sm:$0xff]  ;;  %v780_v32 = vld [vmem:[%s7356_s24 + $0x278] sm:$0xff]  ;;  %v783_v33 = vld [vmem:[%s7356_s24 + $0x290] sm:$0xff]  ;;  %v4454_v36 = vpack.c.bf16 %v776_v28, %v773_v27 }
  0x52   : > { %4567 = vmatpush3.bf16.msra.mxu1 %v4566_v49  ;;  %4441 = vmatprep.subr.bf16.mxu0 %v4440_v50  ;;  %v877_v34 = vld [vmem:[%s7356_s24 + $0x580] sm:$0xff]  ;;  %v880_v35 = vld [vmem:[%s7356_s24 + $0x598] sm:$0xff]  ;;  %v4582_v37 = vpack.c.bf16 %v826_v31, %v823_v29  ;;  %v4456_v38 = vpack.c.bf16 %v783_v33, %v780_v32  ;;  %v779_v39 = vld [vmem:[%s7356_s24 + $0x270] sm:$0xff] }
  0x53   : > { %4569 = vmatprep.subr.bf16.mxu1 %v4568_v54  ;;  %1116 = vmatprep.mubr.f32.mxu1 %v5727_v10  ;;  %v782_v40 = vld [vmem:[%s7356_s24 + $0x288] sm:$0xff]  ;;  %v829_v41 = vld [vmem:[%s7356_s24 + $0x400] sm:$0xff]  ;;  %v4584_v42 = vpack.c.bf16 %v880_v35, %v877_v34  ;;  %v832_v43 = vld [vmem:[%s7356_s24 + $0x418] sm:$0xff] }
  0x54   : > { %v786_v44 = vld [vmem:[%s7356_s24 + $0x2a8] sm:$0xff]  ;;  %v789_v45 = vld [vmem:[%s7356_s24 + $0x2c0] sm:$0xff]  ;;  %v883_v46 = vld [vmem:[%s7356_s24 + $0x5b0] sm:$0xff]  ;;  %v4458_v49 = vpack.c.bf16 %v782_v40, %v779_v39  ;;  %v4586_v50 = vpack.c.bf16 %v832_v43, %v829_v41 }
  0x55   : > { %4443 = vmatpush1.bf16.msra.mxu0 %v4442_v60  ;;  %1117 = vmatmul.mubr.f32.gmra.mrb[2].mxu1 %v5736_v15  ;;  %v886_v47 = vld [vmem:[%s7356_s24 + $0x5c8] sm:$0xff]  ;;  %v4460_v51 = vpack.c.bf16 %v789_v45, %v786_v44  ;;  %v785_v52 = vld [vmem:[%s7356_s24 + $0x2a0] sm:$0xff]  ;;  %v788_v53 = vld [vmem:[%s7356_s24 + $0x2b8] sm:$0xff] }
  0x56   : > { %4571 = vmatpush3.bf16.msra.mxu1 %v4570_v61  ;;  %4445 = vmatprep.subr.bf16.mxu0 %v4444_v62  ;;  %v835_v54 = vld [vmem:[%s7356_s24 + $0x430] sm:$0xff]  ;;  %v4588_v55 = vpack.c.bf16 %v886_v47, %v883_v46  ;;  %v838_v56 = vld [vmem:[%s7356_s24 + $0x448] sm:$0xff]  ;;  %v792_v57 = vld [vmem:[%s7356_s24 + $0x2d8] sm:$0xff]  ;;  %v4462_v61 = vpack.c.bf16 %v788_v53, %v785_v52 }
  0x57   : > { %4573 = vmatprep.subr.bf16.mxu1 %v4572_v2  ;;  %1186 = vmatprep.mubr.f32.mxu1 %v5756_v24  ;;  %v795_v58 = vld [vmem:[%s7356_s24 + $0x2f0] sm:$0xff]  ;;  %v889_v59 = vld [vmem:[%s7356_s24 + $0x5e0] sm:$0xff]  ;;  %v892_v60 = vld [vmem:[%s7356_s24 + $0x5f8] sm:$0xff]  ;;  %v4590_v62 = vpack.c.bf16 %v838_v56, %v835_v54 }
  0x58   : > { %v4464_v63 = vpack.c.bf16 %v795_v58, %v792_v57  ;;  %v791_v0 = vld [vmem:[%s7356_s24 + $0x2d0] sm:$0xff]  ;;  %v794_v1 = vld [vmem:[%s7356_s24 + $0x2e8] sm:$0xff]  ;;  %v841_v2 = vld [vmem:[%s7356_s24 + $0x460] sm:$0xff]  ;;  %v4592_v3 = vpack.c.bf16 %v892_v60, %v889_v59 }
  0x59   : > { %4447 = vmatpush1.bf16.msra.mxu0 %v4446_v8  ;;  %v844_v4 = vld [vmem:[%s7356_s24 + $0x478] sm:$0xff]  ;;  %v798_v5 = vld [vmem:[%s7356_s24 + $0x308] sm:$0xff]  ;;  %v801_v6 = vld [vmem:[%s7356_s24 + $0x320] sm:$0xff]  ;;  %v4466_v9 = vpack.c.bf16 %v794_v1, %v791_v0 }
  0x5a   : > { %4575 = vmatpush3.bf16.msra.mxu1 %v4574_v11  ;;  %4449 = vmatprep.subr.bf16.mxu0 %v4448_v12  ;;  %v1198_v7 = vld [vmem:[%s7359_s23 + $0x8] sm:$0xff]  ;;  %v1201_v8 = vld [vmem:[%s7359_s23 + $0x20] sm:$0xff]  ;;  %v4594_v11 = vpack.c.bf16 %v844_v4, %v841_v2  ;;  %v4468_v12 = vpack.c.bf16 %v801_v6, %v798_v5  ;;  %v800_v14 = vld [vmem:[%s7356_s24 + $0x318] sm:$0xff] }
  0x5b   : > { %4577 = vmatprep.subr.bf16.mxu1 %v4576_v16  ;;  %v797_v13 = vld [vmem:[%s7356_s24 + $0x300] sm:$0xff]  ;;  %v4596_v16 = vpack.c.bf16 %v1201_v8, %v1198_v7  ;;  %v1200_v18 = vld [vmem:[%s7359_s23 + $0x18] sm:$0xff]  ;;  %v807_v21 = vld [vmem:[%s7356_s24 + $0x350] sm:$0xff] }
  0x5c   : > { %v1197_v17 = vld [vmem:[%s7359_s23] sm:$0xff]  ;;  %v804_v19 = vld [vmem:[%s7356_s24 + $0x338] sm:$0xff]  ;;  %v803_v29 = vld [vmem:[%s7356_s24 + $0x330] sm:$0xff] }
  0x5d   : > { %4451 = vmatpush1.bf16.msra.mxu0 %v4450_v23  ;;  %v1204_v22 = vld [vmem:[%s7359_s23 + $0x38] sm:$0xff]  ;;  %v1207_v23 = vld [vmem:[%s7359_s23 + $0x50] sm:$0xff]  ;;  %v4598_v28 = vpack.c.bf16 %v1200_v18, %v1197_v17  ;;  %v4472_v32 = vpack.c.bf16 %v807_v21, %v804_v19  ;;  %v1206_v34 = vld [vmem:[%s7359_s23 + $0x48] sm:$0xff] }
  0x5e   : > { %4579 = vmatpush3.bf16.msra.mxu1 %v4578_v25  ;;  %4453 = vmatprep.subr.bf16.mxu0 %v4452_v26  ;;  %v5880_v25 = vld [vmem:[%s5592_s22 + $0x10] sm:$0xff]  ;;  %v4470_v26 = vpack.c.bf16 %v800_v14, %v797_v13  ;;  %v5883_v27 = vld [vmem:[%s5592_s22 + $0x38] sm:$0xff]  ;;  %v4600_v33 = vpack.c.bf16 %v1207_v23, %v1204_v22  ;;  %v810_v35 = vld [vmem:[%s7356_s24 + $0x368] sm:$0xff] }
  0x5f   : > { %4581 = vmatprep.subr.bf16.mxu1 %v4580_v30  ;;  %v806_v30 = vld [vmem:[%s7356_s24 + $0x348] sm:$0xff]  ;;  %v1203_v31 = vld [vmem:[%s7359_s23 + $0x30] sm:$0xff]  ;;  %v809_v43 = vld [vmem:[%s7356_s24 + $0x360] sm:$0xff] }
  0x60   : > { %v5912_v39 = vld [vmem:[%s5592_s22 + $0x30] sm:$0xff]  ;;  %v4474_v40 = vpack.c.bf16 %v806_v30, %v803_v29  ;;  %v4602_v41 = vpack.c.bf16 %v1206_v34, %v1203_v31  ;;  %v812_v44 = vld [vmem:[%s7356_s24 + $0x378] sm:$0xff]  ;;  %v1209_v45 = vld [vmem:[%s7359_s23 + $0x60] sm:$0xff] }
  0x61   : > { %4455 = vmatpush1.bf16.msra.mxu0 %v4454_v36  ;;  %v813_v36 = vld [vmem:[%s7356_s24 + $0x380] sm:$0xff]  ;;  %v1212_v47 = vld [vmem:[%s7359_s23 + $0x78] sm:$0xff]  ;;  %v1219_v52 = vld [vmem:[%s7359_s23 + $0xb0] sm:$0xff]  ;;  %v4478_v53 = vpack.c.bf16 %v812_v44, %v809_v43 }
  0x62   : > { %4583 = vmatpush3.bf16.msra.mxu1 %v4582_v37  ;;  %4457 = vmatprep.subr.bf16.mxu0 %v4456_v38  ;;  %v1210_v37 = vld [vmem:[%s7359_s23 + $0x68] sm:$0xff]  ;;  %v1213_v38 = vld [vmem:[%s7359_s23 + $0x80] sm:$0xff]  ;;  %v4606_v54 = vpack.c.bf16 %v1212_v47, %v1209_v45  ;;  %v815_v56 = vld [vmem:[%s7356_s24 + $0x390] sm:$0xff] }
  0x63   : > { %4585 = vmatprep.subr.bf16.mxu1 %v4584_v42  ;;  %v4476_v42 = vpack.c.bf16 %v813_v36, %v810_v35  ;;  %v4604_v46 = vpack.c.bf16 %v1213_v38, %v1210_v37  ;;  %v818_v57 = vld [vmem:[%s7356_s24 + $0x3a8] sm:$0xff]  ;;  %v1215_v58 = vld [vmem:[%s7359_s23 + $0x90] sm:$0xff]  ;;  %v1225_v0 = vld [vmem:[%s7359_s23 + $0xe0] sm:$0xff] }
  0x64   : > { %v1218_v60 = vld [vmem:[%s7359_s23 + $0xa8] sm:$0xff]  ;;  %v4482_v1 = vpack.c.bf16 %v818_v57, %v815_v56  ;;  %v821_v4 = vld [vmem:[%s7356_s24 + $0x3c0] sm:$0xff]  ;;  %v824_v5 = vld [vmem:[%s7356_s24 + $0x3d8] sm:$0xff] }
  0x65   : > { %4459 = vmatpush1.bf16.msra.mxu0 %v4458_v49  ;;  %v816_v49 = vld [vmem:[%s7356_s24 + $0x398] sm:$0xff]  ;;  %v4610_v2 = vpack.c.bf16 %v1218_v60, %v1215_v58  ;;  %v1221_v6 = vld [vmem:[%s7359_s23 + $0xc0] sm:$0xff]  ;;  %v1231_v13 = vld [vmem:[%s7359_s23 + $0x110] sm:$0xff]  ;;  %v4486_v14 = vpack.c.bf16 %v824_v5, %v821_v4 }
  0x66   : > { %4587 = vmatpush3.bf16.msra.mxu1 %v4586_v50  ;;  %4461 = vmatprep.subr.bf16.mxu0 %v4460_v51  ;;  %v819_v50 = vld [vmem:[%s7356_s24 + $0x3b0] sm:$0xff]  ;;  %v1216_v51 = vld [vmem:[%s7359_s23 + $0x98] sm:$0xff]  ;;  %v830_v19 = vld [vmem:[%s7356_s24 + $0x408] sm:$0xff] }
  0x67   : > { %4589 = vmatprep.subr.bf16.mxu1 %v4588_v55  ;;  %v4480_v55 = vpack.c.bf16 %v819_v50, %v816_v49  ;;  %v4608_v59 = vpack.c.bf16 %v1219_v52, %v1216_v51  ;;  %v1224_v8 = vld [vmem:[%s7359_s23 + $0xd8] sm:$0xff]  ;;  %v827_v18 = vld [vmem:[%s7356_s24 + $0x3f0] sm:$0xff]  ;;  %v1230_v23 = vld [vmem:[%s7359_s23 + $0x108] sm:$0xff] }
  0x68   : > { %v1227_v21 = vld [vmem:[%s7359_s23 + $0xf0] sm:$0xff]  ;;  %v1234_v29 = vld [vmem:[%s7359_s23 + $0x128] sm:$0xff]  ;;  %v1237_v30 = vld [vmem:[%s7359_s23 + $0x140] sm:$0xff]  ;;  %v4490_v31 = vpack.c.bf16 %v830_v19, %v827_v18 }
  0x69   : > { %4463 = vmatpush1.bf16.msra.mxu0 %v4462_v61  ;;  %v822_v61 = vld [vmem:[%s7356_s24 + $0x3c8] sm:$0xff]  ;;  %v833_v34 = vld [vmem:[%s7356_s24 + $0x420] sm:$0xff]  ;;  %v836_v35 = vld [vmem:[%s7356_s24 + $0x438] sm:$0xff]  ;;  %v4620_v37 = vpack.c.bf16 %v1237_v30, %v1234_v29 }
  0x6a   : > { %4591 = vmatpush3.bf16.msra.mxu1 %v4590_v62  ;;  %4465 = vmatprep.subr.bf16.mxu0 %v4464_v63  ;;  %v825_v62 = vld [vmem:[%s7356_s24 + $0x3e0] sm:$0xff]  ;;  %v1222_v63 = vld [vmem:[%s7359_s23 + $0xc8] sm:$0xff]  ;;  %v1236_v38 = vld [vmem:[%s7359_s23 + $0x138] sm:$0xff]  ;;  %v4494_v44 = vpack.c.bf16 %v836_v35, %v833_v34 }
  0x6b   : > { %4593 = vmatprep.subr.bf16.mxu1 %v4592_v3  ;;  %v4484_v3 = vpack.c.bf16 %v825_v62, %v822_v61  ;;  %v4612_v7 = vpack.c.bf16 %v1225_v0, %v1222_v63  ;;  %v1233_v36 = vld [vmem:[%s7359_s23 + $0x120] sm:$0xff]  ;;  %v1243_v43 = vld [vmem:[%s7359_s23 + $0x170] sm:$0xff]  ;;  %v842_v49 = vld [vmem:[%s7356_s24 + $0x468] sm:$0xff] }
  0x6c   : > { %v4622_v45 = vpack.c.bf16 %v1236_v38, %v1233_v36  ;;  %v839_v47 = vld [vmem:[%s7356_s24 + $0x450] sm:$0xff]  ;;  %v1242_v52 = vld [vmem:[%s7359_s23 + $0x168] sm:$0xff]  ;;  %v1249_v56 = vld [vmem:[%s7359_s23 + $0x1a0] sm:$0xff] }
  0x6d   : > { %4467 = vmatpush1.bf16.msra.mxu0 %v4466_v9  ;;  %v828_v9 = vld [vmem:[%s7356_s24 + $0x3f8] sm:$0xff]  ;;  %v1239_v50 = vld [vmem:[%s7359_s23 + $0x150] sm:$0xff]  ;;  %v4498_v57 = vpack.c.bf16 %v842_v49, %v839_v47  ;;  %v845_v60 = vld [vmem:[%s7356_s24 + $0x480] sm:$0xff] }
  0x6e   : > { %4595 = vmatpush3.bf16.msra.mxu1 %v4594_v11  ;;  %4469 = vmatprep.subr.bf16.mxu0 %v4468_v12  ;;  %v831_v11 = vld [vmem:[%s7356_s24 + $0x410] sm:$0xff]  ;;  %v1228_v12 = vld [vmem:[%s7359_s23 + $0xf8] sm:$0xff]  ;;  %v4626_v58 = vpack.c.bf16 %v1242_v52, %v1239_v50  ;;  %v1245_v62 = vld [vmem:[%s7359_s23 + $0x180] sm:$0xff] }
  0x6f   : > { %4597 = vmatprep.subr.bf16.mxu1 %v4596_v16  ;;  %v4614_v16 = vpack.c.bf16 %v1224_v8, %v1221_v6  ;;  %v4488_v17 = vpack.c.bf16 %v831_v11, %v828_v9  ;;  %v4616_v22 = vpack.c.bf16 %v1231_v13, %v1228_v12  ;;  %v848_v61 = vld [vmem:[%s7356_s24 + $0x498] sm:$0xff]  ;;  %v1255_v4 = vld [vmem:[%s7359_s23 + $0x1d0] sm:$0xff]  ;;  %v854_v9 = vld [vmem:[%s7356_s24 + $0x4c8] sm:$0xff] }
  0x70   : > { %958 = vmatmul.mubr.f32.vlgmr.msra.gmra.mrb[0].mxu0 %v5672_v48  ;;  %v1248_v0 = vld [vmem:[%s7359_s23 + $0x198] sm:$0xff]  ;;  %v4502_v5 = vpack.c.bf16 %v848_v61, %v845_v60  ;;  %v851_v8 = vld [vmem:[%s7356_s24 + $0x4b0] sm:$0xff]  ;;  %v1254_v13 = vld [vmem:[%s7359_s23 + $0x1c8] sm:$0xff] }
  0x71   : > { %1187 = vmatmul.mubr.f32.vlgmr.msra.gmra.mrb[4].mxu1 %v5880_v25  ;;  %4471 = vmatpush1.bf16.msra.mxu0 %v4470_v26  ;;  %v834_v26 = vld [vmem:[%s7356_s24 + $0x428] sm:$0xff]  ;;  %v4630_v6 = vpack.c.bf16 %v1248_v0, %v1245_v62  ;;  %v1251_v11 = vld [vmem:[%s7359_s23 + $0x1b0] sm:$0xff]  ;;  %v1261_v18 = vld [vmem:[%s7359_s23 + $0x200] sm:$0xff]  ;;  %v4506_v19 = vpack.c.bf16 %v854_v9, %v851_v8 }
  0x72   : > { %4599 = vmatpush1.bf16.msra.mxu1 %v4598_v28  ;;  %1191 = vmatprep.mubr.f32.mxu1 %v5883_v27  ;;  %v837_v28 = vld [vmem:[%s7356_s24 + $0x440] sm:$0xff]  ;;  %v1260_v30 = vld [vmem:[%s7359_s23 + $0x1f8] sm:$0xff]  ;;  %v1267_v34 = vld [vmem:[%s7359_s23 + $0x230] sm:$0xff] }
  0x73   : > { %4473 = vmatprep.subr.bf16.mxu0 %v4472_v32  ;;  %4601 = vmatprep.subr.bf16.mxu1 %v4600_v33  ;;  %v4618_v32 = vpack.c.bf16 %v1230_v23, %v1227_v21  ;;  %v4492_v33 = vpack.c.bf16 %v837_v28, %v834_v26  ;;  %v4634_v21 = vpack.c.bf16 %v1254_v13, %v1251_v11  ;;  %v857_v23 = vld [vmem:[%s7356_s24 + $0x4e0] sm:$0xff]  ;;  %v860_v26 = vld [vmem:[%s7356_s24 + $0x4f8] sm:$0xff]  ;;  %v863_v38 = vld [vmem:[%s7356_s24 + $0x510] sm:$0xff] }
  0x74   : > { %963 = vmatprep.mubr.f32.mxu0 %v5727_v10  ;;  %v1257_v28 = vld [vmem:[%s7359_s23 + $0x1e0] sm:$0xff]  ;;  %v4510_v35 = vpack.c.bf16 %v860_v26, %v857_v23  ;;  %v1279_v60 = vld [vmem:[%s7359_s23 + $0x290] sm:$0xff] }
  0x75   : > { %1192 = vmatmul.mubr.f32.gmra.mrb[6].mxu1 %v5912_v39  ;;  %4475 = vmatpush1.bf16.msra.mxu0 %v4474_v40  ;;  %v840_v40 = vld [vmem:[%s7356_s24 + $0x458] sm:$0xff]  ;;  %v4638_v36 = vpack.c.bf16 %v1260_v30, %v1257_v28  ;;  %v1273_v47 = vld [vmem:[%s7359_s23 + $0x260] sm:$0xff]  ;;  %v875_v0 = vld [vmem:[%s7356_s24 + $0x570] sm:$0xff] }
  0x76   : > { %4603 = vmatpush1.bf16.msra.mxu1 %v4602_v41  ;;  %4477 = vmatprep.subr.bf16.mxu0 %v4476_v42  ;;  %v843_v41 = vld [vmem:[%s7356_s24 + $0x470] sm:$0xff]  ;;  %v1240_v42 = vld [vmem:[%s7359_s23 + $0x158] sm:$0xff]  ;;  %v869_v52 = vld [vmem:[%s7356_s24 + $0x540] sm:$0xff] }
  0x77   : > { %4605 = vmatprep.subr.bf16.mxu1 %v4604_v46  ;;  %964 = vmatmul.mubr.f32.gmra.mrb[2].mxu0 %v5736_v15  ;;  %v4496_v46 = vpack.c.bf16 %v843_v41, %v840_v40  ;;  %v4624_v51 = vpack.c.bf16 %v1243_v43, %v1240_v42  ;;  %v866_v40 = vld [vmem:[%s7356_s24 + $0x528] sm:$0xff]  ;;  %v1263_v41 = vld [vmem:[%s7359_s23 + $0x210] sm:$0xff]  ;;  %v1285_v8 = vld [vmem:[%s7359_s23 + $0x2c0] sm:$0xff] }
  0x78   : > { %1034 = vmatprep.mubr.f32.mxu0 %v5756_v24  ;;  %1453 = vmatprep.mubr.f32.mxu1 %v5613_v20  ;;  %v1266_v43 = vld [vmem:[%s7359_s23 + $0x228] sm:$0xff]  ;;  %v4514_v49 = vpack.c.bf16 %v866_v40, %v863_v38  ;;  %v881_v13 = vld [vmem:[%s7356_s24 + $0x5a0] sm:$0xff]  ;;  %v1291_v23 = vld [vmem:[%s7359_s23 + $0x2f0] sm:$0xff] }
  0x79   : > { %4479 = vmatpush1.bf16.msra.mxu0 %v4478_v53  ;;  %v846_v53 = vld [vmem:[%s7356_s24 + $0x488] sm:$0xff]  ;;  %v4642_v50 = vpack.c.bf16 %v1266_v43, %v1263_v41  ;;  %v887_v30 = vld [vmem:[%s7356_s24 + $0x5d0] sm:$0xff]  ;;  %v1297_v38 = vld [vmem:[%s7359_s23 + $0x320] sm:$0xff] }
  0x7a   : > { %4607 = vmatpush1.bf16.msra.mxu1 %v4606_v54  ;;  %4481 = vmatprep.subr.bf16.mxu0 %v4480_v55  ;;  %v849_v54 = vld [vmem:[%s7356_s24 + $0x4a0] sm:$0xff]  ;;  %v1246_v55 = vld [vmem:[%s7359_s23 + $0x188] sm:$0xff]  ;;  %v1199_v43 = vld [vmem:[%s7359_s23 + $0x10] sm:$0xff] }
  0x7b   : > { %4609 = vmatprep.subr.bf16.mxu1 %v4608_v59  ;;  %v4500_v59 = vpack.c.bf16 %v849_v54, %v846_v53  ;;  %v4628_v63 = vpack.c.bf16 %v1249_v56, %v1246_v55  ;;  %v872_v53 = vld [vmem:[%s7356_s24 + $0x558] sm:$0xff]  ;;  %v1269_v54 = vld [vmem:[%s7359_s23 + $0x240] sm:$0xff] }
  0x7c   : > { %v1272_v56 = vld [vmem:[%s7359_s23 + $0x258] sm:$0xff]  ;;  %v4518_v61 = vpack.c.bf16 %v872_v53, %v869_v52 }
  0x7d   : > { %4483 = vmatpush1.bf16.msra.mxu0 %v4482_v1  ;;  %v852_v1 = vld [vmem:[%s7356_s24 + $0x4b8] sm:$0xff]  ;;  %v4646_v62 = vpack.c.bf16 %v1272_v56, %v1269_v54  ;;  %v1205_v56 = vld [vmem:[%s7359_s23 + $0x40] sm:$0xff] }
  0x7e   : > { %4611 = vmatpush1.bf16.msra.mxu1 %v4610_v2  ;;  %4485 = vmatprep.subr.bf16.mxu0 %v4484_v3  ;;  %v855_v2 = vld [vmem:[%s7356_s24 + $0x4d0] sm:$0xff]  ;;  %v1252_v3 = vld [vmem:[%s7359_s23 + $0x1b8] sm:$0xff] }
  0x7f   : > { %4613 = vmatprep.subr.bf16.mxu1 %v4612_v7  ;;  %v4504_v7 = vpack.c.bf16 %v855_v2, %v852_v1  ;;  %v4632_v12 = vpack.c.bf16 %v1255_v4, %v1252_v3  ;;  %v878_v1 = vld [vmem:[%s7356_s24 + $0x588] sm:$0xff]  ;;  %v1275_v2 = vld [vmem:[%s7359_s23 + $0x270] sm:$0xff]  ;;  %v1256_v52 = vld [vmem:[%s7359_s23 + $0x1d8] sm:$0xff] }
  0x80   : > { %v1278_v4 = vld [vmem:[%s7359_s23 + $0x288] sm:$0xff]  ;;  %v4522_v9 = vpack.c.bf16 %v878_v1, %v875_v0  ;;  %v1309_v0 = vld [vmem:[%s7359_s23 + $0x380] sm:$0xff] }
  0x81   : > { %4487 = vmatpush1.bf16.msra.mxu0 %v4486_v14  ;;  %v858_v14 = vld [vmem:[%s7356_s24 + $0x4e8] sm:$0xff]  ;;  %v4650_v11 = vpack.c.bf16 %v1278_v4, %v1275_v2  ;;  %v1211_v4 = vld [vmem:[%s7359_s23 + $0x70] sm:$0xff] }
  0x82   : > { %4615 = vmatpush1.bf16.msra.mxu1 %v4614_v16  ;;  %4489 = vmatprep.subr.bf16.mxu0 %v4488_v17  ;;  %v861_v16 = vld [vmem:[%s7356_s24 + $0x500] sm:$0xff]  ;;  %v1258_v17 = vld [vmem:[%s7359_s23 + $0x1e8] sm:$0xff] }
  0x83   : > { %4617 = vmatprep.subr.bf16.mxu1 %v4616_v22  ;;  %v4508_v22 = vpack.c.bf16 %v861_v16, %v858_v14  ;;  %v4636_v29 = vpack.c.bf16 %v1261_v18, %v1258_v17  ;;  %v884_v14 = vld [vmem:[%s7356_s24 + $0x5b8] sm:$0xff]  ;;  %v1281_v16 = vld [vmem:[%s7359_s23 + $0x2a0] sm:$0xff] }
  0x84   : > { %v1284_v18 = vld [vmem:[%s7359_s23 + $0x2b8] sm:$0xff]  ;;  %v4526_v26 = vpack.c.bf16 %v884_v14, %v881_v13  ;;  %v1311_v14 = vld [vmem:[%s7359_s23 + $0x390] sm:$0xff] }
  0x85   : > { %4491 = vmatpush1.bf16.msra.mxu0 %v4490_v31  ;;  %v864_v31 = vld [vmem:[%s7356_s24 + $0x518] sm:$0xff]  ;;  %v4654_v28 = vpack.c.bf16 %v1284_v18, %v1281_v16  ;;  %v1217_v16 = vld [vmem:[%s7359_s23 + $0xa0] sm:$0xff]  ;;  %v1271_v18 = vld [vmem:[%s7359_s23 + $0x250] sm:$0xff] }
  0x86   : > { %4619 = vmatpush1.bf16.msra.mxu1 %v4618_v32  ;;  %4493 = vmatprep.subr.bf16.mxu0 %v4492_v33  ;;  %v867_v32 = vld [vmem:[%s7356_s24 + $0x530] sm:$0xff]  ;;  %v1264_v33 = vld [vmem:[%s7359_s23 + $0x218] sm:$0xff] }
  0x87   : > { %4621 = vmatprep.subr.bf16.mxu1 %v4620_v37  ;;  %v4512_v37 = vpack.c.bf16 %v867_v32, %v864_v31  ;;  %v4640_v42 = vpack.c.bf16 %v1267_v34, %v1264_v33  ;;  %v890_v31 = vld [vmem:[%s7356_s24 + $0x5e8] sm:$0xff]  ;;  %v1287_v32 = vld [vmem:[%s7359_s23 + $0x2d0] sm:$0xff] }
  0x88   : > { %v1290_v34 = vld [vmem:[%s7359_s23 + $0x2e8] sm:$0xff]  ;;  %v4530_v40 = vpack.c.bf16 %v890_v31, %v887_v30  ;;  %v1320_v31 = vld [vmem:[%s7359_s23 + $0x3d8] sm:$0xff] }
  0x89   : > { %4495 = vmatpush1.bf16.msra.mxu0 %v4494_v44  ;;  %v870_v44 = vld [vmem:[%s7356_s24 + $0x548] sm:$0xff]  ;;  %v4658_v41 = vpack.c.bf16 %v1290_v34, %v1287_v32  ;;  %v1277_v32 = vld [vmem:[%s7359_s23 + $0x280] sm:$0xff]  ;;  %v1324_v34 = vld [vmem:[%s7359_s23 + $0x3f8] sm:$0xff] }
  0x8a   : > { %4623 = vmatpush1.bf16.msra.mxu1 %v4622_v45  ;;  %4497 = vmatprep.subr.bf16.mxu0 %v4496_v46  ;;  %v873_v45 = vld [vmem:[%s7356_s24 + $0x560] sm:$0xff]  ;;  %v1270_v46 = vld [vmem:[%s7359_s23 + $0x248] sm:$0xff] }
  0x8b   : > { %4625 = vmatprep.subr.bf16.mxu1 %v4624_v51  ;;  %v4516_v51 = vpack.c.bf16 %v873_v45, %v870_v44  ;;  %v4644_v55 = vpack.c.bf16 %v1273_v47, %v1270_v46  ;;  %v1202_v44 = vld [vmem:[%s7359_s23 + $0x28] sm:$0xff]  ;;  %v1293_v46 = vld [vmem:[%s7359_s23 + $0x300] sm:$0xff]  ;;  %v1296_v47 = vld [vmem:[%s7359_s23 + $0x318] sm:$0xff] }
  0x8c   : > { %v4726_v53 = vpack.c.bf16 %v1202_v44, %v1199_v43  ;;  %v4662_v54 = vpack.c.bf16 %v1296_v47, %v1293_v46  ;;  %v1226_v30 = vld [vmem:[%s7359_s23 + $0xe8] sm:$0xff] }
  0x8d   : > { %4499 = vmatpush1.bf16.msra.mxu0 %v4498_v57  ;;  %v876_v57 = vld [vmem:[%s7356_s24 + $0x578] sm:$0xff]  ;;  %v1326_v44 = vld [vmem:[%s7359_s23 + $0x408] sm:$0xff] }
  0x8e   : > { %4627 = vmatpush1.bf16.msra.mxu1 %v4626_v58  ;;  %4501 = vmatprep.subr.bf16.mxu0 %v4500_v59  ;;  %v879_v58 = vld [vmem:[%s7356_s24 + $0x590] sm:$0xff]  ;;  %v1276_v59 = vld [vmem:[%s7359_s23 + $0x278] sm:$0xff]  ;;  %v1286_v46 = vld [vmem:[%s7359_s23 + $0x2c8] sm:$0xff] }
  0x8f   : > { %4629 = vmatprep.subr.bf16.mxu1 %v4628_v63  ;;  %v4520_v63 = vpack.c.bf16 %v879_v58, %v876_v57  ;;  %v4648_v3 = vpack.c.bf16 %v1279_v60, %v1276_v59  ;;  %v1208_v57 = vld [vmem:[%s7359_s23 + $0x58] sm:$0xff]  ;;  %v1302_v60 = vld [vmem:[%s7359_s23 + $0x348] sm:$0xff] }
  0x90   : > { %v4730_v1 = vpack.c.bf16 %v1208_v57, %v1205_v56  ;;  %v1330_v47 = vld [vmem:[%s7359_s23 + $0x428] sm:$0xff]  ;;  %v1332_v57 = vld [vmem:[%s7359_s23 + $0x438] sm:$0xff] }
  0x91   : > { %4503 = vmatpush1.bf16.msra.mxu0 %v4502_v5  ;;  %v882_v5 = vld [vmem:[%s7356_s24 + $0x5a8] sm:$0xff] }
  0x92   : > { %4631 = vmatpush1.bf16.msra.mxu1 %v4630_v6  ;;  %4505 = vmatprep.subr.bf16.mxu0 %v4504_v7  ;;  %v885_v6 = vld [vmem:[%s7356_s24 + $0x5c0] sm:$0xff]  ;;  %v1282_v7 = vld [vmem:[%s7359_s23 + $0x2a8] sm:$0xff] }
  0x93   : > { %4633 = vmatprep.subr.bf16.mxu1 %v4632_v12  ;;  %v4524_v12 = vpack.c.bf16 %v885_v6, %v882_v5  ;;  %v4652_v17 = vpack.c.bf16 %v1285_v8, %v1282_v7  ;;  %v1214_v5 = vld [vmem:[%s7359_s23 + $0x88] sm:$0xff]  ;;  %v1265_v6 = vld [vmem:[%s7359_s23 + $0x220] sm:$0xff]  ;;  %v1268_v7 = vld [vmem:[%s7359_s23 + $0x238] sm:$0xff] }
  0x94   : > { %v1312_v8 = vld [vmem:[%s7359_s23 + $0x398] sm:$0xff]  ;;  %v4736_v13 = vpack.c.bf16 %v1268_v7, %v1265_v6  ;;  %v1345_v6 = vld [vmem:[%s7359_s23 + $0x4a0] sm:$0xff] }
  0x95   : > { %4507 = vmatpush1.bf16.msra.mxu0 %v4506_v19  ;;  %v888_v19 = vld [vmem:[%s7356_s24 + $0x5d8] sm:$0xff] }
  0x96   : > { %4635 = vmatpush1.bf16.msra.mxu1 %v4634_v21  ;;  %4509 = vmatprep.subr.bf16.mxu0 %v4508_v22  ;;  %v891_v21 = vld [vmem:[%s7356_s24 + $0x5f0] sm:$0xff]  ;;  %v1288_v22 = vld [vmem:[%s7359_s23 + $0x2d8] sm:$0xff] }
  0x97   : > { %4637 = vmatprep.subr.bf16.mxu1 %v4636_v29  ;;  %v4528_v29 = vpack.c.bf16 %v891_v21, %v888_v19  ;;  %v4656_v33 = vpack.c.bf16 %v1291_v23, %v1288_v22  ;;  %v1274_v19 = vld [vmem:[%s7359_s23 + $0x268] sm:$0xff]  ;;  %v1321_v22 = vld [vmem:[%s7359_s23 + $0x3e0] sm:$0xff] }
  0x98   : > { %v1318_v21 = vld [vmem:[%s7359_s23 + $0x3c8] sm:$0xff] }
  0x99   : > { %4511 = vmatpush1.bf16.msra.mxu0 %v4510_v35  ;;  %v1247_v35 = vld [vmem:[%s7359_s23 + $0x190] sm:$0xff] }
  0x9a   : > { %4639 = vmatpush1.bf16.msra.mxu1 %v4638_v36  ;;  %4513 = vmatprep.subr.bf16.mxu0 %v4512_v37  ;;  %v1250_v36 = vld [vmem:[%s7359_s23 + $0x1a8] sm:$0xff] }
  0x9b   : > { %4641 = vmatprep.subr.bf16.mxu1 %v4640_v42  ;;  %v1294_v37 = vld [vmem:[%s7359_s23 + $0x308] sm:$0xff]  ;;  %v4724_v42 = vpack.c.bf16 %v1250_v36, %v1247_v35  ;;  %v1327_v35 = vld [vmem:[%s7359_s23 + $0x410] sm:$0xff] }
  0x9c   : > { %v4660_v45 = vpack.c.bf16 %v1297_v38, %v1294_v37  ;;  %v4680_v43 = vpack.c.bf16 %v1327_v35, %v1324_v34  ;;  %v5132_v35 = vld [vmem:[%s5592_s22 + $0x28] sm:$0xff] }
  0x9d   : > { %4515 = vmatpush1.bf16.msra.mxu0 %v4514_v49  ;;  %v1300_v49 = vld [vmem:[%s7359_s23 + $0x338] sm:$0xff] }
  0x9e   : > { %4643 = vmatpush1.bf16.msra.mxu1 %v4642_v50  ;;  %4517 = vmatprep.subr.bf16.mxu0 %v4516_v51  ;;  %v1303_v50 = vld [vmem:[%s7359_s23 + $0x350] sm:$0xff]  ;;  %v1253_v51 = vld [vmem:[%s7359_s23 + $0x1c0] sm:$0xff] }
  0x9f   : > { %4645 = vmatprep.subr.bf16.mxu1 %v4644_v55  ;;  %v1299_v55 = vld [vmem:[%s7359_s23 + $0x330] sm:$0xff]  ;;  %v4664_v58 = vpack.c.bf16 %v1303_v50, %v1300_v49  ;;  %v4728_v59 = vpack.c.bf16 %v1256_v52, %v1253_v51  ;;  %v1333_v49 = vld [vmem:[%s7359_s23 + $0x440] sm:$0xff] }
  0xa0   : > { %v4666_v2 = vpack.c.bf16 %v1302_v60, %v1299_v55  ;;  %v1238_v55 = vld [vmem:[%s7359_s23 + $0x148] sm:$0xff]  ;;  %v4684_v56 = vpack.c.bf16 %v1333_v49, %v1330_v47  ;;  %v1336_v60 = vld [vmem:[%s7359_s23 + $0x458] sm:$0xff]  ;;  %v1363_v47 = vld [vmem:[%s7359_s23 + $0x530] sm:$0xff] }
  0xa1   : > { %4519 = vmatpush1.bf16.msra.mxu0 %v4518_v61  ;;  %v1259_v61 = vld [vmem:[%s7359_s23 + $0x1f0] sm:$0xff]  ;;  %v5133_v49 = vld [vmem:[%s5592_s22 + $0x20] sm:$0xff] }
  0xa2   : > { %4647 = vmatpush1.bf16.msra.mxu1 %v4646_v62  ;;  %4521 = vmatprep.subr.bf16.mxu0 %v4520_v63  ;;  %v1262_v62 = vld [vmem:[%s7359_s23 + $0x208] sm:$0xff] }
  0xa3   : > { %4649 = vmatprep.subr.bf16.mxu1 %v4648_v3  ;;  %v1306_v63 = vld [vmem:[%s7359_s23 + $0x368] sm:$0xff]  ;;  %v4732_v3 = vpack.c.bf16 %v1262_v62, %v1259_v61  ;;  %v1339_v61 = vld [vmem:[%s7359_s23 + $0x470] sm:$0xff] }
  0xa5   : > { %4523 = vmatpush1.bf16.msra.mxu0 %v4522_v9  ;;  %v1315_v9 = vld [vmem:[%s7359_s23 + $0x3b0] sm:$0xff] }
  0xa6   : > { %4651 = vmatpush1.bf16.msra.mxu1 %v4650_v11  ;;  %4525 = vmatprep.subr.bf16.mxu0 %v4524_v12  ;;  %v4734_v11 = vpack.c.bf16 %v1214_v5, %v1211_v4  ;;  %v1338_v4 = vld [vmem:[%s7359_s23 + $0x468] sm:$0xff]  ;;  %v1343_v5 = vld [vmem:[%s7359_s23 + $0x490] sm:$0xff] }
  0xa7   : > { %4653 = vmatprep.subr.bf16.mxu1 %v4652_v17  ;;  %v4672_v17 = vpack.c.bf16 %v1315_v9, %v1312_v8 }
  0xa9   : > { %4527 = vmatpush1.bf16.msra.mxu0 %v4526_v26 }
  0xaa   : > { %4655 = vmatpush1.bf16.msra.mxu1 %v4654_v28  ;;  %4529 = vmatprep.subr.bf16.mxu0 %v4528_v29  ;;  %v4740_v28 = vpack.c.bf16 %v1274_v19, %v1271_v18  ;;  %v1223_v29 = vld [vmem:[%s7359_s23 + $0xd0] sm:$0xff] }
  0xab   : > { %4657 = vmatprep.subr.bf16.mxu1 %v4656_v33  ;;  %v1280_v33 = vld [vmem:[%s7359_s23 + $0x298] sm:$0xff]  ;;  %v4742_v36 = vpack.c.bf16 %v1226_v30, %v1223_v29  ;;  %v1351_v18 = vld [vmem:[%s7359_s23 + $0x4d0] sm:$0xff]  ;;  %v1350_v29 = vld [vmem:[%s7359_s23 + $0x4c8] sm:$0xff] }
  0xac   : > { %v4744_v38 = vpack.c.bf16 %v1280_v33, %v1277_v32  ;;  %v1355_v30 = vld [vmem:[%s7359_s23 + $0x4f0] sm:$0xff]  ;;  %v1354_v32 = vld [vmem:[%s7359_s23 + $0x4e8] sm:$0xff]  ;;  %v1357_v33 = vld [vmem:[%s7359_s23 + $0x500] sm:$0xff] }
  0xad   : > { %4531 = vmatpush1.bf16.msra.mxu0 %v4530_v40  ;;  %v1323_v40 = vld [vmem:[%s7359_s23 + $0x3f0] sm:$0xff] }
  0xae   : > { %4659 = vmatpush1.bf16.msra.mxu1 %v4658_v41  ;;  %4725 = vmatprep.subr.bf16.mxu0 %v4724_v42  ;;  %v1229_v41 = vld [vmem:[%s7359_s23 + $0x100] sm:$0xff]  ;;  %v1232_v42 = vld [vmem:[%s7359_s23 + $0x118] sm:$0xff]  ;;  %v4682_v51 = vpack.c.bf16 %v1326_v44, %v1323_v40  ;;  %v1307_v40 = vld [vmem:[%s7359_s23 + $0x370] sm:$0xff] }
  0xaf   : > { %4661 = vmatprep.subr.bf16.mxu1 %v4660_v45  ;;  %v1283_v45 = vld [vmem:[%s7359_s23 + $0x2b0] sm:$0xff]  ;;  %v4746_v50 = vpack.c.bf16 %v1232_v42, %v1229_v41  ;;  %v1310_v41 = vld [vmem:[%s7359_s23 + $0x388] sm:$0xff]  ;;  %v4700_v42 = vpack.c.bf16 %v1357_v33, %v1354_v32  ;;  %v1361_v44 = vld [vmem:[%s7359_s23 + $0x520] sm:$0xff] }
  0xb0   : > { %1035 = vmatmul.mubr.f32.vlgmr.msra.gmra.mrb[0].mxu0 %v5880_v25  ;;  %v1305_v25 = vld [vmem:[%s7359_s23 + $0x360] sm:$0xff]  ;;  %v4748_v52 = vpack.c.bf16 %v1286_v46, %v1283_v45  ;;  %v1364_v45 = vld [vmem:[%s7359_s23 + $0x538] sm:$0xff]  ;;  %v1387_v33 = vld [vmem:[%s7359_s23 + $0x5f0] sm:$0xff] }
  0xb1   : > { %1454 = vmatmul.mubr.f32.vlgmr.msra.gmra.mrb[8].mxu1 %v5672_v48  ;;  %4727 = vmatpush3.bf16.msra.mxu0 %v4726_v53  ;;  %v4668_v48 = vpack.c.bf16 %v1309_v0, %v1306_v63  ;;  %v1329_v53 = vld [vmem:[%s7359_s23 + $0x420] sm:$0xff]  ;;  %v1360_v46 = vld [vmem:[%s7359_s23 + $0x518] sm:$0xff] }
  0xb2   : > { %4663 = vmatpush1.bf16.msra.mxu1 %v4662_v54  ;;  %1040 = vmatprep.mubr.f32.mxu0 %v5883_v27  ;;  %v1308_v27 = vld [vmem:[%s7359_s23 + $0x378] sm:$0xff]  ;;  %v1235_v54 = vld [vmem:[%s7359_s23 + $0x130] sm:$0xff]  ;;  %v4686_v63 = vpack.c.bf16 %v1332_v57, %v1329_v53  ;;  %v4768_v53 = vpack.c.bf16 %v1364_v45, %v1361_v44  ;;  %v4704_v57 = vpack.c.bf16 %v1363_v47, %v1360_v46 }
  0xb3   : > { %4665 = vmatprep.subr.bf16.mxu1 %v4664_v58  ;;  %4729 = vmatprep.subr.bf16.mxu0 %v4728_v59  ;;  %v4670_v12 = vpack.c.bf16 %v1308_v27, %v1305_v25  ;;  %v1289_v58 = vld [vmem:[%s7359_s23 + $0x2e0] sm:$0xff]  ;;  %v1292_v59 = vld [vmem:[%s7359_s23 + $0x2f8] sm:$0xff]  ;;  %v4750_v62 = vpack.c.bf16 %v1238_v55, %v1235_v54  ;;  %v4688_v25 = vpack.c.bf16 %v1339_v61, %v1336_v60  ;;  %v1342_v27 = vld [vmem:[%s7359_s23 + $0x488] sm:$0xff] }
  0xb4   : > { %1041 = vmatmul.mubr.f32.gmra.mrb[2].mxu0 %v5912_v39  ;;  %1459 = vmatprep.mubr.f32.mxu1 %v5727_v10  ;;  %v1220_v10 = vld [vmem:[%s7359_s23 + $0xb8] sm:$0xff]  ;;  %v4752_v0 = vpack.c.bf16 %v1292_v59, %v1289_v58  ;;  %v1359_v54 = vld [vmem:[%s7359_s23 + $0x510] sm:$0xff]  ;;  %v1313_v55 = vld [vmem:[%s7359_s23 + $0x3a0] sm:$0xff] }
  0xb5   : > { %4731 = vmatpush3.bf16.msra.mxu0 %v4730_v1  ;;  %1607 = vmatprep.mubr.f32.mxu0 %v5613_v20  ;;  %v1314_v20 = vld [vmem:[%s7359_s23 + $0x3a8] sm:$0xff]  ;;  %v4738_v23 = vpack.c.bf16 %v1220_v10, %v1217_v16  ;;  %v1335_v1 = vld [vmem:[%s7359_s23 + $0x450] sm:$0xff]  ;;  %v1344_v16 = vld [vmem:[%s7359_s23 + $0x498] sm:$0xff] }
  0xb6   : > { %4667 = vmatpush1.bf16.msra.mxu1 %v4666_v2  ;;  %4733 = vmatprep.subr.bf16.mxu0 %v4732_v3  ;;  %v4674_v26 = vpack.c.bf16 %v1314_v20, %v1311_v14  ;;  %v1241_v2 = vld [vmem:[%s7359_s23 + $0x160] sm:$0xff]  ;;  %v1244_v3 = vld [vmem:[%s7359_s23 + $0x178] sm:$0xff]  ;;  %v4690_v8 = vpack.c.bf16 %v1338_v4, %v1335_v1  ;;  %v4692_v14 = vpack.c.bf16 %v1345_v6, %v1342_v27  ;;  %v1362_v58 = vld [vmem:[%s7359_s23 + $0x528] sm:$0xff] }
  0xb7   : > { %4669 = vmatprep.subr.bf16.mxu1 %v4668_v48  ;;  %1460 = vmatmul.mubr.f32.gmra.mrb[10].mxu1 %v5736_v15  ;;  %v1317_v15 = vld [vmem:[%s7359_s23 + $0x3c0] sm:$0xff]  ;;  %v1346_v48 = vld [vmem:[%s7359_s23 + $0x4a8] sm:$0xff]  ;;  %v4754_v7 = vpack.c.bf16 %v1244_v3, %v1241_v2  ;;  %v1348_v20 = vld [vmem:[%s7359_s23 + $0x4b8] sm:$0xff] }
  0xb8   : > { %1530 = vmatprep.mubr.f32.mxu1 %v5756_v24  ;;  %v4676_v24 = vpack.c.bf16 %v1321_v22, %v1318_v21  ;;  %v4678_v37 = vpack.c.bf16 %v1320_v31, %v1317_v15  ;;  %v4756_v9 = vpack.c.bf16 %v1346_v48, %v1343_v5  ;;  %v1349_v10 = vld [vmem:[%s7359_s23 + $0x4c0] sm:$0xff]  ;;  %v4696_v15 = vpack.c.bf16 %v1351_v18, %v1348_v20  ;;  %v1367_v59 = vld [vmem:[%s7359_s23 + $0x550] sm:$0xff]  ;;  %v1370_v60 = vld [vmem:[%s7359_s23 + $0x568] sm:$0xff] }
  0xb9   : > { %4735 = vmatpush3.bf16.msra.mxu0 %v4734_v11  ;;  %v1341_v11 = vld [vmem:[%s7359_s23 + $0x480] sm:$0xff]  ;;  %v1366_v61 = vld [vmem:[%s7359_s23 + $0x548] sm:$0xff]  ;;  %v4772_v1 = vpack.c.bf16 %v1370_v60, %v1367_v59  ;;  %v1319_v3 = vld [vmem:[%s7359_s23 + $0x3d0] sm:$0xff] }
  0xba   : > { %4671 = vmatpush1.bf16.msra.mxu1 %v4670_v12  ;;  %4737 = vmatprep.subr.bf16.mxu0 %v4736_v13  ;;  %v1295_v12 = vld [vmem:[%s7359_s23 + $0x310] sm:$0xff]  ;;  %v1298_v13 = vld [vmem:[%s7359_s23 + $0x328] sm:$0xff]  ;;  %v4694_v21 = vpack.c.bf16 %v1344_v16, %v1341_v11  ;;  %v5131_v31 = vld [vmem:[%s5592_s22] sm:$0xff] }
  0xbb   : > { %4673 = vmatprep.subr.bf16.mxu1 %v4672_v17  ;;  %v1352_v17 = vld [vmem:[%s7359_s23 + $0x4d8] sm:$0xff]  ;;  %v4758_v19 = vpack.c.bf16 %v1298_v13, %v1295_v12  ;;  %v1365_v2 = vld [vmem:[%s7359_s23 + $0x540] sm:$0xff]  ;;  %v1371_v12 = vld [vmem:[%s7359_s23 + $0x570] sm:$0xff] }
  0xbc   : > { %v4760_v22 = vpack.c.bf16 %v1352_v17, %v1349_v10  ;;  %v1368_v5 = vld [vmem:[%s7359_s23 + $0x558] sm:$0xff]  ;;  %v1373_v48 = vld [vmem:[%s7359_s23 + $0x580] sm:$0xff]  ;;  %v1374_v10 = vld [vmem:[%s7359_s23 + $0x588] sm:$0xff] }
  0xbd   : > { %4739 = vmatpush3.bf16.msra.mxu0 %v4738_v23  ;;  %v1347_v23 = vld [vmem:[%s7359_s23 + $0x4b0] sm:$0xff]  ;;  %v1376_v27 = vld [vmem:[%s7359_s23 + $0x598] sm:$0xff]  ;;  %v1325_v13 = vld [vmem:[%s7359_s23 + $0x400] sm:$0xff] }
  0xbe   : > { %4675 = vmatpush1.bf16.msra.mxu1 %v4674_v26  ;;  %4741 = vmatprep.subr.bf16.mxu0 %v4740_v28  ;;  %v1301_v26 = vld [vmem:[%s7359_s23 + $0x340] sm:$0xff]  ;;  %v1304_v28 = vld [vmem:[%s7359_s23 + $0x358] sm:$0xff]  ;;  %v4776_v11 = vpack.c.bf16 %v1376_v27, %v1373_v48  ;;  %v1379_v17 = vld [vmem:[%s7359_s23 + $0x5b0] sm:$0xff] }
  0xbf   : > { %4677 = vmatprep.subr.bf16.mxu1 %v4676_v24  ;;  %v1358_v24 = vld [vmem:[%s7359_s23 + $0x508] sm:$0xff]  ;;  %v4762_v34 = vpack.c.bf16 %v1304_v28, %v1301_v26  ;;  %v1372_v6 = vld [vmem:[%s7359_s23 + $0x578] sm:$0xff]  ;;  %v1377_v26 = vld [vmem:[%s7359_s23 + $0x5a0] sm:$0xff] }
  0xc0   : > { %v1382_v20 = vld [vmem:[%s7359_s23 + $0x5c8] sm:$0xff]  ;;  %v1331_v28 = vld [vmem:[%s7359_s23 + $0x430] sm:$0xff]  ;;  %v1384_v32 = vld [vmem:[%s7359_s23 + $0x5d8] sm:$0xff] }
  0xc1   : > { %4743 = vmatpush3.bf16.msra.mxu0 %v4742_v36  ;;  %v4698_v36 = vpack.c.bf16 %v1350_v29, %v1347_v23  ;;  %v1378_v18 = vld [vmem:[%s7359_s23 + $0x5a8] sm:$0xff]  ;;  %v4780_v23 = vpack.c.bf16 %v1382_v20, %v1379_v17  ;;  %v5135_v45 = vld [vmem:[%s5592_s22 + $0x10] sm:$0xff]  ;;  %v5136_v46 = vld [vmem:[%s5592_s22 + $0x38] sm:$0xff] }
  0xc2   : > { %4679 = vmatpush1.bf16.msra.mxu1 %v4678_v37  ;;  %4745 = vmatprep.subr.bf16.mxu0 %v4744_v38  ;;  %v4764_v37 = vpack.c.bf16 %v1358_v24, %v1355_v30  ;;  %v1353_v38 = vld [vmem:[%s7359_s23 + $0x4e0] sm:$0xff]  ;;  %v1380_v30 = vld [vmem:[%s7359_s23 + $0x5b8] sm:$0xff]  ;;  %v1713_v59 = vld [vmem:[%s7361_s0 + $0x10] sm:$0xff] }
  0xc3   : > { %4681 = vmatprep.subr.bf16.mxu1 %v4680_v43  ;;  %v1356_v43 = vld [vmem:[%s7359_s23 + $0x4f8] sm:$0xff]  ;;  %v1385_v24 = vld [vmem:[%s7359_s23 + $0x5e0] sm:$0xff] }
  0xc4   : > { %v1714_v60 = vld [vmem:[%s7361_s0 + $0x18] sm:$0xff] }
  0xc5   : > { %4747 = vmatpush3.bf16.msra.mxu0 %v4746_v50  ;;  %v4766_v50 = vpack.c.bf16 %v1310_v41, %v1307_v40  ;;  %v4720_v40 = vpack.c.bf16 %v1387_v33, %v1384_v32  ;;  %v1383_v41 = vld [vmem:[%s7359_s23 + $0x5d0] sm:$0xff]  ;;  %v1746_v48 = vld [vmem:[%s7361_s0 + $0x118] sm:$0xff] }
  0xc6   : > { %4683 = vmatpush1.bf16.msra.mxu1 %v4682_v51  ;;  %4749 = vmatprep.subr.bf16.mxu0 %v4748_v52  ;;  %v5134_v51 = vld [vmem:[%s5592_s22 + $0x18] sm:$0xff]  ;;  %v4702_v52 = vpack.c.bf16 %v1356_v43, %v1353_v38  ;;  %s7364_s22 = sld [smem:[#allocation20_spill]] }
  0xc7   : > { %4685 = vmatprep.subr.bf16.mxu1 %v4684_v56  ;;  %v1316_v56 = vld [vmem:[%s7359_s23 + $0x3b8] sm:$0xff] }
  0xc8   : > { %v1340_v38 = vld [vmem:[%s7359_s23 + $0x478] sm:$0xff] }
  0xc9   : > { %4751 = vmatpush3.bf16.msra.mxu0 %v4750_v62  ;;  %v1369_v62 = vld [vmem:[%s7359_s23 + $0x560] sm:$0xff]  ;;  %v1718_v20 = vld [vmem:[%s7361_s0 + $0x38] sm:$0xff] }
  0xca   : > { %4687 = vmatpush1.bf16.msra.mxu1 %v4686_v63  ;;  %4753 = vmatprep.subr.bf16.mxu0 %v4752_v0  ;;  %v4770_v63 = vpack.c.bf16 %v1316_v56, %v1313_v55  ;;  %v4706_v0 = vpack.c.bf16 %v1362_v58, %v1359_v54  ;;  %v4708_v4 = vpack.c.bf16 %v1369_v62, %v1366_v61  ;;  %v1729_v55 = vld [vmem:[%s7361_s0 + $0x90] sm:$0xff]  ;;  %v1730_v56 = vld [vmem:[%s7361_s0 + $0x98] sm:$0xff]  ;;  %v1743_v61 = vld [vmem:[%s7361_s0 + $0x100] sm:$0xff] }
  0xcb   : > { %4689 = vmatprep.subr.bf16.mxu1 %v4688_v25  ;;  %v1322_v25 = vld [vmem:[%s7359_s23 + $0x3e8] sm:$0xff]  ;;  %v4792_v58 = vpack.c.bf16 %v1730_v56, %v1729_v55  ;;  %v1738_v32 = vld [vmem:[%s7361_s0 + $0xd8] sm:$0xff]  ;;  %v1725_v55 = vld [vmem:[%s7361_s0 + $0x70] sm:$0xff] }
  0xcc   : > { %v1744_v62 = vld [vmem:[%s7361_s0 + $0x108] sm:$0xff]  ;;  %v1726_v56 = vld [vmem:[%s7361_s0 + $0x78] sm:$0xff] }
  0xcd   : > { %4755 = vmatpush3.bf16.msra.mxu0 %v4754_v7  ;;  %v1375_v7 = vld [vmem:[%s7359_s23 + $0x590] sm:$0xff] }
  0xce   : > { %4691 = vmatpush1.bf16.msra.mxu1 %v4690_v8  ;;  %4757 = vmatprep.subr.bf16.mxu0 %v4756_v9  ;;  %v4774_v8 = vpack.c.bf16 %v1322_v25, %v1319_v3  ;;  %v4710_v9 = vpack.c.bf16 %v1368_v5, %v1365_v2  ;;  %v4712_v16 = vpack.c.bf16 %v1375_v7, %v1372_v6  ;;  %v1745_v3 = vld [vmem:[%s7361_s0 + $0x110] sm:$0xff]  ;;  %v1716_v5 = vld [vmem:[%s7361_s0 + $0x28] sm:$0xff] }
  0xcf   : > { %4693 = vmatprep.subr.bf16.mxu1 %v4692_v14  ;;  %v1328_v14 = vld [vmem:[%s7359_s23 + $0x418] sm:$0xff]  ;;  %v4820_v2 = vpack.c.bf16 %v1744_v62, %v1743_v61  ;;  %v4824_v6 = vpack.c.bf16 %v1746_v48, %v1745_v3  ;;  %v1733_v7 = vld [vmem:[%s7361_s0 + $0xb0] sm:$0xff] }
  0xd0   : > { %1608 = vmatmul.mubr.f32.vlgmr.msra.gmra.mrb[4].mxu0 %v5131_v31  ;;  %v1388_v31 = vld [vmem:[%s7359_s23 + $0x5f8] sm:$0xff] }
  0xd1   : > { %4759 = vmatpush3.bf16.msra.mxu0 %v4758_v19  ;;  %1612 = vmatprep.mubr.f32.mxu0 %v5132_v35  ;;  %v1381_v19 = vld [vmem:[%s7359_s23 + $0x5c0] sm:$0xff]  ;;  %v4718_v35 = vpack.c.bf16 %v1380_v30, %v1377_v26  ;;  %v1758_v3 = vld [vmem:[%s7361_s0 + $0x178] sm:$0xff] }
  0xd2   : > { %4695 = vmatpush1.bf16.msra.mxu1 %v4694_v21  ;;  %4761 = vmatprep.subr.bf16.mxu0 %v4760_v22  ;;  %v4778_v21 = vpack.c.bf16 %v1328_v14, %v1325_v13  ;;  %v4714_v22 = vpack.c.bf16 %v1374_v10, %v1371_v12  ;;  %v4716_v29 = vpack.c.bf16 %v1381_v19, %v1378_v18  ;;  %v1748_v12 = vld [vmem:[%s7361_s0 + $0x128] sm:$0xff]  ;;  %v1749_v18 = vld [vmem:[%s7361_s0 + $0x130] sm:$0xff]  ;;  %v1750_v19 = vld [vmem:[%s7361_s0 + $0x138] sm:$0xff] }
  0xd3   : > { %4697 = vmatprep.subr.bf16.mxu1 %v4696_v15  ;;  %v1334_v15 = vld [vmem:[%s7359_s23 + $0x448] sm:$0xff]  ;;  %v1719_v26 = vld [vmem:[%s7361_s0 + $0x40] sm:$0xff] }
  0xd4   : > { %1613 = vmatmul.mubr.f32.gmra.mrb[6].mxu0 %v5133_v49  ;;  %v1751_v30 = vld [vmem:[%s7361_s0 + $0x140] sm:$0xff] }
  0xd5   : > { %4763 = vmatpush3.bf16.msra.mxu0 %v4762_v34  ;;  %1682 = vmatprep.mubr.f32.mxu0 %v5134_v51  ;;  %v4782_v34 = vpack.c.bf16 %v1334_v15, %v1331_v28  ;;  %v1728_v51 = vld [vmem:[%s7361_s0 + $0x88] sm:$0xff]  ;;  %v4832_v28 = vpack.c.bf16 %v1750_v19, %v1749_v18 }
  0xd6   : > { %4699 = vmatpush1.bf16.msra.mxu1 %v4698_v36  ;;  %4765 = vmatprep.subr.bf16.mxu0 %v4764_v37  ;;  %v4784_v36 = vpack.c.bf16 %v1388_v31, %v1385_v24  ;;  %v1337_v37 = vld [vmem:[%s7359_s23 + $0x460] sm:$0xff]  ;;  %v1752_v24 = vld [vmem:[%s7361_s0 + $0x148] sm:$0xff]  ;;  %v1737_v31 = vld [vmem:[%s7361_s0 + $0xd0] sm:$0xff] }
  0xd7   : > { %4701 = vmatprep.subr.bf16.mxu1 %v4700_v42  ;;  %v1386_v42 = vld [vmem:[%s7359_s23 + $0x5e8] sm:$0xff]  ;;  %v4786_v43 = vpack.c.bf16 %v1340_v38, %v1337_v37  ;;  %v1722_v37 = vld [vmem:[%s7361_s0 + $0x58] sm:$0xff]  ;;  %v1739_v38 = vld [vmem:[%s7361_s0 + $0xe0] sm:$0xff] }
  0xd8   : > { %v4722_v44 = vpack.c.bf16 %v1386_v42, %v1383_v41 }
  0xd9   : > { %4767 = vmatpush3.bf16.msra.mxu0 %v4766_v50  ;;  %v1727_v50 = vld [vmem:[%s7360_s26 + $0x80] sm:$0xff]  ;;  %s5261_s26 = smov [#allocation4]  }
  0xda   : > { %4703 = vmatpush1.bf16.msra.mxu1 %v4702_v52  ;;  %4769 = vmatprep.subr.bf16.mxu0 %v4768_v53  ;;  %v1711_v52 = vld [vmem:[%s7361_s0] sm:$0xff]  ;;  %v4788_v54 = vpack.c.bf16 %v1728_v51, %v1727_v50  ;;  %v1741_v51 = vld [vmem:[%s7361_s0 + $0xf0] sm:$0xff]  ;;  %s5141_s4 = sshll.u32 %s5261_s26, 4  ;;  %s5142_s4 = int_to_ptr.vmem [resolvable:$false] %s5141_s4 }
  0xdb   : > { %4705 = vmatprep.subr.bf16.mxu1 %v4704_v57  ;;  %s5143_s29 = scalar_lea.vmem %s5142_s4, 512 }
  0xdd   : > { %4771 = vmatpush3.bf16.msra.mxu0 %v4770_v63  ;;  %v1731_v63 = vld [vmem:[%s7361_s0 + $0xa0] sm:$0xff] }
  0xde   : > { %4707 = vmatpush1.bf16.msra.mxu1 %v4706_v0  ;;  %4773 = vmatprep.subr.bf16.mxu0 %v4772_v1  ;;  %v1732_v0 = vld [vmem:[%s7361_s0 + $0xa8] sm:$0xff]  ;;  %v4794_v1 = vpack.c.bf16 %v1714_v60, %v1713_v59  ;;  %v1755_v59 = vld [vmem:[%s7361_s0 + $0x160] sm:$0xff] }
  0xdf   : > { %4709 = vmatprep.subr.bf16.mxu1 %v4708_v4  ;;  %v4796_v25 = vpack.c.bf16 %v1732_v0, %v1731_v63  ;;  %v1715_v4 = vld [vmem:[%s7361_s0 + $0x20] sm:$0xff]  ;;  %v1756_v60 = vld [vmem:[%s7361_s0 + $0x168] sm:$0xff] }
  0xe0   : > { %v4798_v14 = vpack.c.bf16 %v1716_v5, %v1715_v4  ;;  %v4844_v63 = vpack.c.bf16 %v1756_v60, %v1755_v59  ;;  %v6804_v59 = vld [vmem:[%s7363_s7] sm:$0xff] }
  0xe1   : > { %4775 = vmatpush3.bf16.msra.mxu0 %v4774_v8  ;;  %v1734_v8 = vld [vmem:[%s7361_s0 + $0xb8] sm:$0xff] }
  0xe2   : > { %4711 = vmatpush1.bf16.msra.mxu1 %v4710_v9  ;;  %4777 = vmatprep.subr.bf16.mxu0 %v4776_v11  ;;  %v1747_v9 = vld [vmem:[%s7361_s0 + $0x120] sm:$0xff]  ;;  %v4800_v17 = vpack.c.bf16 %v1734_v8, %v1733_v7 }
  0xe3   : > { %4713 = vmatprep.subr.bf16.mxu1 %v4712_v16  ;;  %v1717_v16 = vld [vmem:[%s7361_s0 + $0x30] sm:$0xff]  ;;  %v4828_v10 = vpack.c.bf16 %v1748_v12, %v1747_v9 }
  0xe5   : > { %4779 = vmatpush3.bf16.msra.mxu0 %v4778_v21  ;;  %v1735_v21 = vld [vmem:[%s7361_s0 + $0xc0] sm:$0xff] }
  0xe6   : > { %4715 = vmatpush1.bf16.msra.mxu1 %v4714_v22  ;;  %4781 = vmatprep.subr.bf16.mxu0 %v4780_v23  ;;  %v1736_v22 = vld [vmem:[%s7361_s0 + $0xc8] sm:$0xff]  ;;  %v4802_v23 = vpack.c.bf16 %v1718_v20, %v1717_v16 }
  0xe7   : > { %4717 = vmatprep.subr.bf16.mxu1 %v4716_v29  ;;  %v4804_v15 = vpack.c.bf16 %v1736_v22, %v1735_v21  ;;  %v1720_v29 = vld [vmem:[%s7361_s0 + $0x48] sm:$0xff] }
  0xe8   : > { %v4806_v33 = vpack.c.bf16 %v1720_v29, %v1719_v26 }
  0xe9   : > { %4783 = vmatpush3.bf16.msra.mxu0 %v4782_v34  ;;  %v4836_v34 = vpack.c.bf16 %v1752_v24, %v1751_v30 }
  0xea   : > { %4719 = vmatpush1.bf16.msra.mxu1 %v4718_v35  ;;  %4785 = vmatprep.subr.bf16.mxu0 %v4784_v36  ;;  %v4808_v35 = vpack.c.bf16 %v1738_v32, %v1737_v31  ;;  %v1721_v36 = vld [vmem:[%s7361_s0 + $0x50] sm:$0xff] }
  0xeb   : > { %4721 = vmatprep.subr.bf16.mxu1 %v4720_v40  ;;  %v1740_v40 = vld [vmem:[%s7361_s0 + $0xe8] sm:$0xff]  ;;  %v4810_v41 = vpack.c.bf16 %v1722_v37, %v1721_v36 }
  0xec   : > { %v4812_v42 = vpack.c.bf16 %v1740_v40, %v1739_v38 }
  0xed   : > { %4787 = vmatpush3.bf16.msra.mxu0 %v4786_v43  ;;  %v1723_v43 = vld [vmem:[%s7361_s0 + $0x60] sm:$0xff] }
  0xee   : > { %4723 = vmatpush1.bf16.msra.mxu1 %v4722_v44  ;;  %4789 = vmatprep.subr.bf16.mxu0 %v4788_v54  ;;  %v1724_v44 = vld [vmem:[%s7361_s0 + $0x68] sm:$0xff] }
  0xef   : > { %4821 = vmatprep.subr.bf16.mxu1 %v4820_v2 }
  0xf0   : > { %1683 = vmatmul.mubr.f32.vlgmr.msra.gmra.mrb[8].mxu0 %v5135_v45 }
  0xf1   : > { %1531 = vmatmul.mubr.f32.vlgmr.msra.gmra.mrb[8].mxu1 %v5135_v45  ;;  %1687 = vmatprep.mubr.f32.mxu0 %v5136_v46  ;;  %v4814_v45 = vpack.c.bf16 %v1724_v44, %v1723_v43 }
  0xf2   : > { %1536 = vmatprep.mubr.f32.mxu1 %v5136_v46  ;;  %4823 = vmatpush3.bf16.msra.mxu1 %v4820_v2  ;;  %v1753_v46 = vld [vmem:[%s7361_s0 + $0x150] sm:$0xff] }
  0xf3   : > { %4825 = vmatprep.subr.bf16.mxu1 %v4824_v6  ;;  %v1757_v2 = vld [vmem:[%s7361_s0 + $0x170] sm:$0xff] }
  0xf4   : > { %1688 = vmatmul.mubr.f32.gmra.mrb[10].mxu0 %v5912_v39  ;;  %v4848_v4 = vpack.c.bf16 %v1758_v3, %v1757_v2 }
  0xf5   : > { %1537 = vmatmul.mubr.f32.gmra.mrb[10].mxu1 %v5912_v39  ;;  %v1712_v39 = vld [vmem:[%s7361_s0 + $0x8] sm:$0xff] }
  0xf6   : > { %v4790_v57 = vpack.c.bf16 %v1712_v39, %v1711_v52  ;;  %4827 = vmatpush3.bf16.msra.mxu1 %v4824_v6  ;;  %v1742_v52 = vld [vmem:[%s7361_s0 + $0xf8] sm:$0xff] }
  0xf7   : > { %4829 = vmatprep.subr.bf16.mxu1 %v4828_v10  ;;  %v4816_v39 = vpack.c.bf16 %v1742_v52, %v1741_v51 }
  0xf8   : > { %4791 = vmatpush3.bf16.msra.mxu0 %v4790_v57 }
  0xf9   : > { %4793 = vmatprep.subr.bf16.mxu0 %v4792_v58  ;;  %v4818_v58 = vpack.c.bf16 %v1726_v56, %v1725_v55 }
  0xfa   : > { %4831 = vmatpush3.bf16.msra.mxu1 %v4828_v10 }
  0xfb   : > { %4833 = vmatprep.subr.bf16.mxu1 %v4832_v28 }
  0xfc   : > { %4795 = vmatpush3.bf16.msra.mxu0 %v4794_v1 }
  0xfd   : > { %4797 = vmatprep.subr.bf16.mxu0 %v4796_v25 }
  0xfe   : > { %4835 = vmatpush3.bf16.msra.mxu1 %v4832_v28 }
  0xff   : > { %4837 = vmatprep.subr.bf16.mxu1 %v4836_v34 }
 0x100   : > { %4799 = vmatpush3.bf16.msra.mxu0 %v4798_v14 }
 0x101   : > { %4801 = vmatprep.subr.bf16.mxu0 %v4800_v17 }
 0x102   : > { %4839 = vmatpush3.bf16.msra.mxu1 %v4836_v34 }
 0x104   : > { %4803 = vmatpush3.bf16.msra.mxu0 %v4802_v23 }
 0x105   : > { %4805 = vmatprep.subr.bf16.mxu0 %v4804_v15 }
 0x108   : > { %4807 = vmatpush3.bf16.msra.mxu0 %v4806_v33 }
 0x109   : > { %4809 = vmatprep.subr.bf16.mxu0 %v4808_v35 }
 0x10c   : > { %4811 = vmatpush3.bf16.msra.mxu0 %v4810_v41 }
 0x10d   : > { %4813 = vmatprep.subr.bf16.mxu0 %v4812_v42 }
 0x110   : > { %4815 = vmatpush3.bf16.msra.mxu0 %v4814_v45 }
 0x111   : > { %4817 = vmatprep.subr.bf16.mxu0 %v4816_v39 }
 0x114   : > { %4819 = vmatpush3.bf16.msra.mxu0 %v4818_v58  ;;  %v6797_v58 = vld [vmem:[%s7362_s6] sm:$0xff] }
 0x124   : > { %v3808_v47 = vpop.f32.mrb[0].mxu1 }
 0x125   : > { %v3809_v49 = vpop.f32.mrb[1].mxu1 }
 0x126   : > { %v6653_v53 = vadd.f32 %v3809_v49, %v3808_v47  ;;  %v1754_v47 = vld [vmem:[%s7361_s0 + $0x158] sm:$0xff] }
 0x127   : > { %v4840_v50 = vpack.c.bf16 %v1754_v47, %v1753_v46 }
 0x128   : > { %v3811_v27 = vpop.f32.mrb[2].mxu1 }
 0x129   : > { %v3812_v11 = vpop.f32.mrb[3].mxu1  ;;  %4841 = vmatprep.subr.bf16.mxu1 %v4840_v50 }
 0x12a   : > { %v6706_v13 = vadd.f32 %v3812_v11, %v3811_v27  ;;  %4843 = vmatpush3.bf16.msra.mxu1 %v4840_v50 }
 0x12b   : > { %4845 = vmatprep.subr.bf16.mxu1 %v4844_v63 }
 0x12e   : > { %4847 = vmatpush3.bf16.msra.mxu1 %v4844_v63 }
 0x12f   : > { %4849 = vmatprep.subr.bf16.mxu1 %v4848_v4 }
 0x132   : > { %4851 = vmatpush3.bf16.msra.mxu1 %v4848_v4 }
 0x144   : > { %v3846_v49 = vpop.f32.mrb[4].mxu1 }
 0x145   : > { %v3847_v54 = vpop.f32.mrb[5].mxu1 }
 0x146   : > { %v3848_v57 = vadd.f32 %v3847_v54, %v3846_v49 }
 0x148   : > { %v1189_v61 = vadd.f32 %v3848_v57, %v6653_v53  ;;  %v3849_v62 = vpop.f32.mrb[6].mxu1 }
 0x149   : > { %v3850_v0 = vpop.f32.mrb[7].mxu1 }
 0x14a   : > { %v3851_v1 = vadd.f32 %v3850_v0, %v3849_v62  ;;  %v1695_v28 = vmul.f32 %v1189_v61, %v1189_v61 }
 0x14c   : > { %v1194_v25 = vadd.f32 %v3851_v1, %v6706_v13 }
 0x14e   : > { %v1698_v42 = vmul.f32 %v1194_v25, %v1194_v25 }
 0x183   : > { %v1036_v53 = vpop.f32.mrb[0].mxu0 }
 0x184   : > { %v1038_v5 = vpop.f32.mrb[1].mxu0  ;;  %v1693_v17 = vmul.f32 %v1036_v53, %v1036_v53 }
 0x185   : > { %v1694_v19 = vmul.f32 %v1038_v5, %v1038_v5 }
 0x187   : > { %v1042_v48 = vpop.f32.mrb[2].mxu0 }
 0x188   : > { %v1044_v27 = vpop.f32.mrb[3].mxu0  ;;  %v1696_v24 = vmul.f32 %v1042_v48, %v1042_v48 }
 0x189   : > { %v1697_v35 = vmul.f32 %v1044_v27, %v1044_v27 }
 0x1a3   : > { %v3884_v6 = vpop.f32.mrb[4].mxu0 }
 0x1a4   : > { %v3885_v7 = vpop.f32.mrb[5].mxu0 }
 0x1a5   : > { %v3886_v8 = vadd.f32 %v3885_v7, %v3884_v6 }
 0x1a7   : > { %v3887_v9 = vpop.f32.mrb[6].mxu0 }
 0x1a8   : > { %v3888_v11 = vpop.f32.mrb[7].mxu0 }
 0x1a9   : > { %v3889_v12 = vadd.f32 %v3888_v11, %v3887_v9  ;;  %v3669_v9 = vld [vmem:[%s7364_s22] ss:$0 sm:$0xff]  ;;  %s675_s22 = scalar_lea.vmem [#allocation4], %s7136_s27 }
 0x1aa   : > { %s3507_s21 = sshll.u32 %s675_s22, 4  ;;  %s7146_s21 = int_to_ptr.vmem [resolvable:$true] %s3507_s21 }
 0x1ab   : > { %s5137_s18 = scalar_lea.vmem %s7146_s21, 256  ;;  %p5144_p0 = scmp.lt.s32.totalorder %s7146_s21, %s5142_s4 }
 0x1ac   : > { %p5138_p11 = scmp.ne.s32.totalorder %s7146_s21, %s5137_s18  ;;  %p5145_p1 = scmp.lt.s32.totalorder %s5143_s29, %s5137_s18 }
 0x1ae   : > { %p5139_p12 = pnand %p5138_p11, %p5416_p5  ;;  %p5146_p2 = por %p5145_p1, %p5144_p0 }
 0x1b0   : > { %p5140_p13 = pneg %p5139_p12 }
 0x1b2   : > { %p5147_p3 = pnand %p5146_p2, %p5140_p13 }
 0x1c3   : > { %v3922_v14 = vpop.f32.mrb[8].mxu0 }
 0x1c4   : > { %v1532_v16 = vpop.f32.mrb[8].mxu1  ;;  %v3923_v10 = vpop.f32.mrb[9].mxu0 }
 0x1c5   : > { %v1699_v20 = vmul.f32 %v1532_v16, %v1532_v16  ;;  %v1534_v18 = vpop.f32.mrb[9].mxu1  ;;  %v3924_v13 = vadd.f32 %v3923_v10, %v3922_v14  ;;  %v3670_v10 = vld [vmem:[%s7365_s28] ss:$0 sm:$0xff] }
 0x1c6   : > { %v1700_v21 = vmul.f32 %v1534_v18, %v1534_v18  ;;  %v3676_v18 = vld [vmem:[%s7302_s8 + $0x88] sm:$0xff] }
 0x1c7   : > { %v1705_v22 = vadd.f32 %v1699_v20, %v1693_v17  ;;  %v1685_v23 = vadd.f32 %v3924_v13, %v3886_v8  ;;  %v3925_v26 = vpop.f32.mrb[10].mxu0  ;;  %v3675_v20 = vld [vmem:[%s7302_s8 + $0x80] sm:$0xff] }
 0x1c8   : > { %v1706_v15 = vadd.f32 %v1700_v21, %v1694_v19  ;;  %v1538_v29 = vpop.f32.mrb[10].mxu1  ;;  %v3926_v30 = vpop.f32.mrb[11].mxu0 }
 0x1c9   : > { %v1701_v31 = vmul.f32 %v1685_v23, %v1685_v23  ;;  %v1702_v32 = vmul.f32 %v1538_v29, %v1538_v29  ;;  %v1540_v33 = vpop.f32.mrb[11].mxu1  ;;  %v3927_v34 = vadd.f32 %v3926_v30, %v3925_v26  ;;  %v3677_v23 = vld [vmem:[%s7302_s8 + $0x90] sm:$0xff]  ;;  %v3678_v26 = vld [vmem:[%s7302_s8 + $0x98] sm:$0xff]  ;;  %v3679_v30 = vld [vmem:[%s7302_s8 + $0xa0] sm:$0xff] }
 0x1ca   : > { %v1703_v36 = vmul.f32 %v1540_v33, %v1540_v33  ;;  %1823 = vmatprep.mubr.f32.mxu0 %v1706_v15  ;;  %v6834_v15 = vld [vmem:[%s7363_s7 + $0x8] sm:$0xff]  ;;  %v4864_v29 = vpack.c.bf16 %v3678_v26, %v3677_v23  ;;  %v3682_v33 = vld [vmem:[%s7302_s8 + $0xb8] sm:$0xff]  ;;  %v3699_v26 = vld [vmem:[%s7302_s8 + $0x140] sm:$0xff] }
 0x1cb   : > { %v1708_v37 = vadd.f32 %v1702_v32, %v1696_v24  ;;  %v1690_v38 = vadd.f32 %v3927_v34, %v3889_v12  ;;  %1824 = vmatmul.mubr.f32.vlgmr.msra.gmra.mrb[12].mxu0 %v1705_v22  ;;  %v1707_v40 = vadd.f32 %v1701_v31, %v1695_v28  ;;  %v4860_v22 = vpack.c.bf16 %v3676_v18, %v3675_v20  ;;  %v6829_v28 = vld [vmem:[%s7362_s6 + $0x8] sm:$0xff]  ;;  %v3681_v32 = vld [vmem:[%s7302_s8 + $0xb0] sm:$0xff]  ;;  %v3695_v18 = vld [vmem:[%s7302_s8 + $0x120] sm:$0xff] }
 0x1cc   : > { %v1709_v41 = vadd.f32 %v1703_v36, %v1697_v35  ;;  %v3680_v24 = vld [vmem:[%s7302_s8 + $0xa8] sm:$0xff]  ;;  %v4872_v34 = vpack.c.bf16 %v3682_v33, %v3681_v32  ;;  %v3683_v35 = vld [vmem:[%s7302_s8 + $0xc0] sm:$0xff] }
 0x1cd   : > { %v1704_v43 = vmul.f32 %v1690_v38, %v1690_v38  ;;  %4150 = vmatprep.mubr.f32.mxu1 %v1707_v40  ;;  %v4868_v31 = vpack.c.bf16 %v3680_v24, %v3679_v30  ;;  %v3684_v36 = vld [vmem:[%s7302_s8 + $0xc8] sm:$0xff]  ;;  %v3685_v38 = vld [vmem:[%s7302_s8 + $0xd0] sm:$0xff]  ;;  %v3686_v40 = vld [vmem:[%s7302_s8 + $0xd8] sm:$0xff] }
 0x1ce   : > { %1828 = vmatprep.mubr.f32.mxu0 %v1709_v41  ;;  %v4880_v41 = vpack.c.bf16 %v3686_v40, %v3685_v38  ;;  %v3701_v24 = vld [vmem:[%s7302_s8 + $0x150] sm:$0xff]  ;;  %v3703_v33 = vld [vmem:[%s7302_s8 + $0x160] sm:$0xff] }
 0x1cf   : > { %v1710_v44 = vadd.f32 %v1704_v43, %v1698_v42  ;;  %1829 = vmatmul.mubr.f32.gmra.mrb[14].mxu0 %v1708_v37  ;;  %v4876_v37 = vpack.c.bf16 %v3684_v36, %v3683_v35  ;;  %v3687_v42 = vld [vmem:[%s7302_s8 + $0xe0] sm:$0xff]  ;;  %v3688_v43 = vld [vmem:[%s7302_s8 + $0xe8] sm:$0xff]  ;;  %v3705_v36 = vld [vmem:[%s7302_s8 + $0x170] sm:$0xff] }
 0x1d0   : > { %4164 = vmatprep.mubr.msk.f32.mxu0 %vm1958_vm0, %v6804_v59  ;;  %v3707_v40 = vld [vmem:[%s7303_s9] ss:$0 sm:$0xff] }
 0x1d1   : > { %4151 = vmatmul.mubr.f32.vlgmr.msra.gmra.mrb[12].mxu1 %v1710_v44  ;;  %v4884_v44 = vpack.c.bf16 %v3688_v43, %v3687_v42 }
 0x1d2   : > { %4157 = vmatprep.mubr.msk.f32.mxu1 %vm1958_vm0, %v6797_v58 }
 0x29e   : > { %v3960_v45 = vpop.f32.mrb[12].mxu0 }
 0x29f   : > { %v3961_v46 = vpop.f32.mrb[13].mxu0 }
 0x2a0   : > { %v3962_v47 = vadd.f32 %v3961_v46, %v3960_v45  ;;  %v3689_v45 = vld [vmem:[%s7302_s8 + $0xf0] sm:$0xff]  ;;  %v3690_v46 = vld [vmem:[%s7302_s8 + $0xf8] sm:$0xff] }
 0x2a2   : > { %v3963_v49 = vpop.f32.mrb[14].mxu0 }
 0x2a3   : > { %v3964_v50 = vpop.f32.mrb[15].mxu0 }
 0x2a4   : > { %v3965_v51 = vadd.f32 %v3964_v50, %v3963_v49  ;;  %v4152_v52 = vpop.f32.mrb[12].mxu1  ;;  %v2121_v49 = vld [vmem:[%s7302_s8] sm:$0xff]  ;;  %v2122_v50 = vld [vmem:[%s7302_s8 + $0x8] sm:$0xff] }
 0x2a5   : > { %v1900_v54 = vpop.f32.mrb[13].mxu1 }
 0x2a6   : > { %v1906_v39 = vadd.f32 %v4152_v52, %v3965_v51  ;;  %v1901_v55 = vadd.f32 %v3962_v47, %v1900_v54  ;;  %v4888_v47 = vpack.c.bf16 %v3690_v46, %v3689_v45  ;;  %v4892_v51 = vpack.c.bf16 %v2122_v50, %v2121_v49  ;;  %v2123_v52 = vld [vmem:[%s7302_s8 + $0x10] sm:$0xff]  ;;  %v2124_v54 = vld [vmem:[%s7302_s8 + $0x18] sm:$0xff] }
 0x2a8   : > { %1909 = vadd.xlane.f32.xlu0 %v1901_v55  ;;  %v1916_v56 = vmul.f32 %v1901_v55, %v1901_v55  ;;  %v1917_v57 = vmul.f32 %v1906_v39, %v1906_v39 }
 0x2aa   : > { %1918 = vadd.xlane.f32.xlu1 %v1916_v56  ;;  %v2126_v56 = vld [vmem:[%s7302_s8 + $0x28] sm:$0xff] }
 0x2ac   : > { %1911 = vadd.xlane.f32.xlu0 %v1906_v39 }
 0x2ae   : > { %1920 = vadd.xlane.f32.xlu1 %v1917_v57 }
 0x335   : > { %v1910_v60 = vpop.xlane.xlu0 %1909 }
 0x336   : > { %v1914_v61 = vmul.f32 0.0078125, %v1910_v60  ;;  %v2127_v60 = vld [vmem:[%s7302_s8 + $0x30] sm:$0xff] }
 0x337   : > { %v1919_v62 = vpop.xlane.xlu1 %1918 }
 0x338   : > { %v1924_v63 = vmul.f32 %v1914_v61, %v1914_v61  ;;  %v1922_v0 = vmul.f32 0.0078125, %v1919_v62  ;;  %v1928_v6 = vsub.f32 %v1901_v55, %v1914_v61  ;;  %v2125_v55 = vld [vmem:[%s7302_s8 + $0x20] sm:$0xff]  ;;  %v2128_v61 = vld [vmem:[%s7302_s8 + $0x38] sm:$0xff] }
 0x339   : > { %v1912_v1 = vpop.xlane.xlu0 %1911  ;;  %v4900_v57 = vpack.c.bf16 %v2126_v56, %v2125_v55  ;;  %v4904_v62 = vpack.c.bf16 %v2128_v61, %v2127_v60  ;;  %v3715_v55 = vld [vmem:[%s7304_s10 + $0x58] sm:$0xff]  ;;  %v3717_v60 = vld [vmem:[%s7304_s10 + $0x68] sm:$0xff] }
 0x33a   : > { %v1926_v2 = vsub.f32 %v1922_v0, %v1924_v63  ;;  %v1915_v3 = vmul.f32 0.0078125, %v1912_v1  ;;  %v2129_v63 = vld [vmem:[%s7302_s8 + $0x40] sm:$0xff]  ;;  %v2130_v0 = vld [vmem:[%s7302_s8 + $0x48] sm:$0xff] }
 0x33b   : > { %v1921_v25 = vpop.xlane.xlu1 %1920  ;;  %v4908_v1 = vpack.c.bf16 %v2130_v0, %v2129_v63  ;;  %v3719_v63 = vld [vmem:[%s7304_s10 + $0x78] sm:$0xff] }
 0x33c   : > { %v1930_v4 = vadd.f32 1e-05, %v1926_v2  ;;  %v1925_v53 = vmul.f32 %v1915_v3, %v1915_v3  ;;  %v1923_v5 = vmul.f32 0.0078125, %v1921_v25  ;;  %v1929_v11 = vsub.f32 %v1906_v39, %v1915_v3  ;;  %v2131_v2 = vld [vmem:[%s7302_s8 + $0x50] sm:$0xff]  ;;  %v2132_v3 = vld [vmem:[%s7302_s8 + $0x58] sm:$0xff] }
 0x33d   : > { %v4896_v39 = vpack.c.bf16 %v2124_v54, %v2123_v52  ;;  %v4912_v25 = vpack.c.bf16 %v2132_v3, %v2131_v2  ;;  %v3713_v52 = vld [vmem:[%s7304_s10 + $0x48] sm:$0xff] }
 0x33e   : > { %5123 = vrsqrt.f32 %v1930_v4  ;;  %v1927_v48 = vsub.f32 %v1923_v5, %v1925_v53  ;;  %v2133_v4 = vld [vmem:[%s7302_s8 + $0x60] sm:$0xff]  ;;  %v2134_v53 = vld [vmem:[%s7302_s8 + $0x68] sm:$0xff] }
 0x33f   : > { %v4916_v5 = vpack.c.bf16 %v2134_v53, %v2133_v4  ;;  %v2564_v2 = vld [vmem:[%s7304_s10 + $0x8] sm:$0xff]  ;;  %v2566_v4 = vld [vmem:[%s7304_s10 + $0x18] sm:$0xff] }
 0x340   : > { %v1931_v27 = vadd.f32 1e-05, %v1927_v48  ;;  %v2135_v48 = vld [vmem:[%s7302_s8 + $0x70] sm:$0xff] }
 0x342   : > { %5125 = vrsqrt.f32 %v1931_v27  ;;  %v2136_v27 = vld [vmem:[%s7302_s8 + $0x78] sm:$0xff] }
 0x348   : > { %v5124_v7 = vpop.eup %5123 }
 0x349   : > { %v1934_v8 = vmul.f32 %v5124_v7, %v1928_v6  ;;  %v4920_v6 = vpack.c.bf16 %v2136_v27, %v2135_v48  ;;  %v3691_v7 = vld [vmem:[%s7302_s8 + $0x100] sm:$0xff]  ;;  %v2568_v48 = vld [vmem:[%s7304_s10 + $0x28] sm:$0xff] }
 0x34b   : > { %v1943_v16 = vmul.f32 %v3669_v9, %v1934_v8  ;;  %v3692_v8 = vld [vmem:[%s7302_s8 + $0x108] sm:$0xff] }
 0x34c   : > { %v5126_v12 = vpop.eup %5125 }
 0x34d   : > { %v1935_v14 = vmul.f32 %v5126_v12, %v1929_v11  ;;  %v1952_v13 = vadd.f32 %v3670_v10, %v1943_v16  ;;  %v3693_v11 = vld [vmem:[%s7302_s8 + $0x110] sm:$0xff]  ;;  %v3694_v12 = vld [vmem:[%s7302_s8 + $0x118] sm:$0xff] }
 0x34f   : > { %v1944_v17 = vmul.f32 %v3669_v9, %v1935_v14  ;;  %v4924_v9 = vpack.c.bf16 %v3692_v8, %v3691_v7  ;;  %v2570_v7 = vld [vmem:[%s7304_s10 + $0x38] sm:$0xff] }
 0x351   : > { %v1953_v19 = vadd.f32 %v3670_v10, %v1944_v17  ;;  %v4928_v17 = vpack.c.bf16 %v3694_v12, %v3693_v11  ;;  %v3725_v11 = vld [vmem:[%s7304_s10 + $0x88] sm:$0xff] }
 0x353   : > { %v4852_v21 = vpack.c.bf16 %v1953_v19, %v1952_v13 }
 0x355   : > { %4853 = vmatprep.subr.bf16.mxu1 %v4852_v21  ;;  %4857 = vmatprep.subr.bf16.mxu0 %v4852_v21 }
 0x356   : > { %4855 = vmatpush3.bf16.msra.mxu1 %v4852_v21  ;;  %4859 = vmatpush3.bf16.msra.mxu0 %v4852_v21  ;;  %v3697_v21 = vld [vmem:[%s7302_s8 + $0x130] sm:$0xff] }
 0x357   : > { %4861 = vmatprep.subr.bf16.mxu1 %v4860_v22 }
 0x359   : > { %4158 = vmatmul.mubr.msk.f32.vlgmr.msra.gmra.mrb[14].mxu1 %vm1958_vm0, %v6829_v28  ;;  %4165 = vmatmul.mubr.msk.f32.vlgmr.msra.gmra.mrb[16].mxu0 %vm1958_vm0, %v6834_v15 }
 0x35a   : > { %4863 = vmatpush3.bf16.msra.mxu1 %v4860_v22  ;;  %4199 = vmatprep.mubr.f32.mxu1 %v1952_v13  ;;  %v3696_v13 = vld [vmem:[%s7302_s8 + $0x128] sm:$0xff]  ;;  %v3698_v22 = vld [vmem:[%s7302_s8 + $0x138] sm:$0xff] }
 0x35b   : > { %4865 = vmatprep.subr.bf16.mxu1 %v4864_v29  ;;  %4276 = vmatprep.mubr.msk.f32.mxu0 %vm1958_vm0, %v6797_v58  ;;  %v4936_v23 = vpack.c.bf16 %v3698_v22, %v3697_v21 }
 0x35e   : > { %4867 = vmatpush3.bf16.msra.mxu1 %v4864_v29  ;;  %v3700_v29 = vld [vmem:[%s7302_s8 + $0x148] sm:$0xff] }
 0x35f   : > { %4869 = vmatprep.subr.bf16.mxu1 %v4868_v31  ;;  %v4940_v30 = vpack.c.bf16 %v3700_v29, %v3699_v26  ;;  %v3731_v26 = vld [vmem:[%s7304_s10 + $0xb8] sm:$0xff] }
 0x362   : > { %4871 = vmatpush3.bf16.msra.mxu1 %v4868_v31  ;;  %v3702_v31 = vld [vmem:[%s7302_s8 + $0x158] sm:$0xff] }
 0x363   : > { %4873 = vmatprep.subr.bf16.mxu1 %v4872_v34  ;;  %v4944_v32 = vpack.c.bf16 %v3702_v31, %v3701_v24 }
 0x366   : > { %4875 = vmatpush3.bf16.msra.mxu1 %v4872_v34  ;;  %v3704_v34 = vld [vmem:[%s7302_s8 + $0x168] sm:$0xff] }
 0x367   : > { %4877 = vmatprep.subr.bf16.mxu1 %v4876_v37  ;;  %v4948_v35 = vpack.c.bf16 %v3704_v34, %v3703_v33 }
 0x36a   : > { %4879 = vmatpush3.bf16.msra.mxu1 %v4876_v37  ;;  %v3706_v37 = vld [vmem:[%s7302_s8 + $0x178] sm:$0xff] }
 0x36b   : > { %4881 = vmatprep.subr.bf16.mxu1 %v4880_v41  ;;  %v4952_v38 = vpack.c.bf16 %v3706_v37, %v3705_v36 }
 0x36e   : > { %4883 = vmatpush3.bf16.msra.mxu1 %v4880_v41 }
 0x36f   : > { %4885 = vmatprep.subr.bf16.mxu1 %v4884_v44 }
 0x372   : > { %4887 = vmatpush3.bf16.msra.mxu1 %v4884_v44 }
 0x373   : > { %4889 = vmatprep.subr.bf16.mxu1 %v4888_v47 }
 0x376   : > { %4891 = vmatpush3.bf16.msra.mxu1 %v4888_v47 }
 0x377   : > { %4893 = vmatprep.subr.bf16.mxu1 %v4892_v51 }
 0x379   : > { %4200 = vmatmul.mubr.f32.vlgmr.msra.gmra.mrb[16].mxu1 %v1953_v19  ;;  %v4932_v19 = vpack.c.bf16 %v3696_v13, %v3695_v18  ;;  %v3728_v18 = vld [vmem:[%s7304_s10 + $0xa0] sm:$0xff]  ;;  %v3729_v13 = vld [vmem:[%s7304_s10 + $0xa8] sm:$0xff] }
 0x37a   : > { %4895 = vmatpush3.bf16.msra.mxu1 %v4892_v51  ;;  %v3712_v51 = vld [vmem:[%s7304_s10 + $0x40] sm:$0xff]  ;;  %v5004_v21 = vpack.c.bf16 %v3729_v13, %v3728_v18 }
 0x37b   : > { %4897 = vmatprep.subr.bf16.mxu1 %v4896_v39  ;;  %v4964_v54 = vpack.c.bf16 %v3713_v52, %v3712_v51  ;;  %v3749_v52 = vld [vmem:[%s7306_s12 + $0x50] sm:$0xff] }
 0x37e   : > { %4899 = vmatpush3.bf16.msra.mxu1 %v4896_v39  ;;  %v3714_v39 = vld [vmem:[%s7304_s10 + $0x50] sm:$0xff] }
 0x37f   : > { %4901 = vmatprep.subr.bf16.mxu1 %v4900_v57  ;;  %v4968_v56 = vpack.c.bf16 %v3715_v55, %v3714_v39 }
 0x382   : > { %4903 = vmatpush3.bf16.msra.mxu1 %v4900_v57  ;;  %v3716_v57 = vld [vmem:[%s7304_s10 + $0x60] sm:$0xff] }
 0x383   : > { %4905 = vmatprep.subr.bf16.mxu1 %v4904_v62  ;;  %v4972_v61 = vpack.c.bf16 %v3717_v60, %v3716_v57 }
 0x386   : > { %4907 = vmatpush3.bf16.msra.mxu1 %v4904_v62  ;;  %v3718_v62 = vld [vmem:[%s7304_s10 + $0x70] sm:$0xff] }
 0x387   : > { %4909 = vmatprep.subr.bf16.mxu1 %v4908_v1  ;;  %v4976_v0 = vpack.c.bf16 %v3719_v63, %v3718_v62  ;;  %v3276_v62 = vld [vmem:[%s7308_s14 + $0x8] sm:$0xff] }
 0x38a   : > { %4911 = vmatpush3.bf16.msra.mxu1 %v4908_v1  ;;  %v2563_v1 = vld [vmem:[%s7304_s10] sm:$0xff] }
 0x38b   : > { %4913 = vmatprep.subr.bf16.mxu1 %v4912_v25  ;;  %v4980_v3 = vpack.c.bf16 %v2564_v2, %v2563_v1  ;;  %v3366_v1 = vld [vmem:[%s7310_s16 + $0x8] sm:$0xff] }
 0x38e   : > { %4915 = vmatpush3.bf16.msra.mxu1 %v4912_v25  ;;  %v2565_v25 = vld [vmem:[%s7304_s10 + $0x10] sm:$0xff] }
 0x38f   : > { %4917 = vmatprep.subr.bf16.mxu1 %v4916_v5  ;;  %v4984_v53 = vpack.c.bf16 %v2566_v4, %v2565_v25 }
 0x392   : > { %4919 = vmatpush3.bf16.msra.mxu1 %v4916_v5  ;;  %v2567_v5 = vld [vmem:[%s7304_s10 + $0x20] sm:$0xff] }
 0x393   : > { %4921 = vmatprep.subr.bf16.mxu1 %v4920_v6  ;;  %v4988_v27 = vpack.c.bf16 %v2568_v48, %v2567_v5 }
 0x396   : > { %4923 = vmatpush3.bf16.msra.mxu1 %v4920_v6  ;;  %v2569_v6 = vld [vmem:[%s7304_s10 + $0x30] sm:$0xff] }
 0x397   : > { %4925 = vmatprep.subr.bf16.mxu1 %v4924_v9  ;;  %v4992_v8 = vpack.c.bf16 %v2570_v7, %v2569_v6 }
 0x42c   : > { %v4159_v14 = vpop.f32.mrb[14].mxu1  ;;  %v4166_v16 = vpop.f32.mrb[16].mxu0 }
 0x42d   : > { %v2031_v10 = vpop.f32.mrb[15].mxu1  ;;  %v2112_v20 = vpop.f32.mrb[17].mxu0 }
 0x42e   : > { %4234 = vmatprep.mubr.f32.mxu1 %v2031_v10 }
 0x42f   : > { %4235 = vmatmul.mubr.f32.vlgmr.msra.gmra.mrb[16].mxu1 %v4159_v14  ;;  %v3726_v14 = vld [vmem:[%s7304_s10 + $0x90] sm:$0xff] }
 0x430   : > { %4927 = vmatpush3.bf16.msra.mxu1 %v4924_v9  ;;  %4269 = vmatprep.mubr.f32.mxu1 %v2112_v20  ;;  %v3724_v9 = vld [vmem:[%s7304_s10 + $0x80] sm:$0xff] }
 0x431   : > { %4929 = vmatprep.subr.bf16.mxu1 %v4928_v17  ;;  %v4996_v12 = vpack.c.bf16 %v3725_v11, %v3724_v9 }
 0x434   : > { %4931 = vmatpush3.bf16.msra.mxu1 %v4928_v17 }
 0x435   : > { %4933 = vmatprep.subr.bf16.mxu1 %v4932_v19 }
 0x438   : > { %4935 = vmatpush3.bf16.msra.mxu1 %v4932_v19 }
 0x439   : > { %4937 = vmatprep.subr.bf16.mxu1 %v4936_v23 }
 0x43c   : > { %4939 = vmatpush3.bf16.msra.mxu1 %v4936_v23  ;;  %v3730_v23 = vld [vmem:[%s7304_s10 + $0xb0] sm:$0xff] }
 0x43d   : > { %4941 = vmatprep.subr.bf16.mxu1 %v4940_v30  ;;  %v5008_v29 = vpack.c.bf16 %v3731_v26, %v3730_v23 }
 0x440   : > { %4943 = vmatpush3.bf16.msra.mxu1 %v4940_v30  ;;  %v3734_v30 = vld [vmem:[%s7305_s11] ss:$0 sm:$0xff] }
 0x441   : > { %4945 = vmatprep.subr.bf16.mxu1 %v4944_v32 }
 0x444   : > { %4947 = vmatpush3.bf16.msra.mxu1 %v4944_v32 }
 0x445   : > { %4949 = vmatprep.subr.bf16.mxu1 %v4948_v35 }
 0x448   : > { %4951 = vmatpush3.bf16.msra.mxu1 %v4948_v35 }
 0x449   : > { %4953 = vmatprep.subr.bf16.mxu1 %v4952_v38 }
 0x44c   : > { %4955 = vmatpush3.bf16.msra.mxu1 %v4952_v38 }
 0x44f   : > { %4270 = vmatmul.mubr.f32.vlgmr.msra.gmra.mrb[16].mxu1 %v4166_v16  ;;  %v3727_v16 = vld [vmem:[%s7304_s10 + $0x98] sm:$0xff] }
 0x450   : > { %v5000_v20 = vpack.c.bf16 %v3727_v16, %v3726_v14  ;;  %v3757_v16 = vld [vmem:[%s7311_s17] ss:$0 sm:$0xff] }
 0x522   : > { %v4271_v41 = vpop.f32.mrb[16].mxu1 }
 0x523   : > { %v2406_v42 = vadd.f32 %v4271_v41, %v3707_v40  ;;  %v2387_v43 = vpop.f32.mrb[17].mxu1 }
 0x524   : > { %v2405_v44 = vadd.f32 %v3707_v40, %v2387_v43  ;;  %v3739_v40 = vld [vmem:[%s7306_s12 + $0x20] sm:$0xff]  ;;  %v3742_v43 = vld [vmem:[%s7306_s12 + $0x38] sm:$0xff] }
 0x525   : > { %vm2408_vm1 = vcmp.ge.f32.partialorder %v2406_v42, 0.0  ;;  %v2410_v45 = vmul.f32 0.2, %v2406_v42 }
 0x526   : > { %vm2407_vm2 = vcmp.ge.f32.partialorder %v2405_v44, 0.0  ;;  %v2409_v46 = vmul.f32 0.2, %v2405_v44 }
 0x527   : > { %v2412_v47 = vsel %vm2408_vm1, %v2406_v42, %v2410_v45  ;;  %v3741_v42 = vld [vmem:[%s7306_s12 + $0x30] sm:$0xff]  ;;  %v3000_v45 = vld [vmem:[%s7306_s12] sm:$0xff] }
 0x528   : > { %v2411_v49 = vsel %vm2407_vm2, %v2405_v44, %v2409_v46  ;;  %v5024_v44 = vpack.c.bf16 %v3742_v43, %v3741_v42  ;;  %v3001_v46 = vld [vmem:[%s7306_s12 + $0x8] sm:$0xff] }
 0x529   : > { %v4956_v50 = vpack.c.bf16 %v2412_v47, %v2411_v49 }
 0x52b   : > { %4957 = vmatprep.subr.bf16.mxu0 %v4956_v50 }
 0x52c   : > { %4959 = vmatpush3.bf16.msra.mxu0 %v4956_v50 }
 0x52d   : > { %4961 = vmatprep.subr.bf16.mxu0 %v4956_v50 }
 0x52f   : > { %4277 = vmatmul.mubr.msk.f32.vlgmr.msra.gmra.mrb[18].mxu0 %vm1958_vm0, %v6829_v28 }
 0x530   : > { %4963 = vmatpush3.bf16.msra.mxu0 %v4956_v50  ;;  %4283 = vmatprep.mubr.msk.f32.mxu0 %vm1958_vm0, %v6804_v59  ;;  %v3748_v50 = vld [vmem:[%s7306_s12 + $0x48] sm:$0xff] }
 0x531   : > { %4965 = vmatprep.subr.bf16.mxu0 %v4964_v54 }
 0x533   : > { %4284 = vmatmul.mubr.msk.f32.vlgmr.msra.gmra.mrb[20].mxu0 %vm1958_vm0, %v6834_v15 }
 0x534   : > { %4967 = vmatpush3.bf16.msra.mxu0 %v4964_v54  ;;  %4302 = vmatprep.mubr.msk.f32.mxu0 %vm2580_vm3, %v2411_v49  ;;  %v3750_v54 = vld [vmem:[%s7306_s12 + $0x58] sm:$0xff] }
 0x535   : > { %4969 = vmatprep.subr.bf16.mxu0 %v4968_v56 }
 0x538   : > { %4971 = vmatpush3.bf16.msra.mxu0 %v4968_v56  ;;  %v5040_v56 = vpack.c.bf16 %v3750_v54, %v3749_v52 }
 0x539   : > { %4973 = vmatprep.subr.bf16.mxu0 %v4972_v61 }
 0x53c   : > { %4975 = vmatpush3.bf16.msra.mxu0 %v4972_v61  ;;  %v3275_v61 = vld [vmem:[%s7308_s14] sm:$0xff] }
 0x53d   : > { %4977 = vmatprep.subr.bf16.mxu0 %v4976_v0  ;;  %v5044_v63 = vpack.c.bf16 %v3276_v62, %v3275_v61 }
 0x540   : > { %4979 = vmatpush3.bf16.msra.mxu0 %v4976_v0  ;;  %v3365_v0 = vld [vmem:[%s7310_s16] sm:$0xff] }
 0x541   : > { %4981 = vmatprep.subr.bf16.mxu0 %v4980_v3  ;;  %v5048_v2 = vpack.c.bf16 %v3366_v1, %v3365_v0 }
 0x543   : > { %4303 = vmatmul.mubr.msk.f32.vlgmr.msra.gmra.mrb[22].mxu0 %vm2580_vm3, %v2412_v47  ;;  %v3003_v47 = vld [vmem:[%s7306_s12 + $0x18] sm:$0xff] }
 0x544   : > { %4983 = vmatpush3.bf16.msra.mxu0 %v4980_v3  ;;  %v3753_v3 = vld [vmem:[%s7307_s13] ss:$0 sm:$0xff] }
 0x545   : > { %4985 = vmatprep.subr.bf16.mxu0 %v4984_v53 }
 0x548   : > { %4987 = vmatpush3.bf16.msra.mxu0 %v4984_v53 }
 0x549   : > { %4989 = vmatprep.subr.bf16.mxu0 %v4988_v27 }
 0x54c   : > { %4991 = vmatpush3.bf16.msra.mxu0 %v4988_v27 }
 0x54d   : > { %4993 = vmatprep.subr.bf16.mxu0 %v4992_v8 }
 0x550   : > { %4995 = vmatpush3.bf16.msra.mxu0 %v4992_v8  ;;  %v3754_v8 = vld [vmem:[%s7309_s15] ss:$0 sm:$0xff] }
 0x551   : > { %4997 = vmatprep.subr.bf16.mxu0 %v4996_v12 }
 0x602   : > { %v4278_v10 = vpop.f32.mrb[18].mxu0 }
 0x603   : > { %v2479_v17 = vpop.f32.mrb[19].mxu0 }
 0x604   : > { %4321 = vmatprep.mubr.msk.f32.mxu0 %vm2580_vm3, %v2479_v17 }
 0x605   : > { %4322 = vmatmul.mubr.msk.f32.vlgmr.msra.gmra.mrb[22].mxu0 %vm2580_vm3, %v4278_v10 }
 0x606   : > { %4999 = vmatpush3.bf16.msra.mxu0 %v4996_v12  ;;  %v4285_v19 = vpop.f32.mrb[20].mxu0 }
 0x607   : > { %5001 = vmatprep.subr.bf16.mxu0 %v5000_v20  ;;  %v2554_v22 = vpop.f32.mrb[21].mxu0 }
 0x608   : > { %4340 = vmatprep.mubr.msk.f32.mxu0 %vm2580_vm3, %v2554_v22 }
 0x60a   : > { %5003 = vmatpush3.bf16.msra.mxu0 %v5000_v20 }
 0x60b   : > { %5005 = vmatprep.subr.bf16.mxu0 %v5004_v21 }
 0x60e   : > { %5007 = vmatpush3.bf16.msra.mxu0 %v5004_v21 }
 0x60f   : > { %5009 = vmatprep.subr.bf16.mxu0 %v5008_v29 }
 0x612   : > { %5011 = vmatpush3.bf16.msra.mxu0 %v5008_v29 }
 0x615   : > { %4341 = vmatmul.mubr.msk.f32.vlgmr.msra.gmra.mrb[22].mxu0 %vm2580_vm3, %v4285_v19 }
 0x616   : > { %4347 = vmatprep.mubr.msk.f32.mxu0 %vm1958_vm0, %v6797_v58  ;;  %v3740_v58 = vld [vmem:[%s7306_s12 + $0x28] sm:$0xff] }
 0x617   : > { %v5020_v41 = vpack.c.bf16 %v3740_v58, %v3739_v40 }
 0x6e8   : > { %v4342_v24 = vpop.f32.mrb[22].mxu0 }
 0x6e9   : > { %v2843_v31 = vadd.f32 %v4342_v24, %v3734_v30  ;;  %v2824_v32 = vpop.f32.mrb[23].mxu0 }
 0x6ea   : > { %v2842_v33 = vadd.f32 %v3734_v30, %v2824_v32 }
 0x6eb   : > { %vm2845_vm4 = vcmp.ge.f32.partialorder %v2843_v31, 0.0  ;;  %v2847_v34 = vmul.f32 0.2, %v2843_v31 }
 0x6ec   : > { %vm2844_vm5 = vcmp.ge.f32.partialorder %v2842_v33, 0.0  ;;  %v2846_v35 = vmul.f32 0.2, %v2842_v33 }
 0x6ed   : > { %v2849_v36 = vsel %vm2845_vm4, %v2843_v31, %v2847_v34 }
 0x6ee   : > { %v2848_v37 = vsel %vm2844_vm5, %v2842_v33, %v2846_v35 }
 0x6ef   : > { %v5012_v38 = vpack.c.bf16 %v2849_v36, %v2848_v37 }
 0x6f1   : > { %5013 = vmatprep.subr.bf16.mxu0 %v5012_v38 }
 0x6f2   : > { %5015 = vmatpush3.bf16.msra.mxu0 %v5012_v38 }
 0x6f3   : > { %5017 = vmatprep.subr.bf16.mxu0 %v5012_v38 }
 0x6f5   : > { %4348 = vmatmul.mubr.msk.f32.vlgmr.msra.gmra.mrb[24].mxu0 %vm1958_vm0, %v6829_v28  ;;  %v5028_v28 = vpack.c.bf16 %v3001_v46, %v3000_v45 }
 0x6f6   : > { %5019 = vmatpush3.bf16.msra.mxu0 %v5012_v38  ;;  %4354 = vmatprep.mubr.msk.f32.mxu0 %vm1958_vm0, %v6804_v59  ;;  %v3002_v59 = vld [vmem:[%s7306_s12 + $0x10] sm:$0xff] }
 0x6f7   : > { %5021 = vmatprep.subr.bf16.mxu0 %v5020_v41  ;;  %v5032_v49 = vpack.c.bf16 %v3003_v47, %v3002_v59 }
 0x6f9   : > { %4355 = vmatmul.mubr.msk.f32.vlgmr.msra.gmra.mrb[26].mxu0 %vm1958_vm0, %v6834_v15  ;;  %v3747_v15 = vld [vmem:[%s7306_s12 + $0x40] sm:$0xff] }
 0x6fa   : > { %5023 = vmatpush3.bf16.msra.mxu0 %v5020_v41  ;;  %4365 = vmatprep.mubr.msk.f32.mxu0 %vm3009_vm6, %v2848_v37  ;;  %v5036_v51 = vpack.c.bf16 %v3748_v50, %v3747_v15 }
 0x6fb   : > { %5025 = vmatprep.subr.bf16.mxu0 %v5024_v44 }
 0x6fe   : > { %5027 = vmatpush3.bf16.msra.mxu0 %v5024_v44 }
 0x6ff   : > { %5029 = vmatprep.subr.bf16.mxu0 %v5028_v28 }
 0x701   : > { %4366 = vmatmul.mubr.msk.f32.vlgmr.msra.gmra.mrb[28].mxu0 %vm3009_vm6, %v2849_v36 }
 0x702   : > { %5031 = vmatpush3.bf16.msra.mxu0 %v5028_v28 }
 0x703   : > { %5033 = vmatprep.subr.bf16.mxu0 %v5032_v49 }
 0x706   : > { %5035 = vmatpush3.bf16.msra.mxu0 %v5032_v49 }
 0x707   : > { %5037 = vmatprep.subr.bf16.mxu0 %v5036_v51 }
 0x7c8   : > { %v4349_v39 = vpop.f32.mrb[24].mxu0 }
 0x7c9   : > { %v2916_v55 = vpop.f32.mrb[25].mxu0 }
 0x7ca   : > { %4376 = vmatprep.mubr.msk.f32.mxu0 %vm3009_vm6, %v2916_v55 }
 0x7cb   : > { %4377 = vmatmul.mubr.msk.f32.vlgmr.msra.gmra.mrb[28].mxu0 %vm3009_vm6, %v4349_v39 }
 0x7cc   : > { %5039 = vmatpush3.bf16.msra.mxu0 %v5036_v51  ;;  %v4356_v57 = vpop.f32.mrb[26].mxu0 }
 0x7cd   : > { %5041 = vmatprep.subr.bf16.mxu0 %v5040_v56  ;;  %v2991_v60 = vpop.f32.mrb[27].mxu0 }
 0x7ce   : > { %4387 = vmatprep.mubr.msk.f32.mxu0 %vm3009_vm6, %v2991_v60 }
 0x7d0   : > { %5043 = vmatpush3.bf16.msra.mxu0 %v5040_v56 }
 0x7d1   : > { %5045 = vmatprep.subr.bf16.mxu0 %v5044_v63 }
 0x7d3   : > { %4388 = vmatmul.mubr.msk.f32.vlgmr.msra.gmra.mrb[28].mxu0 %vm3009_vm6, %v4356_v57 }
 0x7d4   : > { %5047 = vmatpush3.bf16.msra.mxu0 %v5044_v63 }
 0x7d5   : > { %5049 = vmatprep.subr.bf16.mxu0 %v5048_v2 }
 0x8a6   : > { %v4389_v25 = vpop.f32.mrb[28].mxu0 }
 0x8a7   : > { %v3268_v4 = vadd.f32 %v4389_v25, %v3753_v3  ;;  %v3249_v53 = vpop.f32.mrb[29].mxu0 }
 0x8a8   : > { %v3267_v5 = vadd.f32 %v3753_v3, %v3249_v53 }
 0x8a9   : > { %v3272_v48 = vmul.f32 0.2, %v3268_v4  ;;  %vm3270_vm7 = vcmp.ge.f32.partialorder %v3268_v4, 0.0 }
 0x8aa   : > { %vm3269_vm8 = vcmp.ge.f32.partialorder %v3267_v5, 0.0  ;;  %v3271_v27 = vmul.f32 0.2, %v3267_v5 }
 0x8ab   : > { %v3274_v7 = vsel %vm3270_vm7, %v3268_v4, %v3272_v48 }
 0x8ac   : > { %v3273_v6 = vsel %vm3269_vm8, %v3267_v5, %v3271_v27 }
 0x8ad   : > { %4394 = vmatprep.mubr.msk.f32.mxu0 %vm1958_vm0, %v3273_v6 }
 0x8ae   : > { %4395 = vmatmul.mubr.msk.f32.vlgmr.msra.gmra.mrb[30].mxu0 %vm1958_vm0, %v3274_v7 }
 0x8af   : > { %5051 = vmatpush3.bf16.msra.mxu0 %v5048_v2  ;;  %4401 = vmatprep.mubr.msk.f32.mxu0 %vm1958_vm0, %v3273_v6 }
 0x8b2   : > { %4402 = vmatmul.mubr.msk.f32.vlgmr.msra.gmra.mrb[32].mxu0 %vm1958_vm0, %v3274_v7 }
 0x981   : > { %v4396_v9 = vpop.f32.mrb[30].mxu0 }
 0x982   : > { %v7148_v11 = vadd.f32 %v4396_v9, %v3754_v8  ;;  %v3356_v12 = vpop.f32.mrb[31].mxu0 }
 0x983   : > { %v7150_v14 = vadd.f32 %v3754_v8, %v3356_v12 }
 0x984   : > { %3464 = vst [vmem:[%s675_s22 + $0x8] sm:$0xff] %v7148_v11 }
 0x985   : > { %3463 = vst [vmem:[%s675_s22] sm:$0xff] %v7150_v14  ;;  %v4403_v10 = vpop.f32.mrb[32].mxu0 }
 0x986   : > { %v3446_v17 = vadd.f32 %v4403_v10, %v3757_v16  ;;  %v3440_v20 = vpop.f32.mrb[33].mxu0 }
 0x987   : > { %5150 = shalt.err (!%p5147_p3)
}
 0x988   : > { %s5151_s22 = scalar_lea.hbm %s7159_s3, 256  ;;  %s5155_s26 = scalar_lea.hbm %s7314_s20, 512 }
 0x989   : > { %p5152_p4 = scmp.ne.s32.totalorder %s7159_s3, %s5151_s22  ;;  %p5156_p9 = scmp.lt.u32.totalorder %s7159_s3, %s7314_s20 }
 0x98a   : > { %p5157_p10 = scmp.lt.u32.totalorder %s5155_s26, %s5151_s22  ;;  %p5159_p12 = scmp.lt.u32.totalorder %s5151_s22, %s7159_s3 }
 0x98b   : > { %p5153_p7 = pnand %p5152_p4, %p5416_p5 }
 0x98c   : > { %p5158_p11 = por %p5157_p10, %p5156_p9 }
 0x98d   : > { %p5154_p8 = pneg %p5153_p7 }
 0x98e   : > { %p5160_p13 = por %p5159_p12, %p5158_p11 }
 0x990   : > { %p5161_p0 = pnand %p5160_p13, %p5154_p8 }
 0x992   : > { %5164 = shalt.err (!%p5161_p0)
}
 0x993   : > { %s7332_s18 = smov 128   ;;  %s7334_s28 = smov 8   ;;  %v3441_v18 = vadd.f32 %v3757_v16, %v3440_v20  ;;  %v3452_v13 = vmul.f32 0.5, %v3446_v17  ;;  %3466 = vst [vmem:[%s7163_s19 + $0x8] sm:$0xff] %v3446_v17 }
 0x994   : > { %5073 = dma.vmem_to_hbm [thread:$0]  (%p5416_p5), %s7146_s21, 256, %s7159_s3, %s7167_s2, %s7332_s18, %s7332_s18, %s7334_s28  }
 0x995   : > { %s7366_s0 = sshll.u32 %s7163_s19, 4  ;;  %s7367_s1 = sld [smem:[#allocation26_spill]]  ;;  %v3451_v19 = vmul.f32 0.5, %v3441_v18  ;;  %3465 = vst [vmem:[%s7163_s19] sm:$0xff] %v3441_v18  ;;  %v3455_v21 = vmul.f32 1.442695, %v3452_v13  ;;  %s7196_s0 = int_to_ptr.vmem [resolvable:$true] %s7366_s0 }
 0x996   : > { %s5165_s4 = scalar_lea.vmem %s7196_s0, 256  ;;  %s5264_s21 = smov [#allocation6]  }
 0x997   : > { %p5166_p1 = scmp.ne.s32.totalorder %s7196_s0, %s5165_s4  ;;  %s5169_s3 = sshll.u32 %s5264_s21, 4  ;;  %s5170_s3 = int_to_ptr.vmem [resolvable:$false] %s5169_s3 }
 0x998   : > { %s5171_s18 = scalar_lea.vmem %s5170_s3, 512  ;;  %p5172_p4 = scmp.lt.s32.totalorder %s7196_s0, %s5170_s3 }
 0x999   : > { %p5167_p2 = pnand %p5166_p1, %p5416_p5  ;;  %p5173_p7 = scmp.lt.s32.totalorder %s5171_s18, %s5165_s4 }
 0x99b   : > { %s7202_s26 = scalar_lea.hbm %s7367_s1, %s7144_s30  ;;  %p5168_p3 = pneg %p5167_p2 }
 0x99c   : > { %p5174_p8 = por %p5173_p7, %p5172_p4 }
 0x99e   : > { %p5175_p9 = pnand %p5174_p8, %p5168_p3 }
 0x9a0   : > { %5178 = shalt.err (!%p5175_p9)
}
 0x9a1   : > { %s5179_s19 = scalar_lea.hbm %s7202_s26, 256  ;;  %s5183_s21 = scalar_lea.hbm %s7367_s1, 512 }
 0x9a2   : > { %p5180_p10 = scmp.ne.s32.totalorder %s7202_s26, %s5179_s19  ;;  %p5184_p13 = scmp.lt.u32.totalorder %s7202_s26, %s7367_s1 }
 0x9a3   : > { %p5185_p0 = scmp.lt.u32.totalorder %s5183_s21, %s5179_s19  ;;  %p5187_p2 = scmp.lt.u32.totalorder %s5179_s19, %s7202_s26 }
 0x9a4   : > { %p5181_p11 = pnand %p5180_p10, %p5416_p5 }
 0x9a5   : > { %p5186_p1 = por %p5185_p0, %p5184_p13 }
 0x9a6   : > { %p5182_p12 = pneg %p5181_p11 }
 0x9a7   : > { %p5188_p3 = por %p5187_p2, %p5186_p1 }
 0x9a9   : > { %p5189_p4 = pnand %p5188_p3, %p5182_p12 }
 0x9ab   : > { %5192 = shalt.err (!%p5189_p4)
}
 0x9ac   : > { %s7368_s18 = smov 8   ;;  %s7369_s4 = smov 128   ;;  %v3453_v22 = vmul.f32 1.442695, %v3451_v19  ;;  %5127 = vpow2.f32 %v3455_v21 }
 0x9ad   : > { %s7370_s29 = sld [smem:[#allocation15_spill]]  ;;  %s7371_s21 = sld [smem:[#allocation24_spill]] }
 0x9ae   : > { %5074 = dma.vmem_to_hbm [thread:$0]  (%p5416_p5), %s7196_s0, 256, %s7202_s26, %s7167_s2, %s7369_s4, %s7369_s4, %s7368_s18   ;;  %5129 = vpow2.f32 %v3453_v22 }
 0x9af   : > { %s668_s1 = scalar_lea.vmem [#allocation2], %s7136_s27  ;;  %s7372_s26 = sld [smem:[#allocation25_spill]] }
 0x9b0   : > { %s3491_s6 = sshll.u32 %s668_s1, 4  ;;  %s7374_s27 = sand.u32 1, %s5251_s25   ;;  %s7244_s6 = int_to_ptr.vmem [resolvable:$true] %s3491_s6 }
 0x9b1   : > { %s5193_s19 = scalar_lea.vmem %s7244_s6, 256  ;;  %s5265_s22 = smov [#allocation2]  }
 0x9b2   : > { %p5194_p7 = scmp.ne.s32.totalorder %s7244_s6, %s5193_s19 }
 0x9b3   : > { %s3772_s28 = sshll.u32 %s7370_s29, 4 }
 0x9b4   : > { %s692_s3 = scalar_lea.vmem %s7371_s21, %s3772_s28  ;;  %s7248_s28 = scalar_lea.sflag [#allocation3], %s7374_s27 }
 0x9b5   : > { %v3450_v23 = vld [vmem:[%s692_s3 + $0x8] sm:$0xff]  ;;  %v3449_v26 = vld [vmem:[%s692_s3] sm:$0xff]  ;;  %s7373_s29 = smov %s7372_s26  ;;  %s7242_s7 = scalar_lea.hbm %s7372_s26, %s7144_s30 }
 0x9b6   : > { %v5128_v29 = vpop.eup %5127  ;;  %p5195_p8 = pnand %p5194_p7, %p5416_p5  ;;  %s5197_s21 = sshll.u32 %s5265_s22, 4  ;;  %s5198_s21 = int_to_ptr.vmem [resolvable:$false] %s5197_s21 }
 0x9b7   : > { %v3458_v24 = vmul.f32 %v5128_v29, %v3450_v23  ;;  %s5199_s30 = scalar_lea.vmem %s5198_s21, 512  ;;  %p5200_p10 = scmp.lt.s32.totalorder %s7244_s6, %s5198_s21 }
 0x9b8   : > { %v5130_v30 = vpop.eup %5129  ;;  %p5196_p9 = pneg %p5195_p8  ;;  %p5201_p11 = scmp.lt.s32.totalorder %s5199_s30, %s5193_s19 }
 0x9b9   : > { %v3457_v31 = vmul.f32 %v5130_v30, %v3449_v26  ;;  %v3460_v32 = vadd.f32 %v3458_v24, %v7148_v11 }
 0x9ba   : > { %p5202_p12 = por %p5201_p11, %p5200_p10 }
 0x9bb   : > { %v3459_v33 = vadd.f32 %v3457_v31, %v7150_v14  ;;  %3462 = vst [vmem:[%s668_s1 + $0x8] sm:$0xff] %v3460_v32 }
 0x9bc   : > { %p5203_p13 = pnand %p5202_p12, %p5196_p9 }
 0x9bd   : > { %3461 = vst [vmem:[%s668_s1] sm:$0xff] %v3459_v33 }
 0x9be   : > { %5206 = shalt.err (!%p5203_p13)
}
 0x9bf   : > { %s5207_s1 = scalar_lea.hbm %s7242_s7, 256  ;;  %s5211_s0 = scalar_lea.hbm %s7373_s29, 512 }
 0x9c0   : > { %p5208_p0 = scmp.ne.s32.totalorder %s7242_s7, %s5207_s1  ;;  %p5212_p3 = scmp.lt.u32.totalorder %s7242_s7, %s7373_s29 }
 0x9c1   : > { %p5213_p4 = scmp.lt.u32.totalorder %s5211_s0, %s5207_s1  ;;  %p5215_p8 = scmp.lt.u32.totalorder %s5207_s1, %s7242_s7 }
 0x9c2   : > { %p5209_p1 = pnand %p5208_p0, %p5416_p5 }
 0x9c3   : > { %p5214_p7 = por %p5213_p4, %p5212_p3 }
 0x9c4   : > { %p5210_p2 = pneg %p5209_p1 }
 0x9c5   : > { %p5216_p9 = por %p5215_p8, %p5214_p7 }
 0x9c7   : > { %p5217_p10 = pnand %p5216_p9, %p5210_p2 }
 0x9c9   : > { %5220 = shalt.err (!%p5217_p10)
}
 0x9ca   : > { %5072 = dma.vmem_to_hbm [thread:$0]  (%p5416_p5), %s7244_s6, 256, %s7242_s7, %s7248_s28, %s7369_s4, %s7369_s4, %s7368_s18  }
 0x9cb PF: > { %s7375_s19 = sld [smem:[#allocation11_spill]]  ;;  %s7376_s22 = sld [smem:[#allocation9_spill]] }
 0x9d1   : > { %p5088_p11 = scmp.ge.s32.totalorder %s7375_s19, 2  ;;  %s3538_s30 = sand.u32 1, %s7376_s22  }
 0x9d2   : > { %s3539_s1 = scalar_lea.sflag [#allocation3], %s3538_s30 }
 0x9d3   : > { %p5079_p12 = pnand %p5088_p11, %p5420_p6 }
 0x9d5   : > { %5238 = dma.done.wait (!%p5079_p12), %s3539_s1, 256  }
 0x9d6   : > { %5240 = vsyncadd (!%p5079_p12), %s3539_s1, 4294967040  ;;  %s7378_s5 = sadd.s32 4294967294, %s7375_s19  }
 0x9d7   : > { %s3547_s3 = sand.u32 1, %s7378_s5  }
 0x9d8   : > { %s3548_s2 = scalar_lea.sflag [#allocation5], %s3547_s3 }
 0x9d9   : > { %5242 = dma.done.wait (!%p5079_p12), %s3548_s2, 512  }
 0x9da   : > { %5244 = vsyncadd (!%p5079_p12), %s3548_s2, 4294966784  ;;  %s7379_s27 = sld [smem:[#allocation12_spill]]  ;;  %s7380_s6 = sld [smem:[#allocation10_spill]] }
 0x9db   : > { %s7381_s26 = sld [smem:[#allocation13_spill]]  ;;  %s7382_s2 = smov %s5251_s25 }
 0x9e0   : > { %p35_p5 = scmp.ge.s32.totalorder %s7379_s27, 4   ;;  %s7383_s25 = smov %s7380_s6 }
 0x9e2   :  { %37 = sbr.rel (!%p35_p5) target bundleno = 17 (0x11), region = 172 }
 0x9e9   :  { %3562 = vsyncpa [#allocation3], 1 }
 0x9ea   :  { %3564 = vsyncpa [#allocation3 + $0x1], 1 }
 0x9eb   :  { %3565 = vsyncpa [#allocation5], 1 }
 0x9ec   :  { %3567 = vsyncpa [#allocation5 + $0x1], 1 }

</bundles_post_ra>
